<compile_context>
chip_gen: v5e
topology: v5e:2x2
jax: 0.10.0
libtpu: 0.0.40
codegen_flags: <defaults>
</compile_context>

<pallas_src>
import functools

import jax
import jax.numpy as jnp
from jax import lax
from jax.experimental import pallas as pl
from jax.experimental.pallas import tpu as pltpu


def _pick_row_tile(c, *, multiple=16, cap=512):
    """Largest divisor of c that is a multiple of `multiple`, <= cap and gives
    >= 2 grid steps; falls back to the full dimension (always legal)."""
    for t in range(min(cap, c // 2), multiple - 1, -1):
        if c % t == 0 and t % multiple == 0:
            return t
    return c


def _fused_kernel(x_aug_ref, w1_ref, x303_ref, w2_ref, gamma_ref, beta_ref,
                  x297_ref, out_ref, y_ref, *, eps, inv_p):
    # ---- Step 0 only: SE gate + gating multiply, kept resident in VMEM ------
    #   x_aug_ref: (1, K) f32  = [x305, 1]      w1_ref: (C, K) bf16 = [w1 | b1]
    #   x303_ref:  (C, P) f32                    y_ref:  (C, P) bf16 scratch
    @pl.when(pl.program_id(0) == 0)
    def _():
        s = jnp.maximum(x_aug_ref[...], 0.0)                        # relu, (1, K)
        w1f = w1_ref[...].astype(jnp.float32)                       # (C, K)
        pre = jnp.sum(w1f * s, axis=1, keepdims=True)               # (C, 1) (+bias folded)
        se = jax.nn.sigmoid(pre)                                    # (C, 1)
        y_ref[...] = (x303_ref[...] * se).astype(y_ref.dtype)       # (C, P) bf16

    # ---- Every step: one output-channel row-tile of the 1392->1392 conv -----
    z = jnp.dot(w2_ref[...], y_ref[...],
                preferred_element_type=jnp.float32)                 # (TM, P) f32

    # Training-mode BatchNorm: each row is a complete channel (full H*W), so
    # per-channel batch statistics are exact inside the tile. One pass.
    mean = jnp.sum(z, axis=1, keepdims=True) * inv_p                # (TM, 1)
    ex2 = jnp.sum(z * z, axis=1, keepdims=True) * inv_p
    var = jnp.maximum(ex2 - mean * mean, 0.0)
    bn = (z - mean) * lax.rsqrt(var + eps) * gamma_ref[...] + beta_ref[...]
    out_ref[...] = x297_ref[...] + bn


def module_forward(x305, x303, x297, params, *, eps=1e-5,
                   compute_dtype=jnp.bfloat16):
    """x305: (1, Cin, 1, 1); x303, x297: (1, C, H, W)  — NCHW float32."""
    N, Cin = x305.shape[0], x305.shape[1]
    _, C, H, W = x303.shape
    assert N == 1 and x303.shape[0] == 1 and x297.shape[0] == 1, \
        "kernel assumes batch 1 (as in the reference module)"
    P = H * W
    K = Cin + 1   # conv1 bias folded into the gate contraction

    # Parameter prep (weights used directly in (out, in) form; no transposes).
    w1 = jnp.reshape(params["w1"], (C, Cin)).astype(jnp.float32)
    b1 = jnp.reshape(params["b1"], (C,)).astype(jnp.float32)
    w2 = jnp.reshape(params["w2"], (C, C))
    gamma = jnp.reshape(params["gamma"], (C, 1)).astype(jnp.float32)
    beta = jnp.reshape(params["beta"], (C, 1)).astype(jnp.float32)

    # Augmented gate operands: [w1 | b1] . [relu(x305); 1]  (relu(1) == 1).
    w1_aug = jnp.concatenate([w1, b1[:, None]], axis=1).astype(compute_dtype)  # (C, K)
    x_aug = jnp.concatenate(
        [jnp.reshape(x305, (1, Cin)).astype(jnp.float32),
         jnp.ones((1, 1), jnp.float32)], axis=1)                               # (1, K)

    # Free relayouts: NCHW with N == 1 -> (C, H*W); no pads, no transposes.
    x303_2d = jnp.reshape(x303, (C, P))
    x297_2d = jnp.reshape(x297, (C, P))
    w2_c = w2.astype(compute_dtype)   # bf16 weight for the big MXU matmul

    TM = _pick_row_tile(C)            # e.g. C=1392 -> TM=464 (3 steps)
    grid = (C // TM,)
    itm = jnp.dtype(compute_dtype).itemsize

    out_2d = pl.pallas_call(
        functools.partial(_fused_kernel, eps=float(eps), inv_p=1.0 / float(P)),
        grid=grid,
        in_specs=[
            pl.BlockSpec((1, K), lambda j: (0, 0)),       # x_aug   (resident)
            pl.BlockSpec((C, K), lambda j: (0, 0)),       # w1_aug  (resident, bf16)
            pl.BlockSpec((C, P), lambda j: (0, 0)),       # x303    (resident)
            pl.BlockSpec((TM, C), lambda j: (j, 0)),      # w2 rows (pipelined, bf16)
            pl.BlockSpec((TM, 1), lambda j: (j, 0)),      # gamma
            pl.BlockSpec((TM, 1), lambda j: (j, 0)),      # beta
            pl.BlockSpec((TM, P), lambda j: (j, 0)),      # x297 rows
        ],
        out_specs=pl.BlockSpec((TM, P), lambda j: (j, 0)),
        out_shape=jax.ShapeDtypeStruct((C, P), jnp.float32),
        scratch_shapes=[pltpu.VMEM((C, P), compute_dtype)],   # gated map y
        compiler_params=pltpu.CompilerParams(
            # scratch y is written at step 0 and reused by later steps, so the
            # grid axis must execute sequentially on one core.
            dimension_semantics=("arbitrary",),
            vmem_limit_bytes=48 * 1024 * 1024),
        cost_estimate=pl.CostEstimate(
            flops=int(2 * C * C * P + 2 * C * K + 12 * C * P),
            transcendentals=int(2 * C),
            bytes_accessed=int(K * 4 + C * K * itm + C * C * itm
                               + 2 * C * 4 + 3 * C * P * 4)),
    )(x_aug, w1_aug, x303_2d, w2_c, gamma, beta, x297_2d)

    # Free reshape back to NCHW.
    return jnp.reshape(out_2d, (1, C, H, W))


def reference_forward(x305, x303, x297, params, *, eps=1e-5,
                      matmul_dtype=jnp.float32):
    """Pure-JAX reference (optionally with bf16 weights, matching the kernel)."""
    Cin = x305.shape[1]
    C = x303.shape[1]
    w1 = jnp.reshape(params["w1"], (C, Cin)).astype(jnp.float32)
    b1 = jnp.reshape(params["b1"], (C,)).astype(jnp.float32)
    w2 = jnp.reshape(params["w2"], (C, C))
    gamma = jnp.reshape(params["gamma"], (C,))
    beta = jnp.reshape(params["beta"], (C,))
    if matmul_dtype != jnp.float32:
        # mirror the kernel: gate weights (incl. folded bias) stored in bf16
        w1 = w1.astype(matmul_dtype).astype(jnp.float32)
        b1 = b1.astype(matmul_dtype).astype(jnp.float32)

    s = jnp.maximum(x305, 0.0)                                   # (1, Cin, 1, 1)
    pre = jnp.einsum("ncij,oc->noij", s, w1) + b1[None, :, None, None]
    se = jax.nn.sigmoid(pre)                                     # (1, C, 1, 1)
    y = se * x303
    z = jnp.einsum("nchw,oc->nohw", y.astype(matmul_dtype), w2.astype(matmul_dtype),
                   preferred_element_type=jnp.float32)
    mean = jnp.mean(z, axis=(0, 2, 3), keepdims=True)
    var = jnp.mean((z - mean) ** 2, axis=(0, 2, 3), keepdims=True)
    bn = (z - mean) * lax.rsqrt(var + eps)
    bn = bn * gamma[None, :, None, None] + beta[None, :, None, None]
    return x297 + bn
    # TODO(synk): BatchNorm running-stat (momentum) update is a training side
    # effect that the module forward does not return; not modeled here.


if __name__ == "__main__":
    # Small shapes consistent with the module structure
    # (original: Cin=348, Cout=1392, H=W=14, N=1  ->  here Cin=24, Cout=384, H=W=8).
    N, Cin, Cout, H, W = 1, 24, 384, 8, 8

    key = jax.random.PRNGKey(0)
    k1, k2, k3, k4, k5, k6, k7, k8 = jax.random.split(key, 8)

    x305 = jax.random.normal(k1, (N, Cin, 1, 1), dtype=jnp.float32)
    x303 = jax.random.normal(k2, (N, Cout, H, W), dtype=jnp.float32)
    x297 = jax.random.normal(k3, (N, Cout, H, W), dtype=jnp.float32)

    params = {
        "w1": jax.random.normal(k4, (Cout, Cin), dtype=jnp.float32) * 0.1,
        "b1": jax.random.normal(k5, (Cout,), dtype=jnp.float32) * 0.1,
        "w2": jax.random.normal(k6, (Cout, Cout), dtype=jnp.float32) * 0.1,
        "gamma": 1.0 + 0.1 * jax.random.normal(k7, (Cout,), dtype=jnp.float32),
        "beta": 0.1 * jax.random.normal(k8, (Cout,), dtype=jnp.float32),
    }

    fwd = jax.jit(module_forward)
    out = jax.block_until_ready(fwd(x305, x303, x297, params))

    # Tight check against a reference with matching (bf16-weight) numerics.
    ref_bf16 = jax.block_until_ready(
        reference_forward(x305, x303, x297, params, matmul_dtype=jnp.bfloat16))
    # Loose semantic check against the pure-f32 reference (bf16 rounding noise).
    ref_f32 = jax.block_until_ready(
        reference_forward(x305, x303, x297, params, matmul_dtype=jnp.float32))

    assert out.shape == (N, Cout, H, W)
    assert jnp.allclose(out, ref_bf16, rtol=5e-3, atol=5e-3), \
        "mismatch vs matched-precision reference"
    assert jnp.allclose(out, ref_f32, rtol=2e-2, atol=2e-2), \
        "mismatch vs f32 reference"

    print("KERNEL_OK")
</pallas_src>

<mosaic_0001>
module attributes {stable_mosaic.version = 11 : i64} {
  func.func @_fused_kernel(%arg0: i32, %arg1: memref<1x25xf32, #tpu.memory_space<vmem>>, %arg2: memref<384x25xbf16, #tpu.memory_space<vmem>>, %arg3: memref<384x64xf32, #tpu.memory_space<vmem>>, %arg4: memref<192x384xbf16, #tpu.memory_space<vmem>>, %arg5: memref<192x1xf32, #tpu.memory_space<vmem>>, %arg6: memref<192x1xf32, #tpu.memory_space<vmem>>, %arg7: memref<192x64xf32, #tpu.memory_space<vmem>>, %arg8: memref<192x64xf32, #tpu.memory_space<vmem>>, %arg9: memref<384x64xbf16, #tpu.memory_space<vmem>>) attributes {dimension_semantics = [#tpu.dimension_semantics<arbitrary>], iteration_bounds = array<i64: 2>, scalar_prefetch = 0 : i64, scratch_operands = 1 : i64, tpu.core_type = #tpu.core_type<tc>, window_params = [{pipeline_mode = #tpu.pipeline_mode<synchronous>, transform_indices = @transform_0, window_bounds = array<i64: 1, 25>}, {pipeline_mode = #tpu.pipeline_mode<synchronous>, transform_indices = @transform_1, window_bounds = array<i64: 384, 25>}, {pipeline_mode = #tpu.pipeline_mode<synchronous>, transform_indices = @transform_2, window_bounds = array<i64: 384, 64>}, {transform_indices = @transform_3, window_bounds = array<i64: 192, 384>}, {transform_indices = @transform_4, window_bounds = array<i64: 192, 1>}, {transform_indices = @transform_5, window_bounds = array<i64: 192, 1>}, {transform_indices = @transform_6, window_bounds = array<i64: 192, 64>}, {transform_indices = @transform_7, window_bounds = array<i64: 192, 64>}]} {
    %c0_i32 = arith.constant 0 : i32
    %0 = arith.cmpi eq, %arg0, %c0_i32 : i32
    %1 = arith.extui %0 : i1 to i32
    %c0_i32_0 = arith.constant 0 : i32
    %2 = arith.cmpi ne, %1, %c0_i32_0 : i32
    scf.if %2 {
      %c0_18 = arith.constant 0 : index
      %c0_19 = arith.constant 0 : index
      %35 = vector.load %arg1[%c0_18, %c0_19] : memref<1x25xf32, #tpu.memory_space<vmem>>, vector<1x25xf32>
      %cst_20 = arith.constant 0.000000e+00 : f32
      %36 = vector.broadcast %cst_20 : f32 to vector<1x25xf32>
      %37 = arith.maximumf %35, %36 : vector<1x25xf32>
      %c0_21 = arith.constant 0 : index
      %c0_22 = arith.constant 0 : index
      %38 = vector.load %arg2[%c0_21, %c0_22] : memref<384x25xbf16, #tpu.memory_space<vmem>>, vector<384x25xbf16>
      %39 = arith.extf %38 : vector<384x25xbf16> to vector<384x25xf32>
      %40 = vector.broadcast %37 : vector<1x25xf32> to vector<384x25xf32>
      %41 = arith.mulf %39, %40 : vector<384x25xf32>
      %cst_23 = arith.constant dense<0.000000e+00> : vector<384xf32>
      %42 = vector.multi_reduction <add>, %41, %cst_23 [1] : vector<384x25xf32> to vector<384xf32>
      %43 = vector.shape_cast %42 : vector<384xf32> to vector<384x1xf32>
      %44 = arith.negf %43 : vector<384x1xf32>
      %45 = math.exp %44 : vector<384x1xf32>
      %cst_24 = arith.constant 1.000000e+00 : f32
      %46 = vector.broadcast %cst_24 : f32 to vector<384x1xf32>
      %47 = arith.addf %46, %45 : vector<384x1xf32>
      %48 = arith.divf %46, %47 : vector<384x1xf32>
      %c0_25 = arith.constant 0 : index
      %c0_26 = arith.constant 0 : index
      %49 = vector.load %arg3[%c0_25, %c0_26] : memref<384x64xf32, #tpu.memory_space<vmem>>, vector<384x64xf32>
      %50 = vector.broadcast %48 : vector<384x1xf32> to vector<384x64xf32>
      %51 = arith.mulf %49, %50 : vector<384x64xf32>
      %52 = arith.truncf %51 : vector<384x64xf32> to vector<384x64xbf16>
      %c0_27 = arith.constant 0 : index
      %c0_28 = arith.constant 0 : index
      %53 = vector.load %arg9[%c0_27, %c0_28] : memref<384x64xbf16, #tpu.memory_space<vmem>>, vector<384x64xbf16>
      tpu.vector_store %arg9[%c0_27, %c0_28], %52 {strides = array<i32>} : memref<384x64xbf16, #tpu.memory_space<vmem>>, vector<384x64xbf16>,
    } else {
    }
    %c0 = arith.constant 0 : index
    %c0_1 = arith.constant 0 : index
    %3 = vector.load %arg4[%c0, %c0_1] : memref<192x384xbf16, #tpu.memory_space<vmem>>, vector<192x384xbf16>
    %c0_2 = arith.constant 0 : index
    %c0_3 = arith.constant 0 : index
    %4 = vector.load %arg9[%c0_2, %c0_3] : memref<384x64xbf16, #tpu.memory_space<vmem>>, vector<384x64xbf16>
    %cst = arith.constant dense<0.000000e+00> : vector<192x64xf32>
    %5 = tpu.matmul %3, %4, %cst {dimension_numbers = #tpu.dot_dimension_numbers<[1], [0], [0], [1], [0, 0, 1, 1], [], []>} : vector<192x384xbf16>, vector<384x64xbf16>, vector<192x64xf32> -> vector<192x64xf32>
    %cst_4 = arith.constant dense<0.000000e+00> : vector<192xf32>
    %6 = vector.multi_reduction <add>, %5, %cst_4 [1] : vector<192x64xf32> to vector<192xf32>
    %7 = vector.shape_cast %6 : vector<192xf32> to vector<192x1xf32>
    %cst_5 = arith.constant 1.562500e-02 : f32
    %8 = vector.broadcast %cst_5 : f32 to vector<192x1xf32>
    %9 = arith.mulf %7, %8 : vector<192x1xf32>
    %10 = arith.mulf %5, %5 : vector<192x64xf32>
    %cst_6 = arith.constant dense<0.000000e+00> : vector<192xf32>
    %11 = vector.multi_reduction <add>, %10, %cst_6 [1] : vector<192x64xf32> to vector<192xf32>
    %12 = vector.shape_cast %11 : vector<192xf32> to vector<192x1xf32>
    %cst_7 = arith.constant 1.562500e-02 : f32
    %13 = vector.broadcast %cst_7 : f32 to vector<192x1xf32>
    %14 = arith.mulf %12, %13 : vector<192x1xf32>
    %15 = arith.mulf %9, %9 : vector<192x1xf32>
    %16 = arith.subf %14, %15 : vector<192x1xf32>
    %cst_8 = arith.constant 0.000000e+00 : f32
    %17 = vector.broadcast %cst_8 : f32 to vector<192x1xf32>
    %18 = arith.maximumf %16, %17 : vector<192x1xf32>
    %19 = vector.broadcast %9 : vector<192x1xf32> to vector<192x64xf32>
    %20 = arith.subf %5, %19 : vector<192x64xf32>
    %cst_9 = arith.constant 9.99999974E-6 : f32
    %21 = vector.broadcast %cst_9 : f32 to vector<192x1xf32>
    %22 = arith.addf %18, %21 : vector<192x1xf32>
    %23 = math.rsqrt %22 : vector<192x1xf32>
    %24 = vector.broadcast %23 : vector<192x1xf32> to vector<192x64xf32>
    %25 = arith.mulf %20, %24 : vector<192x64xf32>
    %c0_10 = arith.constant 0 : index
    %c0_11 = arith.constant 0 : index
    %26 = vector.load %arg5[%c0_10, %c0_11] : memref<192x1xf32, #tpu.memory_space<vmem>>, vector<192x1xf32>
    %27 = vector.broadcast %26 : vector<192x1xf32> to vector<192x64xf32>
    %28 = arith.mulf %25, %27 : vector<192x64xf32>
    %c0_12 = arith.constant 0 : index
    %c0_13 = arith.constant 0 : index
    %29 = vector.load %arg6[%c0_12, %c0_13] : memref<192x1xf32, #tpu.memory_space<vmem>>, vector<192x1xf32>
    %30 = vector.broadcast %29 : vector<192x1xf32> to vector<192x64xf32>
    %31 = arith.addf %28, %30 : vector<192x64xf32>
    %c0_14 = arith.constant 0 : index
    %c0_15 = arith.constant 0 : index
    %32 = vector.load %arg7[%c0_14, %c0_15] : memref<192x64xf32, #tpu.memory_space<vmem>>, vector<192x64xf32>
    %33 = arith.addf %32, %31 : vector<192x64xf32>
    %c0_16 = arith.constant 0 : index
    %c0_17 = arith.constant 0 : index
    %34 = vector.load %arg8[%c0_16, %c0_17] : memref<192x64xf32, #tpu.memory_space<vmem>>, vector<192x64xf32>
    tpu.vector_store %arg8[%c0_16, %c0_17], %33 {strides = array<i32>} : memref<192x64xf32, #tpu.memory_space<vmem>>, vector<192x64xf32>,
    return
  }
  func.func @transform_0(%arg0: i32) -> (i32, i32) {
    %c0_i32 = arith.constant 0 : i32
    %c0_i32_0 = arith.constant 0 : i32
    %c0_i32_1 = arith.constant 0 : i32
    return %c0_i32, %c0_i32_0 : i32, i32
  }
  func.func @transform_1(%arg0: i32) -> (i32, i32) {
    %c0_i32 = arith.constant 0 : i32
    %c0_i32_0 = arith.constant 0 : i32
    %c0_i32_1 = arith.constant 0 : i32
    return %c0_i32, %c0_i32_0 : i32, i32
  }
  func.func @transform_2(%arg0: i32) -> (i32, i32) {
    %c0_i32 = arith.constant 0 : i32
    %c0_i32_0 = arith.constant 0 : i32
    %c0_i32_1 = arith.constant 0 : i32
    return %c0_i32, %c0_i32_0 : i32, i32
  }
  func.func @transform_3(%arg0: i32) -> (i32, i32) {
    %c0_i32 = arith.constant 0 : i32
    %c0_i32_0 = arith.constant 0 : i32
    return %arg0, %c0_i32 : i32, i32
  }
  func.func @transform_4(%arg0: i32) -> (i32, i32) {
    %c0_i32 = arith.constant 0 : i32
    %c0_i32_0 = arith.constant 0 : i32
    return %arg0, %c0_i32 : i32, i32
  }
  func.func @transform_5(%arg0: i32) -> (i32, i32) {
    %c0_i32 = arith.constant 0 : i32
    %c0_i32_0 = arith.constant 0 : i32
    return %arg0, %c0_i32 : i32, i32
  }
  func.func @transform_6(%arg0: i32) -> (i32, i32) {
    %c0_i32 = arith.constant 0 : i32
    %c0_i32_0 = arith.constant 0 : i32
    return %arg0, %c0_i32 : i32, i32
  }
  func.func @transform_7(%arg0: i32) -> (i32, i32) {
    %c0_i32 = arith.constant 0 : i32
    %c0_i32_0 = arith.constant 0 : i32
    return %arg0, %c0_i32 : i32, i32
  }
}

</mosaic_0001>

<bundles_post_ra>
// kernel: module_forward.1
= control target key start
LH: loop header
LB: loop body
LE: loop exit
PB: predicated region body
PF: predicated region fallthrough
CT: control target
= control target key end

     0   :  { %s4300_s24 = smov 0   ;;  %s6213_s0 = inlined_call_operand.vmem [shape: f32[1,25], index: 0, kind: input, shape index: {}]   ;;  %s6214_s1 = inlined_call_operand.vmem [shape: bf16[384,25], index: 1, kind: input, shape index: {}]   ;;  %s6215_s2 = inlined_call_operand.vmem [shape: f32[384,64], index: 2, kind: input, shape index: {}]   ;;  %s6216_s3 = inlined_call_operand.vmem [shape: bf16[384,384], index: 3, kind: input, shape index: {}]   ;;  %s6217_s4 = inlined_call_operand.vmem [shape: f32[384,1], index: 4, kind: input, shape index: {}]   ;;  %s6218_s5 = inlined_call_operand.vmem [shape: f32[384,1], index: 5, kind: input, shape index: {}]   ;;  %s6219_s6 = inlined_call_operand.vmem [shape: f32[384,64], index: 6, kind: input, shape index: {}]   ;;  %s6220_s7 = inlined_call_operand.vmem [shape: f32[384,64], index: 7, kind: output, shape index: {}]  }
   0x1 LB: > { %s3494_s25 = sadd.s32 4294967295, %s4257_s24   ;;  %p3498_p0 = scmp.ge.s32.totalorder %s4257_s24, 1  ;;  %s4257_s24 = sphi %s4300_s24, %s17_s24  }
   0x2   : > { %p272_p1 = scmp.lt.s32.totalorder %s4257_s24, 3 }
   0x4   : > { %p273_p2 = pnand %p3498_p0, %p272_p1 }
   0x6   : > { %276 = sbr.rel (%p273_p2) target bundleno = 877 (0x36d), region = 48 }
   0xb   : > { %s320_s26 = smul.u32 24, %s3494_s25  ;;  %p3504_p4 = scmp.ne.s32.totalorder %s3494_s25, 0 }
   0xd   : > { %p321_p3 = scmp.lt.s32.totalorder %s320_s26, 47 }
   0xf   : > { %s6359_s26 = smov (!%p321_p3, %s320_s26), 47  ;;  %354 = sbr.rel (%p3504_p4) target bundleno = 385 (0x181), region = 52 }
  0x10   : > { %s3998_s27 = smul.u32 12, %s6359_s26  ;;  %s3500_s28 = sshll.u32 %s6359_s26, 3 }
  0x11   : > { %s4311_s8 = scalar_lea.vmem %s6217_s4, %s3500_s28  ;;  %s4316_s11 = scalar_lea.vmem %s6218_s5, %s3500_s28 }
  0x12   : > { %s4321_s14 = scalar_lea.vmem %s6216_s3, %s3998_s27  ;;  %s4326_s17 = scalar_lea.vmem %s6219_s6, %s3500_s28 }
  0x13   : > { %s4331_s20 = scalar_lea.vmem %s6220_s7, %s3500_s28 }
  0x14   : > { %v355_v0 = vld [vmem:[%s6213_s0] sm:$0x1]  ;;  %v3952_v1 = vld [vmem:[%s6214_s1 + $0x10] sm:$0xff]   ;;  %v3951_v2 = vld [vmem:[%s6214_s1 + $0x8] sm:$0xff]   ;;  %vm504_vm0 = vcmask 203776   ;;  %vm1705_vm5 = vcmask 519168  }
  0x15   : > { %v356_v3 = vmax.f32 %v355_v0, 0.0  ;;  %v3865_v4 = vunpack.c.l.bf16 %v3952_v1  ;;  %v3861_v5 = vunpack.c.l.bf16 %v3951_v2  ;;  %v3856_v6 = vld [vmem:[%s6214_s1] sm:$0xff]   ;;  %v3866_v9 = vunpack.c.h.bf16 %v3952_v1  ;;  %v3953_v22 = vld [vmem:[%s6214_s1 + $0x18] sm:$0xff]   ;;  %v3955_v32 = vld [vmem:[%s6214_s1 + $0x28] sm:$0xff]  }
  0x16   : > { %v3857_v7 = vunpack.c.l.bf16 %v3856_v6  ;;  %v3862_v13 = vunpack.c.h.bf16 %v3951_v2  ;;  %v3858_v14 = vunpack.c.h.bf16 %v3856_v6  ;;  %v3954_v21 = vld [vmem:[%s6214_s1 + $0x20] sm:$0xff]   ;;  %v3870_v26 = vunpack.c.h.bf16 %v3953_v22  ;;  %v3957_v42 = vld [vmem:[%s6214_s1 + $0x38] sm:$0xff]   ;;  %v3956_v43 = vld [vmem:[%s6214_s1 + $0x30] sm:$0xff]  }
  0x17   : > { %v4345_v8 = vperm.slane %v356_v3, 0  ;;  %v3873_v25 = vunpack.c.l.bf16 %v3954_v21  ;;  %v3869_v28 = vunpack.c.l.bf16 %v3953_v22  ;;  %v3878_v35 = vunpack.c.h.bf16 %v3955_v32  ;;  %v3958_v53 = vld [vmem:[%s6214_s1 + $0x40] sm:$0xff]   ;;  %v3960_v63 = vld [vmem:[%s6214_s1 + $0x50] sm:$0xff]   ;;  %v3959_v0 = vld [vmem:[%s6214_s1 + $0x48] sm:$0xff]  }
  0x18   : > { %v3877_v36 = vunpack.c.l.bf16 %v3955_v32  ;;  %v3874_v38 = vunpack.c.h.bf16 %v3954_v21  ;;  %v3885_v46 = vunpack.c.l.bf16 %v3957_v42  ;;  %v3882_v47 = vunpack.c.h.bf16 %v3956_v43  ;;  %v3963_v21 = vld [vmem:[%s6214_s1 + $0x68] sm:$0xff]   ;;  %v3962_v22 = vld [vmem:[%s6214_s1 + $0x60] sm:$0xff]   ;;  %v3964_v32 = vld [vmem:[%s6214_s1 + $0x70] sm:$0xff]  }
  0x19   : > { %v460_v10 = vmul.f32 %v3865_v4, %v4345_v8  ;;  %v458_v11 = vmul.f32 %v3861_v5, %v4345_v8  ;;  %v456_v12 = vmul.f32 %v3857_v7, %v4345_v8  ;;  %v461_v18 = vmul.f32 %v3866_v9, %v4345_v8 }
  0x1a   : > { %v459_v19 = vmul.f32 %v3862_v13, %v4345_v8  ;;  %v457_v20 = vmul.f32 %v3858_v14, %v4345_v8  ;;  %v464_v29 = vmul.f32 %v3873_v25, %v4345_v8  ;;  %v463_v30 = vmul.f32 %v3870_v26, %v4345_v8 }
  0x1b   : > { %v517_v15 = vsel %vm504_vm0, %v460_v10, 0.0  ;;  %v511_v16 = vsel %vm504_vm0, %v458_v11, 0.0  ;;  %v505_v17 = vsel %vm504_vm0, %v456_v12, 0.0  ;;  %v520_v23 = vsel %vm504_vm0, %v461_v18, 0.0  ;;  %v3961_v11 = vld [vmem:[%s6214_s1 + $0x58] sm:$0xff]  }
  0x1c   : > { %518 = vadd.xlane.f32.xlu2 %v517_v15  ;;  %512 = vadd.xlane.f32.xlu1 %v511_v16  ;;  %v514_v24 = vsel %vm504_vm0, %v459_v19, 0.0  ;;  %v508_v27 = vsel %vm504_vm0, %v457_v20, 0.0  ;;  %v462_v31 = vmul.f32 %v3869_v28, %v4345_v8  ;;  %v529_v33 = vsel %vm504_vm0, %v464_v29, 0.0 }
  0x1d   : > { %506 = vadd.xlane.f32.xlu0 %v505_v17  ;;  %v526_v34 = vsel %vm504_vm0, %v463_v30, 0.0  ;;  %v467_v39 = vmul.f32 %v3878_v35, %v4345_v8  ;;  %v466_v40 = vmul.f32 %v3877_v36, %v4345_v8  ;;  %v465_v41 = vmul.f32 %v3874_v38, %v4345_v8 }
  0x1e   : > { %v523_v37 = vsel %vm504_vm0, %v462_v31, 0.0  ;;  %v3881_v49 = vunpack.c.l.bf16 %v3956_v43  ;;  %v470_v50 = vmul.f32 %v3885_v46, %v4345_v8  ;;  %v469_v51 = vmul.f32 %v3882_v47, %v4345_v8  ;;  %v3965_v43 = vld [vmem:[%s6214_s1 + $0x78] sm:$0xff]  }
  0x1f   : > { %v538_v44 = vsel %vm504_vm0, %v467_v39, 0.0  ;;  %v535_v45 = vsel %vm504_vm0, %v466_v40, 0.0  ;;  %v532_v48 = vsel %vm504_vm0, %v465_v41, 0.0  ;;  %v3890_v56 = vunpack.c.h.bf16 %v3958_v53 }
  0x20   : > { %v468_v52 = vmul.f32 %v3881_v49, %v4345_v8  ;;  %v547_v54 = vsel %vm504_vm0, %v470_v50, 0.0  ;;  %v544_v55 = vsel %vm504_vm0, %v469_v51, 0.0  ;;  %v3889_v57 = vunpack.c.l.bf16 %v3958_v53  ;;  %v3967_v53 = vld [vmem:[%s6214_s1 + $0x88] sm:$0xff]  }
  0x21   : > { %v3886_v59 = vunpack.c.h.bf16 %v3957_v42  ;;  %v473_v60 = vmul.f32 %v3890_v56, %v4345_v8  ;;  %v3897_v3 = vunpack.c.l.bf16 %v3960_v63  ;;  %v3894_v4 = vunpack.c.h.bf16 %v3959_v0  ;;  %v3966_v42 = vld [vmem:[%s6214_s1 + $0x80] sm:$0xff]  }
  0x22   : > { %v541_v58 = vsel %vm504_vm0, %v468_v52, 0.0  ;;  %v472_v61 = vmul.f32 %v3889_v57, %v4345_v8  ;;  %v3893_v6 = vunpack.c.l.bf16 %v3959_v0  ;;  %v3902_v14 = vunpack.c.h.bf16 %v3961_v11  ;;  %v3968_v0 = vld [vmem:[%s6214_s1 + $0x90] sm:$0xff]  }
  0x23   : > { %v471_v62 = vmul.f32 %v3886_v59, %v4345_v8  ;;  %v556_v1 = vsel %vm504_vm0, %v473_v60, 0.0  ;;  %v476_v7 = vmul.f32 %v3897_v3, %v4345_v8  ;;  %v475_v9 = vmul.f32 %v3894_v4, %v4345_v8 }
  0x24   : > { %521 = vadd.xlane.f32.xlu2 %v520_v23  ;;  %515 = vadd.xlane.f32.xlu1 %v514_v24  ;;  %v553_v2 = vsel %vm504_vm0, %v472_v61, 0.0  ;;  %v474_v10 = vmul.f32 %v3893_v6, %v4345_v8  ;;  %v3901_v15 = vunpack.c.l.bf16 %v3961_v11  ;;  %v3898_v17 = vunpack.c.h.bf16 %v3960_v63  ;;  %v3969_v63 = vld [vmem:[%s6214_s1 + $0x98] sm:$0xff]   ;;  %v3970_v11 = vld [vmem:[%s6214_s1 + $0xa0] sm:$0xff]  }
  0x25   : > { %509 = vadd.xlane.f32.xlu0 %v508_v27  ;;  %v550_v5 = vsel %vm504_vm0, %v471_v62, 0.0  ;;  %v565_v12 = vsel %vm504_vm0, %v476_v7, 0.0  ;;  %v562_v13 = vsel %vm504_vm0, %v475_v9, 0.0  ;;  %v479_v18 = vmul.f32 %v3902_v14, %v4345_v8 }
  0x26   : > { %v559_v16 = vsel %vm504_vm0, %v474_v10, 0.0  ;;  %v478_v19 = vmul.f32 %v3901_v15, %v4345_v8  ;;  %v477_v20 = vmul.f32 %v3898_v17, %v4345_v8  ;;  %v3909_v25 = vunpack.c.l.bf16 %v3963_v21 }
  0x27   : > { %v574_v23 = vsel %vm504_vm0, %v479_v18, 0.0  ;;  %v3906_v26 = vunpack.c.h.bf16 %v3962_v22  ;;  %v3905_v28 = vunpack.c.l.bf16 %v3962_v22  ;;  %v3914_v35 = vunpack.c.h.bf16 %v3964_v32  ;;  %v3971_v22 = vld [vmem:[%s6214_s1 + $0xa8] sm:$0xff]  }
  0x28   : > { %v571_v24 = vsel %vm504_vm0, %v478_v19, 0.0  ;;  %v568_v27 = vsel %vm504_vm0, %v477_v20, 0.0  ;;  %v482_v29 = vmul.f32 %v3909_v25, %v4345_v8  ;;  %v3913_v36 = vunpack.c.l.bf16 %v3964_v32  ;;  %v3973_v32 = vld [vmem:[%s6214_s1 + $0xb8] sm:$0xff]  }
  0x29   : > { %v481_v30 = vmul.f32 %v3906_v26, %v4345_v8  ;;  %v480_v31 = vmul.f32 %v3905_v28, %v4345_v8  ;;  %v3910_v38 = vunpack.c.h.bf16 %v3963_v21  ;;  %v485_v39 = vmul.f32 %v3914_v35, %v4345_v8  ;;  %v3972_v21 = vld [vmem:[%s6214_s1 + $0xb0] sm:$0xff]  }
  0x2a   : > { %v484_v40 = vmul.f32 %v3913_v36, %v4345_v8  ;;  %v3921_v46 = vunpack.c.l.bf16 %v3966_v42  ;;  %v3918_v47 = vunpack.c.h.bf16 %v3965_v43  ;;  %v3917_v49 = vunpack.c.l.bf16 %v3965_v43 }
  0x2b   : > { %v483_v41 = vmul.f32 %v3910_v38, %v4345_v8  ;;  %v3926_v56 = vunpack.c.h.bf16 %v3967_v53  ;;  %v3925_v57 = vunpack.c.l.bf16 %v3967_v53  ;;  %v3922_v59 = vunpack.c.h.bf16 %v3966_v42 }
  0x2c   : > { %530 = vadd.xlane.f32.xlu2 %v529_v33  ;;  %527 = vadd.xlane.f32.xlu1 %v526_v34  ;;  %v583_v33 = vsel %vm504_vm0, %v482_v29, 0.0  ;;  %v580_v34 = vsel %vm504_vm0, %v481_v30, 0.0  ;;  %v488_v50 = vmul.f32 %v3921_v46, %v4345_v8  ;;  %v487_v51 = vmul.f32 %v3918_v47, %v4345_v8 }
  0x2d   : > { %524 = vadd.xlane.f32.xlu0 %v523_v37  ;;  %v577_v37 = vsel %vm504_vm0, %v480_v31, 0.0  ;;  %v486_v52 = vmul.f32 %v3917_v49, %v4345_v8  ;;  %v491_v60 = vmul.f32 %v3926_v56, %v4345_v8  ;;  %v490_v61 = vmul.f32 %v3925_v57, %v4345_v8 }
  0x2e   : > { %v489_v62 = vmul.f32 %v3922_v59, %v4345_v8  ;;  %v3933_v3 = vunpack.c.l.bf16 %v3969_v63  ;;  %v3930_v4 = vunpack.c.h.bf16 %v3968_v0  ;;  %v3929_v6 = vunpack.c.l.bf16 %v3968_v0 }
  0x2f   : > { %v3938_v14 = vunpack.c.h.bf16 %v3970_v11  ;;  %v3937_v15 = vunpack.c.l.bf16 %v3970_v11  ;;  %v3934_v17 = vunpack.c.h.bf16 %v3969_v63  ;;  %v3945_v25 = vunpack.c.l.bf16 %v3972_v21 }
  0x30   : > { %v494_v7 = vmul.f32 %v3933_v3, %v4345_v8  ;;  %v493_v9 = vmul.f32 %v3930_v4, %v4345_v8  ;;  %v492_v10 = vmul.f32 %v3929_v6, %v4345_v8  ;;  %v3942_v26 = vunpack.c.h.bf16 %v3971_v22 }
  0x31   : > { %v497_v18 = vmul.f32 %v3938_v14, %v4345_v8  ;;  %v496_v19 = vmul.f32 %v3937_v15, %v4345_v8  ;;  %v495_v20 = vmul.f32 %v3934_v17, %v4345_v8  ;;  %v3941_v28 = vunpack.c.l.bf16 %v3971_v22 }
  0x32   : > { %v500_v29 = vmul.f32 %v3945_v25, %v4345_v8  ;;  %v499_v30 = vmul.f32 %v3942_v26, %v4345_v8  ;;  %v3950_v35 = vunpack.c.h.bf16 %v3973_v32  ;;  %v3949_v36 = vunpack.c.l.bf16 %v3973_v32 }
  0x33   : > { %v498_v31 = vmul.f32 %v3941_v28, %v4345_v8  ;;  %v3946_v38 = vunpack.c.h.bf16 %v3972_v21 }
  0x34   : > { %539 = vadd.xlane.f32.xlu2 %v538_v44  ;;  %536 = vadd.xlane.f32.xlu1 %v535_v45  ;;  %v592_v44 = vsel %vm504_vm0, %v485_v39, 0.0  ;;  %v589_v45 = vsel %vm504_vm0, %v484_v40, 0.0  ;;  %v503_v39 = vmul.f32 %v3950_v35, %v4345_v8  ;;  %v502_v40 = vmul.f32 %v3949_v36, %v4345_v8 }
  0x35   : > { %533 = vadd.xlane.f32.xlu0 %v532_v48  ;;  %v586_v48 = vsel %vm504_vm0, %v483_v41, 0.0  ;;  %v501_v41 = vmul.f32 %v3946_v38, %v4345_v8 }
  0x36   : > { %v643_v49 = vsel %vm504_vm0, %v502_v40, 0.0 }
  0x3c   : > { %548 = vadd.xlane.f32.xlu2 %v547_v54  ;;  %545 = vadd.xlane.f32.xlu1 %v544_v55  ;;  %v601_v54 = vsel %vm504_vm0, %v488_v50, 0.0  ;;  %v598_v55 = vsel %vm504_vm0, %v487_v51, 0.0  ;;  %v640_v50 = vsel %vm504_vm0, %v501_v41, 0.0 }
  0x3d   : > { %542 = vadd.xlane.f32.xlu0 %v541_v58  ;;  %v595_v58 = vsel %vm504_vm0, %v486_v52, 0.0 }
  0x44   : > { %557 = vadd.xlane.f32.xlu2 %v556_v1  ;;  %554 = vadd.xlane.f32.xlu1 %v553_v2  ;;  %v610_v1 = vsel %vm504_vm0, %v491_v60, 0.0  ;;  %v607_v2 = vsel %vm504_vm0, %v490_v61, 0.0 }
  0x45   : > { %551 = vadd.xlane.f32.xlu0 %v550_v5  ;;  %v604_v5 = vsel %vm504_vm0, %v489_v62, 0.0 }
  0x4c   : > { %566 = vadd.xlane.f32.xlu2 %v565_v12  ;;  %563 = vadd.xlane.f32.xlu1 %v562_v13  ;;  %v619_v12 = vsel %vm504_vm0, %v494_v7, 0.0  ;;  %v616_v13 = vsel %vm504_vm0, %v493_v9, 0.0 }
  0x4d   : > { %560 = vadd.xlane.f32.xlu0 %v559_v16  ;;  %v613_v16 = vsel %vm504_vm0, %v492_v10, 0.0 }
  0x54   : > { %575 = vadd.xlane.f32.xlu2 %v574_v23  ;;  %572 = vadd.xlane.f32.xlu1 %v571_v24  ;;  %v628_v23 = vsel %vm504_vm0, %v497_v18, 0.0  ;;  %v625_v24 = vsel %vm504_vm0, %v496_v19, 0.0 }
  0x55   : > { %569 = vadd.xlane.f32.xlu0 %v568_v27  ;;  %v622_v27 = vsel %vm504_vm0, %v495_v20, 0.0 }
  0x5c   : > { %584 = vadd.xlane.f32.xlu2 %v583_v33  ;;  %581 = vadd.xlane.f32.xlu1 %v580_v34  ;;  %v637_v33 = vsel %vm504_vm0, %v500_v29, 0.0  ;;  %v634_v34 = vsel %vm504_vm0, %v499_v30, 0.0 }
  0x5d   : > { %578 = vadd.xlane.f32.xlu0 %v577_v37  ;;  %v631_v37 = vsel %vm504_vm0, %v498_v31, 0.0 }
  0x64   : > { %593 = vadd.xlane.f32.xlu2 %v592_v44  ;;  %590 = vadd.xlane.f32.xlu1 %v589_v45 }
  0x65   : > { %587 = vadd.xlane.f32.xlu0 %v586_v48  ;;  %v646_v48 = vsel %vm504_vm0, %v503_v39, 0.0 }
  0x6c   : > { %602 = vadd.xlane.f32.xlu2 %v601_v54  ;;  %599 = vadd.xlane.f32.xlu1 %v598_v55 }
  0x6d   : > { %596 = vadd.xlane.f32.xlu0 %v595_v58 }
  0x74   : > { %611 = vadd.xlane.f32.xlu2 %v610_v1  ;;  %608 = vadd.xlane.f32.xlu1 %v607_v2 }
  0x75   : > { %605 = vadd.xlane.f32.xlu0 %v604_v5 }
  0x7c   : > { %620 = vadd.xlane.f32.xlu2 %v619_v12  ;;  %617 = vadd.xlane.f32.xlu1 %v616_v13 }
  0x7d   : > { %614 = vadd.xlane.f32.xlu0 %v613_v16 }
  0x84   : > { %629 = vadd.xlane.f32.xlu2 %v628_v23  ;;  %626 = vadd.xlane.f32.xlu1 %v625_v24 }
  0x85   : > { %623 = vadd.xlane.f32.xlu0 %v622_v27 }
  0x8c   : > { %638 = vadd.xlane.f32.xlu2 %v637_v33  ;;  %635 = vadd.xlane.f32.xlu1 %v634_v34 }
  0x8d   : > { %632 = vadd.xlane.f32.xlu0 %v631_v37  ;;  %v1565_v37 = vld [vmem:[%s6215_s2 + $0x20] sm:$0xff] }
  0x8f   : > { %v519_v42 = vpop.xlane.xlu2 %518  ;;  %v513_v43 = vpop.xlane.xlu1 %512 }
  0x90   : > { %v3509_v44 = vmul.f32 -1.442695, %v519_v42  ;;  %v3507_v45 = vmul.f32 -1.442695, %v513_v43  ;;  %v507_v46 = vpop.xlane.xlu0 %506  ;;  %v1563_v42 = vld [vmem:[%s6215_s2 + $0x10] sm:$0xff] }
  0x91   : > { %v3505_v47 = vmul.f32 -1.442695, %v507_v46 }
  0x92   : > { %4008 = vpow2.f32 %v3509_v44 }
  0x93   : > { %4010 = vpow2.f32 %v3507_v45 }
  0x94   : > { %4012 = vpow2.f32 %v3505_v47  ;;  %647 = vadd.xlane.f32.xlu2 %v646_v48  ;;  %644 = vadd.xlane.f32.xlu1 %v643_v49 }
  0x95   : > { %641 = vadd.xlane.f32.xlu0 %v640_v50 }
  0x97   : > { %v522_v51 = vpop.xlane.xlu2 %521  ;;  %v516_v8 = vpop.xlane.xlu1 %515 }
  0x98   : > { %v4009_v52 = vpop.eup %4008  ;;  %v3510_v53 = vmul.f32 -1.442695, %v522_v51  ;;  %v510_v54 = vpop.xlane.xlu0 %509  ;;  %v3508_v57 = vmul.f32 -1.442695, %v516_v8 }
  0x99   : > { %v4011_v55 = vpop.eup %4010  ;;  %v797_v56 = vadd.f32 1.0, %v4009_v52  ;;  %v3506_v60 = vmul.f32 -1.442695, %v510_v54 }
  0x9a   : > { %v4013_v58 = vpop.eup %4012  ;;  %v4506_v59 = vadd.f32 1.0, %v4011_v55  ;;  %4014 = vpow2.f32 %v3510_v53  ;;  %v1561_v55 = vld [vmem:[%s6215_s2] sm:$0xff] }
  0x9b   : > { %4016 = vrcp.f32 %v797_v56  ;;  %v4509_v61 = vadd.f32 1.0, %v4013_v58  ;;  %v910_v62 = vand.u32 2147483647, %v797_v56  ;;  %v912_v63 = vand.u32 2147483648, %v797_v56 }
  0x9c   : > { %4018 = vrcp.f32 %v4506_v59  ;;  %v880_v0 = vand.u32 2147483647, %v4506_v59  ;;  %vm906_vm1 = vweird.f32 %v797_v56  ;;  %vm876_vm2 = vweird.f32 %v4506_v59 }
  0x9d   : > { %4020 = vpow2.f32 %v3508_v57  ;;  %v882_v5 = vand.u32 2147483648, %v4506_v59  ;;  %vm4517_vm3 = vcmp.eq.f32.partialorder %v910_v62, 8.507059e+37  ;;  %v913_v12 = vor.u32 1.1754944e-38, %v912_v63 }
  0x9e   : > { %4022 = vpow2.f32 %v3506_v60  ;;  %v850_v13 = vand.u32 2147483647, %v4509_v61  ;;  %vm4523_vm4 = vcmp.eq.f32.partialorder %v880_v0, 8.507059e+37  ;;  %v852_v17 = vand.u32 2147483648, %v4509_v61 }
  0x9f   : > { %4024 = vrcp.f32 %v4509_v61  ;;  %v531_v1 = vpop.xlane.xlu2 %530  ;;  %v528_v7 = vpop.xlane.xlu1 %527  ;;  %v883_v24 = vor.u32 1.1754944e-38, %v882_v5  ;;  %vm846_vm6 = vweird.f32 %v4509_v61 }
  0xa0   : > { %v4015_v2 = vpop.eup %4014  ;;  %v3513_v3 = vmul.f32 -1.442695, %v531_v1  ;;  %v3512_v21 = vmul.f32 -1.442695, %v528_v7  ;;  %vm4535_vm9 = vcmp.eq.f32.partialorder %v850_v13, 8.507059e+37  ;;  %v525_v29 = vpop.xlane.xlu0 %524  ;;  %v853_v35 = vor.u32 1.1754944e-38, %v852_v17 }
  0xa1   : > { %v4017_v4 = vpop.eup %4016  ;;  %v4515_v6 = vadd.f32 1.0, %v4015_v2  ;;  %v3511_v39 = vmul.f32 -1.442695, %v525_v29 }
  0xa2   : > { %v4019_v9 = vpop.eup %4018  ;;  %v902_v10 = vmul.f32 %v4017_v4, %v797_v56  ;;  %vm907_vm7 = vweird.f32 %v4017_v4 }
  0xa3   : > { %v4021_v14 = vpop.eup %4020  ;;  %v872_v15 = vmul.f32 %v4019_v9, %v4506_v59  ;;  %4026 = vrcp.f32 %v4515_v6  ;;  %vm877_vm8 = vweird.f32 %v4019_v9  ;;  %v925_v31 = vand.u32 2147483647, %v4515_v6  ;;  %vm908_vm10 = vmor %vm906_vm1, %vm907_vm7 }
  0xa4   : > { %v4023_v18 = vpop.eup %4022  ;;  %v903_v19 = vsub.f32 1.0, %v902_v10  ;;  %v4529_v20 = vadd.f32 1.0, %v4021_v14  ;;  %4028 = vpow2.f32 %v3513_v3  ;;  %v927_v32 = vand.u32 2147483648, %v4515_v6  ;;  %vm878_vm12 = vmor %vm876_vm2, %vm877_vm8  ;;  %v1566_v10 = vld [vmem:[%s6215_s2 + $0x28] sm:$0xff] }
  0xa5   : > { %v4025_v22 = vpop.eup %4024  ;;  %v873_v23 = vsub.f32 1.0, %v872_v15  ;;  %v4532_v25 = vadd.f32 1.0, %v4023_v18  ;;  %vm921_vm11 = vweird.f32 %v4515_v6  ;;  %vm4560_vm14 = vcmp.eq.f32.partialorder %v925_v31, 8.507059e+37 }
  0xa6   : > { %v904_v26 = vmul.f32 %v4017_v4, %v903_v19  ;;  %v842_v27 = vmul.f32 %v4025_v22, %v4509_v61  ;;  %4030 = vrcp.f32 %v4529_v20  ;;  %vm847_vm13 = vweird.f32 %v4025_v22 }
  0xa7   : > { %v874_v30 = vmul.f32 %v4019_v9, %v873_v23  ;;  %4032 = vpow2.f32 %v3512_v21  ;;  %v4556_v45 = vpop.xlane.xlu2 %539  ;;  %v928_v49 = vor.u32 1.1754944e-38, %v927_v32  ;;  %vm848_vm15 = vmor %vm846_vm6, %vm847_vm13  ;;  %vm891_vm1 = vweird.f32 %v4529_v20  ;;  %v537_v3 = vpop.xlane.xlu1 %536 }
  0xa8   : > { %v905_v33 = vadd.f32 %v4017_v4, %v904_v26  ;;  %v843_v34 = vsub.f32 1.0, %v842_v27  ;;  %4034 = vrcp.f32 %v4532_v25  ;;  %v895_v2 = vand.u32 2147483647, %v4529_v20  ;;  %v534_v13 = vpop.xlane.xlu0 %533 }
  0xa9   : > { %v4027_v36 = vpop.eup %4026  ;;  %v875_v38 = vadd.f32 %v4019_v9, %v874_v30  ;;  %v897_v61 = vand.u32 2147483648, %v4529_v20  ;;  %v865_v11 = vand.u32 2147483647, %v4532_v25 }
  0xaa   : > { %v4029_v40 = vpop.eup %4028  ;;  %v909_v41 = vsel %vm908_vm10, %v4017_v4, %v905_v33  ;;  %v844_v43 = vmul.f32 %v4025_v22, %v843_v34  ;;  %v917_v44 = vmul.f32 %v4027_v36, %v4515_v6  ;;  %vm922_vm0 = vweird.f32 %v4027_v36  ;;  %v1562_v34 = vld [vmem:[%s6215_s2 + $0x8] sm:$0xff] }
  0xab   : > { %v914_v46 = vsel %vm4517_vm3, %v913_v12, %v909_v41  ;;  %v879_v47 = vsel %vm878_vm12, %v4019_v9, %v875_v38  ;;  %v4572_v56 = vadd.f32 1.0, %v4029_v40  ;;  %vm923_vm2 = vmor %vm921_vm11, %vm922_vm0  ;;  %v867_v12 = vand.u32 2147483648, %v4532_v25 }
  0xac   : > { %v1613_v50 = vmul.f32 %v1565_v37, %v914_v46  ;;  %v884_v51 = vsel %vm4523_vm4, %v883_v24, %v879_v47  ;;  %v845_v8 = vadd.f32 %v4025_v22, %v844_v43  ;;  %v918_v52 = vsub.f32 1.0, %v917_v44  ;;  %v4031_v53 = vpop.eup %4030  ;;  %v1564_v24 = vld [vmem:[%s6215_s2 + $0x18] sm:$0xff] }
  0xad   : > { %v1611_v54 = vmul.f32 %v1563_v42, %v884_v51  ;;  %v4033_v57 = vpop.eup %4032  ;;  %v887_v62 = vmul.f32 %v4031_v53, %v4529_v20  ;;  %vm892_vm3 = vweird.f32 %v4031_v53  ;;  %4036 = vrcp.f32 %v4572_v56 }
  0xae   : > { %v1661_v58 = vpack.c.bf16 %v1613_v50, %v1613_v50  ;;  %v849_v59 = vsel %vm848_vm15, %v4025_v22, %v845_v8  ;;  %v919_v60 = vmul.f32 %v4027_v36, %v918_v52  ;;  %v4035_v63 = vpop.eup %4034  ;;  %vm861_vm4 = vweird.f32 %v4532_v25  ;;  %vm893_vm7 = vmor %vm891_vm1, %vm892_vm3 }
  0xaf   : > { %v1659_v0 = vpack.c.bf16 %v1611_v54, %v1611_v54  ;;  %v854_v1 = vsel %vm4535_vm9, %v853_v35, %v849_v59  ;;  %v888_v7 = vsub.f32 1.0, %v887_v62  ;;  %v857_v9 = vmul.f32 %v4035_v63, %v4532_v25  ;;  %v549_v23 = vpop.xlane.xlu2 %548  ;;  %v546_v42 = vpop.xlane.xlu1 %545 }
  0xb0   : > { %1710 = vst.msk [vmem:[#allocation2 + $0x10] sm:$0xf] %vm1705_vm5, %v1661_v58  ;;  %v1609_v4 = vmul.f32 %v1561_v55, %v854_v1  ;;  %v920_v5 = vadd.f32 %v4027_v36, %v919_v60  ;;  %vm862_vm6 = vweird.f32 %v4035_v63  ;;  %v4594_v6 = vadd.f32 1.0, %v4033_v57  ;;  %v543_v50 = vpop.xlane.xlu0 %542 }
  0xb1   : > { %1708 = vst.msk [vmem:[#allocation2 + $0x8] sm:$0xf] %vm1705_vm5, %v1659_v0  ;;  %v889_v16 = vmul.f32 %v4031_v53, %v888_v7  ;;  %v858_v17 = vsub.f32 1.0, %v857_v9  ;;  %4038 = vpow2.f32 %v3511_v39  ;;  %vm896_vm8 = vcmp.eq.f32.partialorder %v895_v2, 8.507059e+37  ;;  %vm863_vm10 = vmor %vm861_vm4, %vm862_vm6  ;;  %v1569_v0 = vld [vmem:[%s6215_s2 + $0x40] sm:$0xff] }
  0xb2   : > { %v1657_v14 = vpack.c.bf16 %v1609_v4, %v1609_v4  ;;  %v924_v15 = vsel %vm923_vm2, %v4027_v36, %v920_v5  ;;  %v898_v26 = vor.u32 1.1754944e-38, %v897_v61  ;;  %vm4603_vm9 = vcmp.eq.f32.partialorder %v865_v11, 8.507059e+37 }
  0xb3   : > { %v929_v18 = vsel %vm4560_vm14, %v928_v49, %v924_v15  ;;  %v890_v21 = vadd.f32 %v4031_v53, %v889_v16  ;;  %v859_v22 = vmul.f32 %v4035_v63, %v858_v17  ;;  %4040 = vrcp.f32 %v4594_v6  ;;  %v4037_v32 = vpop.eup %4036  ;;  %v1568_v15 = vld [vmem:[%s6215_s2 + $0x38] sm:$0xff] }
  0xb4   : > { %1706 = vst.msk [vmem:[#allocation2] sm:$0xf] %vm1705_vm5, %v1657_v14  ;;  %v1614_v19 = vmul.f32 %v1566_v10, %v929_v18  ;;  %v868_v31 = vor.u32 1.1754944e-38, %v867_v12  ;;  %vm966_vm11 = vweird.f32 %v4572_v56  ;;  %v3516_v20 = vmul.f32 -1.442695, %v4556_v45 }
  0xb5   : > { %v894_v29 = vsel %vm893_vm7, %v4031_v53, %v890_v21  ;;  %v860_v30 = vadd.f32 %v4035_v63, %v859_v22  ;;  %v3515_v35 = vmul.f32 -1.442695, %v537_v3  ;;  %v962_v38 = vmul.f32 %v4037_v32, %v4572_v56 }
  0xb6   : > { %v1662_v28 = vpack.c.bf16 %v1614_v19, %v1614_v19  ;;  %v899_v33 = vsel %vm896_vm8, %v898_v26, %v894_v29  ;;  %v970_v39 = vand.u32 2147483647, %v4572_v56  ;;  %v972_v41 = vand.u32 2147483648, %v4572_v56 }
  0xb7   : > { %v1612_v36 = vmul.f32 %v1564_v24, %v899_v33  ;;  %v864_v37 = vsel %vm863_vm10, %v4035_v63, %v860_v30  ;;  %4042 = vpow2.f32 %v3516_v20  ;;  %v3514_v25 = vmul.f32 -1.442695, %v534_v13  ;;  %v4039_v43 = vpop.eup %4038  ;;  %v558_v62 = vpop.xlane.xlu2 %557 }
  0xb8   : > { %1711 = vst.msk [vmem:[#allocation2 + $0x14] sm:$0xf] %vm1705_vm5, %v1662_v28  ;;  %v869_v40 = vsel %vm4603_vm9, %v868_v31, %v864_v37  ;;  %v963_v46 = vsub.f32 1.0, %v962_v38  ;;  %4044 = vpow2.f32 %v3515_v35  ;;  %vm967_vm12 = vweird.f32 %v4037_v32 }
  0xb9   : > { %v1660_v44 = vpack.c.bf16 %v1612_v36, %v1612_v36  ;;  %v1610_v45 = vmul.f32 %v1562_v34, %v869_v40  ;;  %v4041_v47 = vpop.eup %4040  ;;  %v4622_v48 = vadd.f32 1.0, %v4039_v43  ;;  %4046 = vpow2.f32 %v3514_v25  ;;  %vm968_vm14 = vmor %vm966_vm11, %vm967_vm12 }
  0xba   : > { %v3519_v49 = vmul.f32 -1.442695, %v549_v23  ;;  %v964_v8 = vmul.f32 %v4037_v32, %v963_v46  ;;  %v947_v52 = vmul.f32 %v4041_v47, %v4594_v6  ;;  %v3518_v53 = vmul.f32 -1.442695, %v546_v42  ;;  %v555_v23 = vpop.xlane.xlu1 %554 }
  0xbb   : > { %1709 = vst.msk [vmem:[#allocation2 + $0xc] sm:$0xf] %vm1705_vm5, %v1660_v44  ;;  %v1658_v51 = vpack.c.bf16 %v1610_v45, %v1610_v45  ;;  %vm4626_vm13 = vcmp.eq.f32.partialorder %v970_v39, 8.507059e+37  ;;  %v973_v55 = vor.u32 1.1754944e-38, %v972_v41  ;;  %v955_v57 = vand.u32 2147483647, %v4594_v6 }
  0xbc   : > { %4048 = vrcp.f32 %v4622_v48  ;;  %v965_v58 = vadd.f32 %v4037_v32, %v964_v8  ;;  %v948_v59 = vsub.f32 1.0, %v947_v52  ;;  %v3517_v60 = vmul.f32 -1.442695, %v543_v50 }
  0xbd   : > { %1707 = vst.msk [vmem:[#allocation2 + $0x4] sm:$0xf] %vm1705_vm5, %v1658_v51  ;;  %4050 = vpow2.f32 %v3519_v49  ;;  %v4043_v63 = vpop.eup %4042  ;;  %vm952_vm15 = vweird.f32 %v4041_v47  ;;  %v957_v1 = vand.u32 2147483648, %v4594_v6  ;;  %v940_v2 = vand.u32 2147483647, %v4622_v48 }
  0xbe   : > { %v942_v61 = vand.u32 2147483648, %v4622_v48  ;;  %v4045_v3 = vpop.eup %4044  ;;  %v969_v4 = vsel %vm968_vm14, %v4037_v32, %v965_v58  ;;  %v949_v5 = vmul.f32 %v4041_v47, %v948_v59  ;;  %v4642_v7 = vadd.f32 1.0, %v4043_v63 }
  0xbf   : > { %4052 = vpow2.f32 %v3518_v53  ;;  %v4047_v9 = vpop.eup %4046  ;;  %v974_v10 = vsel %vm4626_vm13, %v973_v55, %v969_v4  ;;  %v4646_v11 = vadd.f32 1.0, %v4045_v3  ;;  %v3522_v56 = vmul.f32 -1.442695, %v558_v62 }
  0xc0   : > { %4054 = vpow2.f32 %v3517_v60  ;;  %v1617_v12 = vmul.f32 %v1569_v0, %v974_v10  ;;  %v950_v13 = vadd.f32 %v4041_v47, %v949_v5  ;;  %vm951_vm0 = vweird.f32 %v4594_v6  ;;  %v1571_v10 = vld [vmem:[%s6215_s2 + $0x50] sm:$0xff] }
  0xc1   : > { %4056 = vrcp.f32 %v4642_v7  ;;  %vm953_vm1 = vmor %vm951_vm0, %vm952_vm15  ;;  %vm956_vm2 = vcmp.eq.f32.partialorder %v955_v57, 8.507059e+37  ;;  %v958_v16 = vor.u32 1.1754944e-38, %v957_v1  ;;  %vm936_vm3 = vweird.f32 %v4622_v48 }
  0xc2   : > { %v4049_v14 = vpop.eup %4048  ;;  %4058 = vrcp.f32 %v4646_v11  ;;  %v1665_v18 = vpack.c.bf16 %v1617_v12, %v1617_v12  ;;  %v954_v19 = vsel %vm953_vm1, %v4041_v47, %v950_v13  ;;  %vm4657_vm4 = vcmp.eq.f32.partialorder %v940_v2, 8.507059e+37  ;;  %v1567_v47 = vld [vmem:[%s6215_s2 + $0x30] sm:$0xff] }
  0xc3   : > { %v4051_v17 = vpop.eup %4050  ;;  %v932_v6 = vmul.f32 %v4049_v14, %v4622_v48  ;;  %v943_v22 = vor.u32 1.1754944e-38, %v942_v61  ;;  %v959_v24 = vsel %vm956_vm2, %v958_v16, %v954_v19  ;;  %v1015_v26 = vand.u32 2147483647, %v4642_v7  ;;  %v4704_v48 = vpop.xlane.xlu0 %551  ;;  %v1572_v61 = vld [vmem:[%s6215_s2 + $0x58] sm:$0xff] }
  0xc4   : > { %v1017_v27 = vand.u32 2147483648, %v4642_v7  ;;  %4060 = vpow2.f32 %v3522_v56  ;;  %1714 = vst.msk [vmem:[#allocation2 + $0x20] sm:$0xf] %vm1705_vm5, %v1665_v18  ;;  %v1616_v29 = vmul.f32 %v1568_v15, %v959_v24  ;;  %v1000_v31 = vand.u32 2147483647, %v4646_v11 }
  0xc5   : > { %v4053_v28 = vpop.eup %4052  ;;  %v933_v30 = vsub.f32 1.0, %v932_v6  ;;  %v4665_v32 = vadd.f32 1.0, %v4047_v9  ;;  %vm937_vm6 = vweird.f32 %v4049_v14  ;;  %vm1011_vm7 = vweird.f32 %v4642_v7 }
  0xc6   : > { %v4055_v33 = vpop.eup %4054  ;;  %v4668_v34 = vadd.f32 1.0, %v4051_v17  ;;  %v4670_v20 = vmul.f32 -1.442695, %v555_v23  ;;  %v1664_v36 = vpack.c.bf16 %v1616_v29, %v1616_v29  ;;  %v1002_v38 = vand.u32 2147483648, %v4646_v11  ;;  %vm938_vm11 = vmor %vm936_vm3, %vm937_vm6  ;;  %v1570_v29 = vld [vmem:[%s6215_s2 + $0x48] sm:$0xff] }
  0xc7   : > { %v4057_v35 = vpop.eup %4056  ;;  %v934_v37 = vmul.f32 %v4049_v14, %v933_v30  ;;  %4062 = vrcp.f32 %v4665_v32  ;;  %vm4675_vm8 = vcmp.eq.f32.partialorder %v1015_v26, 8.507059e+37  ;;  %vm996_vm9 = vweird.f32 %v4646_v11 }
  0xc8   : > { %v4059_v39 = vpop.eup %4058  ;;  %v1007_v40 = vmul.f32 %v4057_v35, %v4642_v7  ;;  %v4680_v25 = vadd.f32 1.0, %v4053_v28  ;;  %1713 = vst.msk [vmem:[#allocation2 + $0x1c] sm:$0xf] %vm1705_vm5, %v1664_v36  ;;  %v1018_v43 = vor.u32 1.1754944e-38, %v1017_v27  ;;  %vm4684_vm10 = vcmp.eq.f32.partialorder %v1000_v31, 8.507059e+37 }
  0xc9   : > { %v935_v42 = vadd.f32 %v4049_v14, %v934_v37  ;;  %v992_v44 = vmul.f32 %v4059_v39, %v4646_v11  ;;  %v985_v50 = vand.u32 2147483647, %v4665_v32  ;;  %4064 = vrcp.f32 %v4668_v34 }
  0xca   : > { %v4688_v46 = vpop.eup %4060  ;;  %v1008_v49 = vsub.f32 1.0, %v1007_v40  ;;  %v4698_v51 = vadd.f32 1.0, %v4055_v33  ;;  %vm1012_vm12 = vweird.f32 %v4057_v35  ;;  %v1003_v53 = vor.u32 1.1754944e-38, %v1002_v38  ;;  %v567_v33 = vpop.xlane.xlu2 %566 }
  0xcb   : > { %v939_v8 = vsel %vm938_vm11, %v4049_v14, %v935_v42  ;;  %v993_v52 = vsub.f32 1.0, %v992_v44  ;;  %v987_v57 = vand.u32 2147483648, %v4665_v32  ;;  %4066 = vrcp.f32 %v4680_v25  ;;  %vm1013_vm0 = vmor %vm1011_vm7, %vm1012_vm12  ;;  %v1575_v44 = vld [vmem:[%s6215_s2 + $0x70] sm:$0xff] }
  0xcc   : > { %v944_v54 = vsel %vm4657_vm4, %v943_v22, %v939_v8  ;;  %v1009_v55 = vmul.f32 %v4057_v35, %v1008_v49  ;;  %vm997_vm13 = vweird.f32 %v4059_v39  ;;  %v1060_v62 = vand.u32 2147483647, %v4668_v34 }
  0xcd   : > { %v4063_v58 = vpop.eup %4062  ;;  %v1615_v59 = vmul.f32 %v1567_v47, %v944_v54  ;;  %v994_v60 = vmul.f32 %v4059_v39, %v993_v52  ;;  %vm981_vm14 = vweird.f32 %v4665_v32  ;;  %vm4709_vm15 = vcmp.eq.f32.partialorder %v985_v50, 8.507059e+37  ;;  %vm998_vm2 = vmor %vm996_vm9, %vm997_vm13 }
  0xce   : > { %v1010_v63 = vadd.f32 %v4057_v35, %v1009_v55  ;;  %v977_v0 = vmul.f32 %v4063_v58, %v4665_v32  ;;  %vm1056_vm1 = vweird.f32 %v4668_v34  ;;  %v1062_v4 = vand.u32 2147483648, %v4668_v34 }
  0xcf   : > { %v1663_v2 = vpack.c.bf16 %v1615_v59, %v1615_v59  ;;  %v995_v3 = vadd.f32 %v4059_v39, %v994_v60  ;;  %v4065_v5 = vpop.eup %4064  ;;  %v988_v12 = vor.u32 1.1754944e-38, %v987_v57  ;;  %4068 = vrcp.f32 %v4698_v51 }
  0xd0   : > { %v1014_v9 = vsel %vm1013_vm0, %v4057_v35, %v1010_v63  ;;  %v978_v56 = vsub.f32 1.0, %v977_v0  ;;  %v1052_v14 = vmul.f32 %v4065_v5, %v4668_v34  ;;  %vm4732_vm3 = vcmp.eq.f32.partialorder %v1060_v62, 8.507059e+37  ;;  %v564_v35 = vpop.xlane.xlu1 %563  ;;  %v1574_v34 = vld [vmem:[%s6215_s2 + $0x68] sm:$0xff] }
  0xd1   : > { %1712 = vst.msk [vmem:[#allocation2 + $0x18] sm:$0xf] %vm1705_vm5, %v1663_v2  ;;  %v1019_v7 = vsel %vm4675_vm8, %v1018_v43, %v1014_v9  ;;  %v999_v13 = vsel %vm998_vm2, %v4059_v39, %v995_v3  ;;  %vm1041_vm4 = vweird.f32 %v4680_v25  ;;  %v4067_v11 = vpop.eup %4066  ;;  %vm982_vm6 = vweird.f32 %v4063_v58  ;;  %v561_v39 = vpop.xlane.xlu0 %560 }
  0xd2   : > { %v1620_v16 = vmul.f32 %v1572_v61, %v1019_v7  ;;  %v1004_v17 = vsel %vm4684_vm10, %v1003_v53, %v999_v13  ;;  %v979_v18 = vmul.f32 %v4063_v58, %v978_v56  ;;  %v1053_v6 = vsub.f32 1.0, %v1052_v14  ;;  %vm983_vm7 = vmor %vm981_vm14, %vm982_vm6  ;;  %v576_v56 = vpop.xlane.xlu2 %575 }
  0xd3   : > { %v1619_v19 = vmul.f32 %v1571_v10, %v1004_v17  ;;  %v1063_v21 = vor.u32 1.1754944e-38, %v1062_v4  ;;  %v1037_v22 = vmul.f32 %v4067_v11, %v4680_v25  ;;  %v1045_v26 = vand.u32 2147483647, %v4680_v25 }
  0xd4   : > { %v1668_v23 = vpack.c.bf16 %v1620_v16, %v1620_v16  ;;  %v980_v24 = vadd.f32 %v4063_v58, %v979_v18  ;;  %v1047_v27 = vand.u32 2147483648, %v4680_v25  ;;  %v1054_v30 = vmul.f32 %v4065_v5, %v1053_v6 }
  0xd5   : > { %v1667_v28 = vpack.c.bf16 %v1619_v19, %v1619_v19  ;;  %vm1057_vm8 = vweird.f32 %v4065_v5  ;;  %v1038_v31 = vsub.f32 1.0, %v1037_v22  ;;  %v4069_v36 = vpop.eup %4068  ;;  %vm1042_vm9 = vweird.f32 %v4067_v11 }
  0xd6   : > { %1717 = vst.msk [vmem:[#allocation2 + $0x2c] sm:$0xf] %vm1705_vm5, %v1668_v23  ;;  %v984_v37 = vsel %vm983_vm7, %v4063_v58, %v980_v24  ;;  %v4749_v38 = vadd.f32 1.0, %v4688_v46  ;;  %4070 = vpow2.f32 %v4670_v20  ;;  %v1055_v40 = vadd.f32 %v4065_v5, %v1054_v30  ;;  %vm1058_vm10 = vmor %vm1056_vm1, %vm1057_vm8 }
  0xd7   : > { %1716 = vst.msk [vmem:[#allocation2 + $0x28] sm:$0xf] %vm1705_vm5, %v1667_v28  ;;  %v989_v32 = vsel %vm4709_vm15, %v988_v12, %v984_v37  ;;  %v1039_v41 = vmul.f32 %v4067_v11, %v1038_v31  ;;  %v1022_v42 = vmul.f32 %v4069_v36, %v4698_v51  ;;  %vm4762_vm11 = vcmp.eq.f32.partialorder %v1045_v26, 8.507059e+37  ;;  %vm1043_vm12 = vmor %vm1041_vm4, %vm1042_vm9 }
  0xd8   : > { %v1618_v43 = vmul.f32 %v1570_v29, %v989_v32  ;;  %v1030_v45 = vand.u32 2147483647, %v4698_v51  ;;  %4072 = vrcp.f32 %v4749_v38  ;;  %v1059_v46 = vsel %vm1058_vm10, %v4065_v5, %v1055_v40  ;;  %v573_v12 = vpop.xlane.xlu1 %572 }
  0xd9   : > { %v1040_v47 = vadd.f32 %v4067_v11, %v1039_v41  ;;  %v1048_v49 = vor.u32 1.1754944e-38, %v1047_v27  ;;  %v1023_v50 = vsub.f32 1.0, %v1022_v42  ;;  %v1064_v52 = vsel %vm4732_vm3, %v1063_v21, %v1059_v46  ;;  %v570_v13 = vpop.xlane.xlu0 %569  ;;  %v1578_v27 = vld [vmem:[%s6215_s2 + $0x88] sm:$0xff] }
  0xda   : > { %v1666_v8 = vpack.c.bf16 %v1618_v43, %v1618_v43  ;;  %vm1027_vm13 = vweird.f32 %v4069_v36  ;;  %v1032_v53 = vand.u32 2147483648, %v4698_v51  ;;  %v1623_v54 = vmul.f32 %v1575_v44, %v1064_v52  ;;  %v585_v43 = vpop.xlane.xlu2 %584 }
  0xdb   : > { %v1044_v55 = vsel %vm1043_vm12, %v4067_v11, %v1040_v47  ;;  %v1024_v57 = vmul.f32 %v4069_v36, %v1023_v50  ;;  %v3520_v58 = vmul.f32 -1.442695, %v4704_v48  ;;  %vm1026_vm14 = vweird.f32 %v4698_v51  ;;  %v1573_v48 = vld [vmem:[%s6215_s2 + $0x60] sm:$0xff] }
  0xdc   : > { %v4071_v59 = vpop.eup %4070  ;;  %1715 = vst.msk [vmem:[#allocation2 + $0x24] sm:$0xf] %vm1705_vm5, %v1666_v8  ;;  %v1049_v60 = vsel %vm4762_vm11, %v1048_v49, %v1044_v55  ;;  %vm4782_vm15 = vcmp.eq.f32.partialorder %v1030_v45, 8.507059e+37  ;;  %v1671_v25 = vpack.c.bf16 %v1623_v54, %v1623_v54  ;;  %vm1028_vm0 = vmor %vm1026_vm14, %vm1027_vm13  ;;  %v1033_v61 = vor.u32 1.1754944e-38, %v1032_v53 }
  0xdd   : > { %v1622_v63 = vmul.f32 %v1574_v34, %v1049_v60  ;;  %v1025_v0 = vadd.f32 %v4069_v36, %v1024_v57  ;;  %v4786_v1 = vadd.f32 1.0, %v4071_v59  ;;  %4074 = vpow2.f32 %v3520_v58  ;;  %v1577_v59 = vld [vmem:[%s6215_s2 + $0x80] sm:$0xff] }
  0xde   : > { %v4073_v2 = vpop.eup %4072  ;;  %v3525_v3 = vmul.f32 -1.442695, %v567_v33  ;;  %v3524_v51 = vmul.f32 -1.442695, %v564_v35  ;;  %1720 = vst.msk [vmem:[#allocation2 + $0x38] sm:$0xf] %vm1705_vm5, %v1671_v25  ;;  %vm1101_vm2 = vweird.f32 %v4749_v38 }
  0xdf   : > { %v1670_v4 = vpack.c.bf16 %v1622_v63, %v1622_v63  ;;  %v1029_v5 = vsel %vm1028_vm0, %v4069_v36, %v1025_v0  ;;  %v1097_v9 = vmul.f32 %v4073_v2, %v4749_v38  ;;  %v3523_v10 = vmul.f32 -1.442695, %v561_v39 }
  0xe0   : > { %v1034_v7 = vsel %vm4782_vm15, %v1033_v61, %v1029_v5  ;;  %4076 = vrcp.f32 %v4786_v1  ;;  %v1105_v11 = vand.u32 2147483647, %v4749_v38  ;;  %v1107_v16 = vand.u32 2147483648, %v4749_v38  ;;  %v582_v44 = vpop.xlane.xlu1 %581 }
  0xe1   : > { %1719 = vst.msk [vmem:[#allocation2 + $0x34] sm:$0xf] %vm1705_vm5, %v1670_v4  ;;  %v1621_v14 = vmul.f32 %v1573_v48, %v1034_v7  ;;  %v1098_v15 = vsub.f32 1.0, %v1097_v9  ;;  %4078 = vpow2.f32 %v3525_v3  ;;  %v3528_v17 = vmul.f32 -1.442695, %v576_v56  ;;  %v579_v46 = vpop.xlane.xlu0 %578 }
  0xe2   : > { %4080 = vpow2.f32 %v3524_v51  ;;  %vm1102_vm1 = vweird.f32 %v4073_v2  ;;  %v1090_v21 = vand.u32 2147483647, %v4786_v1  ;;  %v3527_v22 = vmul.f32 -1.442695, %v573_v12 }
  0xe3   : > { %v1669_v18 = vpack.c.bf16 %v1621_v14, %v1621_v14  ;;  %v1099_v19 = vmul.f32 %v4073_v2, %v1098_v15  ;;  %4082 = vpow2.f32 %v3523_v10  ;;  %v4075_v6 = vpop.eup %4074  ;;  %vm1103_vm3 = vmor %vm1101_vm2, %vm1102_vm1  ;;  %vm1106_vm4 = vcmp.eq.f32.partialorder %v1105_v11, 8.507059e+37 }
  0xe4   : > { %v4803_v24 = vadd.f32 1.0, %v4075_v6  ;;  %v1108_v28 = vor.u32 1.1754944e-38, %v1107_v16  ;;  %4084 = vpow2.f32 %v3528_v17  ;;  %v3526_v29 = vmul.f32 -1.442695, %v570_v13  ;;  %v1584_v16 = vld [vmem:[%s6215_s2 + $0xb8] sm:$0xff] }
  0xe5   : > { %1718 = vst.msk [vmem:[#allocation2 + $0x30] sm:$0xf] %vm1705_vm5, %v1669_v18  ;;  %v1100_v23 = vadd.f32 %v4073_v2, %v1099_v19  ;;  %vm1086_vm6 = vweird.f32 %v4786_v1  ;;  %vm4811_vm7 = vcmp.eq.f32.partialorder %v1090_v21, 8.507059e+37  ;;  %v1092_v38 = vand.u32 2147483648, %v4786_v1 }
  0xe6   : > { %v4077_v26 = vpop.eup %4076  ;;  %4086 = vrcp.f32 %v4803_v24  ;;  %v1075_v20 = vand.u32 2147483647, %v4803_v24  ;;  %v1077_v50 = vand.u32 2147483648, %v4803_v24  ;;  %v3531_v34 = vmul.f32 -1.442695, %v585_v43 }
  0xe7   : > { %v4079_v30 = vpop.eup %4078  ;;  %v1104_v31 = vsel %vm1103_vm3, %v4073_v2, %v1100_v23  ;;  %v1082_v33 = vmul.f32 %v4077_v26, %v4786_v1  ;;  %4088 = vpow2.f32 %v3527_v22  ;;  %vm1087_vm8 = vweird.f32 %v4077_v26  ;;  %v1576_v23 = vld [vmem:[%s6215_s2 + $0x78] sm:$0xff] }
  0xe8   : > { %v4081_v35 = vpop.eup %4080  ;;  %v1109_v36 = vsel %vm1106_vm4, %v1108_v28, %v1104_v31  ;;  %v4816_v41 = vadd.f32 1.0, %v4079_v30  ;;  %4090 = vpow2.f32 %v3526_v29  ;;  %v1093_v52 = vor.u32 1.1754944e-38, %v1092_v38  ;;  %vm1088_vm10 = vmor %vm1086_vm6, %vm1087_vm8 }
  0xe9   : > { %v4083_v39 = vpop.eup %4082  ;;  %v1626_v32 = vmul.f32 %v1578_v27, %v1109_v36  ;;  %v1083_v40 = vsub.f32 1.0, %v1082_v33  ;;  %v4818_v42 = vadd.f32 1.0, %v4081_v35  ;;  %v4826_v53 = vmul.f32 -1.442695, %v582_v44 }
  0xea   : > { %v4821_v45 = vadd.f32 1.0, %v4083_v39  ;;  %4092 = vrcp.f32 %v4816_v41  ;;  %v4085_v8 = vpop.eup %4084  ;;  %vm1071_vm9 = vweird.f32 %v4803_v24  ;;  %v4831_v57 = vmul.f32 -1.442695, %v579_v46  ;;  %v1581_v39 = vld [vmem:[%s6215_s2 + $0xa0] sm:$0xff]  ;;  %v1580_v46 = vld [vmem:[%s6215_s2 + $0x98] sm:$0xff] }
  0xeb   : > { %v1674_v47 = vpack.c.bf16 %v1626_v32, %v1626_v32  ;;  %v1084_v49 = vmul.f32 %v4077_v26, %v1083_v40  ;;  %4094 = vrcp.f32 %v4818_v42  ;;  %vm4840_vm11 = vcmp.eq.f32.partialorder %v1075_v20, 8.507059e+37 }
  0xec   : > { %v4087_v54 = vpop.eup %4086  ;;  %4096 = vrcp.f32 %v4821_v45  ;;  %v1150_v25 = vand.u32 2147483647, %v4816_v41  ;;  %v1152_v63 = vand.u32 2147483648, %v4816_v41  ;;  %v1078_v2 = vor.u32 1.1754944e-38, %v1077_v50  ;;  %v1579_v50 = vld [vmem:[%s6215_s2 + $0x90] sm:$0xff] }
  0xed   : > { %1723 = vst.msk [vmem:[#allocation2 + $0x44] sm:$0xf] %vm1705_vm5, %v1674_v47  ;;  %v1085_v55 = vadd.f32 %v4077_v26, %v1084_v49  ;;  %v4089_v58 = vpop.eup %4088  ;;  %v1067_v60 = vmul.f32 %v4087_v54, %v4803_v24  ;;  %v1135_v48 = vand.u32 2147483647, %v4818_v42  ;;  %v1137_v61 = vand.u32 2147483648, %v4818_v42 }
  0xee   : > { %v4091_v3 = vpop.eup %4090  ;;  %vm1146_vm12 = vweird.f32 %v4816_v41  ;;  %4098 = vpow2.f32 %v3531_v34  ;;  %vm1072_vm13 = vweird.f32 %v4087_v54  ;;  %vm1131_vm14 = vweird.f32 %v4818_v42 }
  0xef   : > { %v1089_v0 = vsel %vm1088_vm10, %v4077_v26, %v1085_v55  ;;  %v1068_v51 = vsub.f32 1.0, %v1067_v60  ;;  %v4852_v9 = vadd.f32 1.0, %v4085_v8  ;;  %vm4855_vm15 = vcmp.eq.f32.partialorder %v1150_v25, 8.507059e+37  ;;  %vm1073_vm1 = vmor %vm1071_vm9, %vm1072_vm13  ;;  %v594_v25 = vpop.xlane.xlu2 %593 }
  0xf0   : > { %v1094_v1 = vsel %vm4811_vm7, %v1093_v52, %v1089_v0  ;;  %v4093_v4 = vpop.eup %4092  ;;  %v1153_v13 = vor.u32 1.1754944e-38, %v1152_v63  ;;  %vm4860_vm0 = vcmp.eq.f32.partialorder %v1135_v48, 8.507059e+37  ;;  %v1138_v17 = vor.u32 1.1754944e-38, %v1137_v61 }
  0xf1   : > { %v1625_v5 = vmul.f32 %v1577_v59, %v1094_v1  ;;  %v4095_v10 = vpop.eup %4094  ;;  %v1069_v56 = vmul.f32 %v4087_v54, %v1068_v51  ;;  %v1142_v12 = vmul.f32 %v4093_v4, %v4816_v41  ;;  %v4864_v18 = vadd.f32 1.0, %v4089_v58  ;;  %v591_v51 = vpop.xlane.xlu1 %590 }
  0xf2   : > { %v4097_v14 = vpop.eup %4096  ;;  %v1127_v11 = vmul.f32 %v4095_v10, %v4818_v42  ;;  %v1120_v22 = vand.u32 2147483647, %v4821_v45  ;;  %v1122_v27 = vand.u32 2147483648, %v4821_v45  ;;  %4100 = vrcp.f32 %v4852_v9 }
  0xf3   : > { %v1673_v15 = vpack.c.bf16 %v1625_v5, %v1625_v5  ;;  %v1070_v19 = vadd.f32 %v4087_v54, %v1069_v56  ;;  %v1143_v6 = vsub.f32 1.0, %v1142_v12  ;;  %v1112_v21 = vmul.f32 %v4097_v14, %v4821_v45 }
  0xf4   : > { %v1128_v26 = vsub.f32 1.0, %v1127_v11  ;;  %v4877_v28 = vadd.f32 1.0, %v4091_v3  ;;  %v4099_v29 = vpop.eup %4098  ;;  %vm1147_vm2 = vweird.f32 %v4093_v4  ;;  %vm1132_vm3 = vweird.f32 %v4095_v10 }
  0xf5   : > { %1722 = vst.msk [vmem:[#allocation2 + $0x40] sm:$0xf] %vm1705_vm5, %v1673_v15  ;;  %v1074_v30 = vsel %vm1073_vm1, %v4087_v54, %v1070_v19  ;;  %v1144_v31 = vmul.f32 %v4093_v4, %v1143_v6  ;;  %v1113_v33 = vsub.f32 1.0, %v1112_v21  ;;  %4102 = vrcp.f32 %v4864_v18  ;;  %vm1148_vm6 = vmor %vm1146_vm12, %vm1147_vm2 }
  0xf6   : > { %v1079_v35 = vsel %vm4840_vm11, %v1078_v2, %v1074_v30  ;;  %v1129_v36 = vmul.f32 %v4095_v10, %v1128_v26  ;;  %vm1117_vm4 = vweird.f32 %v4097_v14  ;;  %vm1116_vm7 = vweird.f32 %v4821_v45  ;;  %vm1133_vm9 = vmor %vm1131_vm14, %vm1132_vm3  ;;  %v588_v26 = vpop.xlane.xlu0 %587 }
  0xf7   : > { %v1624_v24 = vmul.f32 %v1576_v23, %v1079_v35  ;;  %v1145_v37 = vadd.f32 %v4093_v4, %v1144_v31  ;;  %v1114_v38 = vmul.f32 %v4097_v14, %v1113_v33  ;;  %vm4888_vm8 = vcmp.eq.f32.partialorder %v1120_v22, 8.507059e+37  ;;  %vm1118_vm10 = vmor %vm1116_vm7, %vm1117_vm4 }
  0xf8   : > { %v1130_v32 = vadd.f32 %v4095_v10, %v1129_v36  ;;  %v1123_v43 = vor.u32 1.1754944e-38, %v1122_v27  ;;  %4104 = vrcp.f32 %v4877_v28  ;;  %v4101_v47 = vpop.eup %4100  ;;  %vm1191_vm11 = vweird.f32 %v4852_v9 }
  0xf9   : > { %v1672_v44 = vpack.c.bf16 %v1624_v24, %v1624_v24  ;;  %v1149_v20 = vsel %vm1148_vm6, %v4093_v4, %v1145_v37  ;;  %v1115_v41 = vadd.f32 %v4097_v14, %v1114_v38  ;;  %v1195_v8 = vand.u32 2147483647, %v4852_v9  ;;  %v603_v24 = vpop.xlane.xlu2 %602 }
  0xfa   : > { %v1154_v45 = vsel %vm4855_vm15, %v1153_v13, %v1149_v20  ;;  %v1134_v49 = vsel %vm1133_vm9, %v4095_v10, %v1130_v32  ;;  %v1187_v54 = vmul.f32 %v4101_v47, %v4852_v9  ;;  %v1197_v60 = vand.u32 2147483648, %v4852_v9  ;;  %v1583_v9 = vld [vmem:[%s6215_s2 + $0xb0] sm:$0xff] }
  0xfb   : > { %1721 = vst.msk [vmem:[#allocation2 + $0x3c] sm:$0xf] %vm1705_vm5, %v1672_v44  ;;  %v1629_v42 = vmul.f32 %v1581_v39, %v1154_v45  ;;  %v1139_v52 = vsel %vm4860_vm0, %v1138_v17, %v1134_v49  ;;  %v1119_v34 = vsel %vm1118_vm10, %v4097_v14, %v1115_v41  ;;  %v4103_v55 = vpop.eup %4102  ;;  %v1180_v62 = vand.u32 2147483647, %v4864_v18  ;;  %v1582_v39 = vld [vmem:[%s6215_s2 + $0xa8] sm:$0xff] }
  0xfc   : > { %v1628_v58 = vmul.f32 %v1580_v46, %v1139_v52  ;;  %v1124_v59 = vsel %vm4888_vm8, %v1123_v43, %v1119_v34  ;;  %v1188_v2 = vsub.f32 1.0, %v1187_v54  ;;  %v1172_v48 = vmul.f32 %v4103_v55, %v4864_v18 }
  0xfd   : > { %v1677_v63 = vpack.c.bf16 %v1629_v42, %v1629_v42  ;;  %v1627_v0 = vmul.f32 %v1579_v50, %v1124_v59  ;;  %vm1192_vm12 = vweird.f32 %v4101_v47  ;;  %vm4916_vm13 = vcmp.eq.f32.partialorder %v1195_v8, 8.507059e+37 }
  0xfe   : > { %v1676_v61 = vpack.c.bf16 %v1628_v58, %v1628_v58  ;;  %v1182_v1 = vand.u32 2147483648, %v4864_v18  ;;  %v4105_v4 = vpop.eup %4104  ;;  %v1189_v10 = vmul.f32 %v4101_v47, %v1188_v2  ;;  %v1173_v56 = vsub.f32 1.0, %v1172_v48  ;;  %vm1193_vm1 = vmor %vm1191_vm11, %vm1192_vm12  ;;  %v1587_v48 = vld [vmem:[%s6215_s2 + $0xd0] sm:$0xff] }
  0xff   : > { %1726 = vst.msk [vmem:[#allocation2 + $0x50] sm:$0xf] %vm1705_vm5, %v1677_v63  ;;  %v1675_v5 = vpack.c.bf16 %v1627_v0, %v1627_v0  ;;  %v4922_v12 = vadd.f32 1.0, %v4099_v29  ;;  %v1198_v7 = vor.u32 1.1754944e-38, %v1197_v60  ;;  %vm1176_vm14 = vweird.f32 %v4864_v18 }
 0x100   : > { %1725 = vst.msk [vmem:[#allocation2 + $0x4c] sm:$0xf] %vm1705_vm5, %v1676_v61  ;;  %vm4926_vm15 = vcmp.eq.f32.partialorder %v1180_v62, 8.507059e+37  ;;  %v1157_v14 = vmul.f32 %v4105_v4, %v4877_v28  ;;  %v1190_v15 = vadd.f32 %v4101_v47, %v1189_v10  ;;  %v1174_v11 = vmul.f32 %v4103_v55, %v1173_v56  ;;  %v597_v56 = vpop.xlane.xlu0 %596 }
 0x101   : > { %1724 = vst.msk [vmem:[#allocation2 + $0x48] sm:$0xf] %vm1705_vm5, %v1675_v5  ;;  %vm1177_vm0 = vweird.f32 %v4103_v55  ;;  %4106 = vrcp.f32 %v4922_v12  ;;  %v1183_v17 = vor.u32 1.1754944e-38, %v1182_v1  ;;  %v1167_v6 = vand.u32 2147483648, %v4877_v28 }
 0x102   : > { %v1158_v19 = vsub.f32 1.0, %v1157_v14  ;;  %4108 = vpow2.f32 %v4826_v53  ;;  %v1194_v21 = vsel %vm1193_vm1, %v4101_v47, %v1190_v15  ;;  %v1175_v22 = vadd.f32 %v4103_v55, %v1174_v11  ;;  %vm1178_vm2 = vmor %vm1176_vm14, %vm1177_vm0 }
 0x103   : > { %4110 = vpow2.f32 %v4831_v57  ;;  %v3534_v23 = vmul.f32 -1.442695, %v594_v25  ;;  %v1199_v27 = vsel %vm4916_vm13, %v1198_v7, %v1194_v21  ;;  %vm1162_vm3 = vweird.f32 %v4105_v4 }
 0x104   : > { %v1159_v29 = vmul.f32 %v4105_v4, %v1158_v19  ;;  %v1165_v53 = vand.u32 2147483647, %v4877_v28  ;;  %v1632_v30 = vmul.f32 %v1584_v16, %v1199_v27  ;;  %v1179_v31 = vsel %vm1178_vm2, %v4103_v55, %v1175_v22 }
 0x105   : > { %4112 = vpow2.f32 %v3534_v23  ;;  %v3533_v57 = vmul.f32 -1.442695, %v591_v51  ;;  %v1184_v33 = vsel %vm4926_vm15, %v1183_v17, %v1179_v31  ;;  %vm1161_vm4 = vweird.f32 %v4877_v28  ;;  %v600_v28 = vpop.xlane.xlu1 %599  ;;  %v1588_v17 = vld [vmem:[%s6215_s2 + $0xd8] sm:$0xff] }
 0x106   : > { %v1160_v35 = vadd.f32 %v4105_v4, %v1159_v29  ;;  %v3532_v36 = vmul.f32 -1.442695, %v588_v26  ;;  %v1680_v38 = vpack.c.bf16 %v1632_v30, %v1632_v30  ;;  %v1631_v18 = vmul.f32 %v1583_v9, %v1184_v33  ;;  %vm1163_vm6 = vmor %vm1161_vm4, %vm1162_vm3 }
 0x107   : > { %v4107_v37 = vpop.eup %4106  ;;  %v1168_v32 = vor.u32 1.1754944e-38, %v1167_v6  ;;  %4114 = vpow2.f32 %v3533_v57  ;;  %vm1166_vm7 = vcmp.eq.f32.partialorder %v1165_v53, 8.507059e+37  ;;  %v3537_v45 = vmul.f32 -1.442695, %v603_v24  ;;  %v5003_v53 = vpop.xlane.xlu2 %611 }
 0x108   : > { %v4109_v40 = vpop.eup %4108  ;;  %v1164_v43 = vsel %vm1163_vm6, %v4105_v4, %v1160_v35  ;;  %v1232_v44 = vmul.f32 %v4107_v37, %v4922_v12  ;;  %4116 = vpow2.f32 %v3532_v36  ;;  %1729 = vst.msk [vmem:[#allocation2 + $0x5c] sm:$0xf] %vm1705_vm5, %v1680_v38  ;;  %v1679_v46 = vpack.c.bf16 %v1631_v18, %v1631_v18 }
 0x109   : > { %v4111_v20 = vpop.eup %4110  ;;  %v1169_v41 = vsel %vm1166_vm7, %v1168_v32, %v1164_v43  ;;  %v4960_v47 = vadd.f32 1.0, %v4109_v40  ;;  %v1240_v8 = vand.u32 2147483647, %v4922_v12  ;;  %v1242_v34 = vand.u32 2147483648, %v4922_v12  ;;  %v1586_v40 = vld [vmem:[%s6215_s2 + $0xc8] sm:$0xff] }
 0x10a   : > { %v1630_v49 = vmul.f32 %v1582_v39, %v1169_v41  ;;  %v1233_v50 = vsub.f32 1.0, %v1232_v44  ;;  %v4963_v42 = vadd.f32 1.0, %v4111_v20  ;;  %1728 = vst.msk [vmem:[#allocation2 + $0x58] sm:$0xf] %vm1705_vm5, %v1679_v46  ;;  %v3536_v54 = vmul.f32 -1.442695, %v600_v28 }
 0x10b   : > { %v4113_v52 = vpop.eup %4112  ;;  %4118 = vrcp.f32 %v4960_v47  ;;  %vm1237_vm8 = vweird.f32 %v4107_v37  ;;  %vm1236_vm9 = vweird.f32 %v4922_v12  ;;  %v1225_v60 = vand.u32 2147483647, %v4960_v47  ;;  %v1585_v41 = vld [vmem:[%s6215_s2 + $0xc0] sm:$0xff] }
 0x10c   : > { %v1678_v55 = vpack.c.bf16 %v1630_v49, %v1630_v49  ;;  %v1234_v58 = vmul.f32 %v4107_v37, %v1233_v50  ;;  %4120 = vrcp.f32 %v4963_v42  ;;  %v1227_v63 = vand.u32 2147483648, %v4960_v47  ;;  %vm1238_vm10 = vmor %vm1236_vm9, %vm1237_vm8 }
 0x10d   : > { %v4115_v59 = vpop.eup %4114  ;;  %4122 = vpow2.f32 %v3537_v45  ;;  %v4973_v0 = vadd.f32 1.0, %v4113_v52  ;;  %vm1241_vm11 = vcmp.eq.f32.partialorder %v1240_v8, 8.507059e+37  ;;  %v1243_v61 = vor.u32 1.1754944e-38, %v1242_v34  ;;  %v609_v34 = vpop.xlane.xlu1 %608 }
 0x10e   : > { %v4117_v62 = vpop.eup %4116  ;;  %1727 = vst.msk [vmem:[#allocation2 + $0x54] sm:$0xf] %vm1705_vm5, %v1678_v55  ;;  %v1235_v25 = vadd.f32 %v4107_v37, %v1234_v58  ;;  %v4975_v2 = vadd.f32 1.0, %v4115_v59  ;;  %v1210_v3 = vand.u32 2147483647, %v4963_v42  ;;  %4124 = vpow2.f32 %v3536_v54  ;;  %v606_v54 = vpop.xlane.xlu0 %605 }
 0x10f   : > { %vm1221_vm12 = vweird.f32 %v4960_v47  ;;  %4126 = vrcp.f32 %v4973_v0  ;;  %v4983_v51 = vadd.f32 1.0, %v4117_v62  ;;  %vm1206_vm13 = vweird.f32 %v4963_v42 }
 0x110   : > { %v1239_v1 = vsel %vm1238_vm10, %v4107_v37, %v1235_v25  ;;  %v1212_v10 = vand.u32 2147483648, %v4963_v42  ;;  %4128 = vrcp.f32 %v4975_v2  ;;  %vm4989_vm14 = vcmp.eq.f32.partialorder %v1225_v60, 8.507059e+37 }
 0x111   : > { %v4119_v4 = vpop.eup %4118  ;;  %v1244_v5 = vsel %vm1241_vm11, %v1243_v61, %v1239_v1  ;;  %v1228_v15 = vor.u32 1.1754944e-38, %v1227_v63  ;;  %vm4994_vm15 = vcmp.eq.f32.partialorder %v1210_v3, 8.507059e+37  ;;  %v1285_v19 = vand.u32 2147483647, %v4973_v0 }
 0x112   : > { %v4121_v12 = vpop.eup %4120  ;;  %v1635_v7 = vmul.f32 %v1587_v48, %v1244_v5  ;;  %v1217_v13 = vmul.f32 %v4119_v4, %v4960_v47  ;;  %v1287_v6 = vand.u32 2147483648, %v4973_v0  ;;  %v1270_v23 = vand.u32 2147483647, %v4975_v2  ;;  %v1590_v48 = vld [vmem:[%s6215_s2 + $0xe8] sm:$0xff] }
 0x113   : > { %v4123_v11 = vpop.eup %4122  ;;  %v1202_v16 = vmul.f32 %v4121_v12, %v4963_v42  ;;  %4130 = vrcp.f32 %v4983_v51  ;;  %v1213_v9 = vor.u32 1.1754944e-38, %v1212_v10  ;;  %vm1281_vm0 = vweird.f32 %v4973_v0  ;;  %v1589_v10 = vld [vmem:[%s6215_s2 + $0xe0] sm:$0xff] }
 0x114   : > { %v1683_v21 = vpack.c.bf16 %v1635_v7, %v1635_v7  ;;  %v1218_v22 = vsub.f32 1.0, %v1217_v13  ;;  %v4125_v26 = vpop.eup %4124  ;;  %v3535_v29 = vmul.f32 -1.442695, %v597_v56  ;;  %vm1222_vm1 = vweird.f32 %v4119_v4 }
 0x115   : > { %v1203_v27 = vsub.f32 1.0, %v1202_v16  ;;  %v4127_v30 = vpop.eup %4126  ;;  %vm1266_vm2 = vweird.f32 %v4975_v2  ;;  %v1272_v57 = vand.u32 2147483648, %v4975_v2  ;;  %v5008_v33 = vadd.f32 1.0, %v4123_v11  ;;  %vm1223_vm7 = vmor %vm1221_vm12, %vm1222_vm1 }
 0x116   : > { %1732 = vst.msk [vmem:[#allocation2 + $0x68] sm:$0xf] %vm1705_vm5, %v1683_v21  ;;  %v1219_v31 = vmul.f32 %v4119_v4, %v1218_v22  ;;  %v4129_v35 = vpop.eup %4128  ;;  %vm1207_vm3 = vweird.f32 %v4121_v12  ;;  %v1277_v24 = vmul.f32 %v4127_v30, %v4973_v0  ;;  %vm5011_vm4 = vcmp.eq.f32.partialorder %v1285_v19, 8.507059e+37 }
 0x117   : > { %v1204_v36 = vmul.f32 %v4121_v12, %v1203_v27  ;;  %v1288_v18 = vor.u32 1.1754944e-38, %v1287_v6  ;;  %v1262_v39 = vmul.f32 %v4129_v35, %v4975_v2  ;;  %vm5016_vm6 = vcmp.eq.f32.partialorder %v1270_v23, 8.507059e+37  ;;  %vm1208_vm9 = vmor %vm1206_vm13, %vm1207_vm3 }
 0x118   : > { %v1220_v38 = vadd.f32 %v4119_v4, %v1219_v31  ;;  %v1278_v44 = vsub.f32 1.0, %v1277_v24  ;;  %vm1251_vm8 = vweird.f32 %v4983_v51  ;;  %v1255_v28 = vand.u32 2147483647, %v4983_v51 }
 0x119   : > { %v1205_v43 = vadd.f32 %v4121_v12, %v1204_v36  ;;  %4132 = vrcp.f32 %v5008_v33  ;;  %v4131_v20 = vpop.eup %4130  ;;  %vm1282_vm10 = vweird.f32 %v4127_v30  ;;  %v1263_v47 = vsub.f32 1.0, %v1262_v39  ;;  %v615_v36 = vpop.xlane.xlu0 %614  ;;  %v1593_v39 = vld [vmem:[%s6215_s2 + $0x100] sm:$0xff] }
 0x11a   : > { %v1224_v46 = vsel %vm1223_vm7, %v4119_v4, %v1220_v38  ;;  %v1273_v45 = vor.u32 1.1754944e-38, %v1272_v57  ;;  %v1279_v8 = vmul.f32 %v4127_v30, %v1278_v44  ;;  %v1247_v52 = vmul.f32 %v4131_v20, %v4983_v51  ;;  %vm1283_vm12 = vmor %vm1281_vm0, %vm1282_vm10 }
 0x11b   : > { %v1229_v49 = vsel %vm4989_vm14, %v1228_v15, %v1224_v46  ;;  %v1209_v50 = vsel %vm1208_vm9, %v4121_v12, %v1205_v43  ;;  %v1264_v59 = vmul.f32 %v4129_v35, %v1263_v47  ;;  %vm1267_vm11 = vweird.f32 %v4129_v35  ;;  %v621_v12 = vpop.xlane.xlu2 %620 }
 0x11c   : > { %v1634_v55 = vmul.f32 %v1586_v40, %v1229_v49  ;;  %v1214_v58 = vsel %vm4994_vm15, %v1213_v9, %v1209_v50  ;;  %v1280_v60 = vadd.f32 %v4127_v30, %v1279_v8  ;;  %v1248_v62 = vsub.f32 1.0, %v1247_v52  ;;  %vm1268_vm14 = vmor %vm1266_vm2, %vm1267_vm11 }
 0x11d   : > { %v1633_v42 = vmul.f32 %v1585_v41, %v1214_v58  ;;  %v1257_v25 = vand.u32 2147483648, %v4983_v51  ;;  %v1265_v61 = vadd.f32 %v4129_v35, %v1264_v59  ;;  %vm1252_vm13 = vweird.f32 %v4131_v20 }
 0x11e   : > { %v1682_v63 = vpack.c.bf16 %v1634_v55, %v1634_v55  ;;  %v5046_v3 = vadd.f32 1.0, %v4125_v26  ;;  %v1284_v5 = vsel %vm1283_vm12, %v4127_v30, %v1280_v60  ;;  %v1249_v56 = vmul.f32 %v4131_v20, %v1248_v62  ;;  %vm1253_vm0 = vmor %vm1251_vm8, %vm1252_vm13 }
 0x11f   : > { %v4133_v1 = vpop.eup %4132  ;;  %v1681_v4 = vpack.c.bf16 %v1633_v42, %v1633_v42  ;;  %4134 = vpow2.f32 %v3535_v29  ;;  %v1289_v0 = vsel %vm5011_vm4, %v1288_v18, %v1284_v5  ;;  %v1269_v7 = vsel %vm1268_vm14, %v4129_v35, %v1265_v61  ;;  %v618_v35 = vpop.xlane.xlu1 %617 }
 0x120   : > { %1731 = vst.msk [vmem:[#allocation2 + $0x64] sm:$0xf] %vm1705_vm5, %v1682_v63  ;;  %vm5057_vm15 = vcmp.eq.f32.partialorder %v1255_v28, 8.507059e+37  ;;  %v1322_v14 = vmul.f32 %v4133_v1, %v5008_v33  ;;  %v1638_v15 = vmul.f32 %v1590_v48, %v1289_v0  ;;  %v1274_v2 = vsel %vm5016_vm6, %v1273_v45, %v1269_v7 }
 0x121   : > { %1730 = vst.msk [vmem:[#allocation2 + $0x60] sm:$0xf] %vm1705_vm5, %v1681_v4  ;;  %v1250_v11 = vadd.f32 %v4131_v20, %v1249_v56  ;;  %4136 = vrcp.f32 %v5046_v3  ;;  %v1637_v16 = vmul.f32 %v1589_v10, %v1274_v2  ;;  %v1258_v19 = vor.u32 1.1754944e-38, %v1257_v25  ;;  %v1592_v25 = vld [vmem:[%s6215_s2 + $0xf8] sm:$0xff] }
 0x122   : > { %v1323_v6 = vsub.f32 1.0, %v1322_v14  ;;  %v1330_v21 = vand.u32 2147483647, %v5008_v33  ;;  %v1686_v22 = vpack.c.bf16 %v1638_v15, %v1638_v15  ;;  %v1332_v26 = vand.u32 2147483648, %v5008_v33 }
 0x123   : > { %v1254_v23 = vsel %vm1253_vm0, %v4131_v20, %v1250_v11  ;;  %v3540_v27 = vmul.f32 -1.442695, %v5003_v53  ;;  %v1685_v9 = vpack.c.bf16 %v1637_v16, %v1637_v16  ;;  %vm1327_vm1 = vweird.f32 %v4133_v1  ;;  %v630_v46 = vpop.xlane.xlu2 %629 }
 0x124   : > { %v1259_v29 = vsel %vm5057_vm15, %v1258_v19, %v1254_v23  ;;  %v1324_v30 = vmul.f32 %v4133_v1, %v1323_v6  ;;  %1735 = vst.msk [vmem:[#allocation2 + $0x74] sm:$0xf] %vm1705_vm5, %v1686_v22  ;;  %v3539_v57 = vmul.f32 -1.442695, %v609_v34  ;;  %vm1326_vm2 = vweird.f32 %v5008_v33 }
 0x125   : > { %v4135_v31 = vpop.eup %4134  ;;  %v1636_v51 = vmul.f32 %v1588_v17, %v1259_v29  ;;  %4138 = vpow2.f32 %v3540_v27  ;;  %1734 = vst.msk [vmem:[#allocation2 + $0x70] sm:$0xf] %vm1705_vm5, %v1685_v9  ;;  %v3538_v37 = vmul.f32 -1.442695, %v606_v54  ;;  %vm1328_vm3 = vmor %vm1326_vm2, %vm1327_vm1  ;;  %v1333_v32 = vor.u32 1.1754944e-38, %v1332_v26  ;;  %v1591_v27 = vld [vmem:[%s6215_s2 + $0xf0] sm:$0xff] }
 0x126   : > { %v1325_v24 = vadd.f32 %v4133_v1, %v1324_v30  ;;  %v5080_v53 = vadd.f32 1.0, %v4135_v31  ;;  %4140 = vpow2.f32 %v3539_v57  ;;  %v3543_v40 = vmul.f32 -1.442695, %v621_v12 }
 0x127   : > { %v4137_v38 = vpop.eup %4136  ;;  %v1684_v18 = vpack.c.bf16 %v1636_v51, %v1636_v51  ;;  %vm1331_vm4 = vcmp.eq.f32.partialorder %v1330_v21, 8.507059e+37  ;;  %v1315_v28 = vand.u32 2147483647, %v5046_v3  ;;  %v3542_v20 = vmul.f32 -1.442695, %v618_v35 }
 0x128   : > { %v1329_v43 = vsel %vm1328_vm3, %v4133_v1, %v1325_v24  ;;  %v1307_v44 = vmul.f32 %v4137_v38, %v5046_v3  ;;  %4142 = vrcp.f32 %v5080_v53  ;;  %v1317_v45 = vand.u32 2147483648, %v5046_v3  ;;  %v624_v1 = vpop.xlane.xlu0 %623 }
 0x129   : > { %1733 = vst.msk [vmem:[#allocation2 + $0x6c] sm:$0xf] %vm1705_vm5, %v1684_v18  ;;  %v1334_v33 = vsel %vm1331_vm4, %v1333_v32, %v1329_v43  ;;  %4144 = vpow2.f32 %v3538_v37  ;;  %vm1312_vm6 = vweird.f32 %v4137_v38  ;;  %v1300_v50 = vand.u32 2147483647, %v5080_v53 }
 0x12a   : > { %v1641_v41 = vmul.f32 %v1593_v39, %v1334_v33  ;;  %v1308_v47 = vsub.f32 1.0, %v1307_v44  ;;  %v1302_v8 = vand.u32 2147483648, %v5080_v53  ;;  %4146 = vpow2.f32 %v3543_v40 }
 0x12b   : > { %v4139_v49 = vpop.eup %4138  ;;  %v3541_v55 = vmul.f32 -1.442695, %v615_v36  ;;  %vm1311_vm7 = vweird.f32 %v5046_v3  ;;  %4148 = vpow2.f32 %v3542_v20  ;;  %vm5097_vm8 = vcmp.eq.f32.partialorder %v1315_v28, 8.507059e+37  ;;  %v627_v3 = vpop.xlane.xlu1 %626 }
 0x12c   : > { %v1689_v52 = vpack.c.bf16 %v1641_v41, %v1641_v41  ;;  %v1309_v34 = vmul.f32 %v4137_v38, %v1308_v47  ;;  %v5093_v54 = vadd.f32 1.0, %v4139_v49  ;;  %v4141_v58 = vpop.eup %4140  ;;  %v1318_v62 = vor.u32 1.1754944e-38, %v1317_v45  ;;  %vm1313_vm9 = vmor %vm1311_vm7, %vm1312_vm6  ;;  %v639_v21 = vpop.xlane.xlu2 %638 }
 0x12d   : > { %vm1296_vm10 = vweird.f32 %v5080_v53  ;;  %vm5108_vm11 = vcmp.eq.f32.partialorder %v1300_v50, 8.507059e+37  ;;  %v5112_v61 = vadd.f32 1.0, %v4141_v58  ;;  %v1303_v10 = vor.u32 1.1754944e-38, %v1302_v8  ;;  %v1596_v8 = vld [vmem:[%s6215_s2 + $0x118] sm:$0xff] }
 0x12e   : > { %v4143_v59 = vpop.eup %4142  ;;  %1738 = vst.msk [vmem:[#allocation2 + $0x80] sm:$0xf] %vm1705_vm5, %v1689_v52  ;;  %v1310_v42 = vadd.f32 %v4137_v38, %v1309_v34  ;;  %4150 = vrcp.f32 %v5093_v54  ;;  %v3546_v56 = vmul.f32 -1.442695, %v630_v46  ;;  %v1375_v13 = vand.u32 2147483647, %v5093_v54 }
 0x12f   : > { %v1292_v63 = vmul.f32 %v4143_v59, %v5080_v53  ;;  %v4145_v4 = vpop.eup %4144  ;;  %4152 = vpow2.f32 %v3541_v55  ;;  %vm1297_vm12 = vweird.f32 %v4143_v59  ;;  %v5118_v15 = vmul.f32 -1.442695, %v627_v3  ;;  %v1595_v3 = vld [vmem:[%s6215_s2 + $0x110] sm:$0xff] }
 0x130   : > { %v1314_v5 = vsel %vm1313_vm9, %v4137_v38, %v1310_v42  ;;  %v4147_v12 = vpop.eup %4146  ;;  %4154 = vrcp.f32 %v5112_v61  ;;  %v5120_v2 = vmul.f32 -1.442695, %v624_v1  ;;  %v1377_v17 = vand.u32 2147483648, %v5093_v54  ;;  %vm1298_vm15 = vmor %vm1296_vm10, %vm1297_vm12 }
 0x131   : > { %v1319_v0 = vsel %vm5097_vm8, %v1318_v62, %v1314_v5  ;;  %v1293_v7 = vsub.f32 1.0, %v1292_v63  ;;  %v4149_v11 = vpop.eup %4148  ;;  %v5123_v19 = vadd.f32 1.0, %v4145_v4  ;;  %v5125_v6 = vadd.f32 1.0, %v4147_v12 }
 0x132   : > { %v1640_v14 = vmul.f32 %v1592_v25, %v1319_v0  ;;  %vm1371_vm13 = vweird.f32 %v5093_v54  ;;  %v1360_v26 = vand.u32 2147483647, %v5112_v61  ;;  %4156 = vpow2.f32 %v3546_v56 }
 0x133   : > { %v1294_v16 = vmul.f32 %v4143_v59, %v1293_v7  ;;  %vm5133_vm14 = vcmp.eq.f32.partialorder %v1375_v13, 8.507059e+37  ;;  %4158 = vrcp.f32 %v5123_v19  ;;  %v1362_v51 = vand.u32 2147483648, %v5112_v61 }
 0x134   : > { %v4151_v22 = vpop.eup %4150  ;;  %v1688_v23 = vpack.c.bf16 %v1640_v14, %v1640_v14  ;;  %4160 = vrcp.f32 %v5125_v6  ;;  %v5144_v57 = vadd.f32 1.0, %v4149_v11  ;;  %v5146_v35 = vmul.f32 -1.442695, %v639_v21 }
 0x135   : > { %v1295_v9 = vadd.f32 %v4143_v59, %v1294_v16  ;;  %v1367_v29 = vmul.f32 %v4151_v22, %v5093_v54  ;;  %v4153_v31 = vpop.eup %4152  ;;  %v1378_v38 = vor.u32 1.1754944e-38, %v1377_v17  ;;  %vm1356_vm0 = vweird.f32 %v5112_v61  ;;  %v1594_v16 = vld [vmem:[%s6215_s2 + $0x108] sm:$0xff] }
 0x136   : > { %1737 = vst.msk [vmem:[#allocation2 + $0x7c] sm:$0xf] %vm1705_vm5, %v1688_v23  ;;  %v4155_v36 = vpop.eup %4154  ;;  %vm1372_vm1 = vweird.f32 %v4151_v22  ;;  %vm5152_vm2 = vcmp.eq.f32.partialorder %v1360_v26, 8.507059e+37  ;;  %v1345_v32 = vand.u32 2147483647, %v5123_v19  ;;  %v1347_v44 = vand.u32 2147483648, %v5123_v19 }
 0x137   : > { %v1299_v24 = vsel %vm1298_vm15, %v4143_v59, %v1295_v9  ;;  %v1368_v37 = vsub.f32 1.0, %v1367_v29  ;;  %v1352_v53 = vmul.f32 %v4155_v36, %v5112_v61  ;;  %v1420_v33 = vand.u32 2147483647, %v5125_v6  ;;  %vm1373_vm6 = vmor %vm1371_vm13, %vm1372_vm1  ;;  %v1599_v9 = vld [vmem:[%s6215_s2 + $0x130] sm:$0xff] }
 0x138   : > { %v1304_v18 = vsel %vm5108_vm11, %v1303_v10, %v1299_v24  ;;  %v4157_v28 = vpop.eup %4156  ;;  %v1363_v46 = vor.u32 1.1754944e-38, %v1362_v51  ;;  %4162 = vrcp.f32 %v5144_v57  ;;  %v5160_v41 = vadd.f32 1.0, %v4153_v31 }
 0x139   : > { %v1639_v40 = vmul.f32 %v1591_v27, %v1304_v18  ;;  %v1369_v43 = vmul.f32 %v4151_v22, %v1368_v37  ;;  %v1353_v20 = vsub.f32 1.0, %v1352_v53  ;;  %v4159_v47 = vpop.eup %4158  ;;  %vm1341_vm3 = vweird.f32 %v5123_v19 }
 0x13a   : > { %vm1416_vm4 = vweird.f32 %v5125_v6  ;;  %v4161_v50 = vpop.eup %4160  ;;  %vm1357_vm7 = vweird.f32 %v4155_v36  ;;  %v1337_v34 = vmul.f32 %v4159_v47, %v5123_v19  ;;  %vm5171_vm8 = vcmp.eq.f32.partialorder %v1345_v32, 8.507059e+37  ;;  %v636_v19 = vpop.xlane.xlu1 %635  ;;  %v1598_v32 = vld [vmem:[%s6215_s2 + $0x128] sm:$0xff] }
 0x13b   : > { %v1687_v45 = vpack.c.bf16 %v1639_v40, %v1639_v40  ;;  %v1370_v49 = vadd.f32 %v4151_v22, %v1369_v43  ;;  %v1354_v52 = vmul.f32 %v4155_v36, %v1353_v20  ;;  %v1348_v59 = vor.u32 1.1754944e-38, %v1347_v44  ;;  %vm1358_vm10 = vmor %vm1356_vm0, %vm1357_vm7  ;;  %v633_v44 = vpop.xlane.xlu0 %632 }
 0x13c   : > { %v1412_v42 = vmul.f32 %v4161_v50, %v5125_v6  ;;  %vm5177_vm9 = vcmp.eq.f32.partialorder %v1420_v33, 8.507059e+37  ;;  %v1338_v25 = vsub.f32 1.0, %v1337_v34  ;;  %v1422_v63 = vand.u32 2147483648, %v5125_v6 }
 0x13d   : > { %1736 = vst.msk [vmem:[#allocation2 + $0x78] sm:$0xf] %vm1705_vm5, %v1687_v45  ;;  %v1374_v58 = vsel %vm1373_vm6, %v4151_v22, %v1370_v49  ;;  %v1355_v62 = vadd.f32 %v4155_v36, %v1354_v52  ;;  %vm1401_vm11 = vweird.f32 %v5144_v57  ;;  %4164 = vrcp.f32 %v5160_v41 }
 0x13e   : > { %v1379_v54 = vsel %vm5133_vm14, %v1378_v38, %v1374_v58  ;;  %v1413_v1 = vsub.f32 1.0, %v1412_v42  ;;  %v4163_v4 = vpop.eup %4162  ;;  %v1339_v10 = vmul.f32 %v4159_v47, %v1338_v25  ;;  %vm1342_vm12 = vweird.f32 %v4159_v47  ;;  %v1597_v58 = vld [vmem:[%s6215_s2 + $0x120] sm:$0xff] }
 0x13f   : > { %v1644_v48 = vmul.f32 %v1596_v8, %v1379_v54  ;;  %v1359_v5 = vsel %vm1358_vm10, %v4155_v36, %v1355_v62  ;;  %vm1417_vm13 = vweird.f32 %v4161_v50  ;;  %v1397_v7 = vmul.f32 %v4163_v4, %v5144_v57  ;;  %vm1343_vm14 = vmor %vm1341_vm3, %vm1342_vm12 }
 0x140   : > { %v1364_v12 = vsel %vm5152_vm2, %v1363_v46, %v1359_v5  ;;  %v1414_v0 = vmul.f32 %v4161_v50, %v1413_v1  ;;  %v1340_v61 = vadd.f32 %v4159_v47, %v1339_v10  ;;  %v1405_v14 = vand.u32 2147483647, %v5144_v57  ;;  %vm1418_vm15 = vmor %vm1416_vm4, %vm1417_vm13  ;;  %v648_v46 = vpop.xlane.xlu2 %647 }
 0x141   : > { %v1692_v56 = vpack.c.bf16 %v1644_v48, %v1644_v48  ;;  %v1643_v13 = vmul.f32 %v1595_v3, %v1364_v12  ;;  %v1407_v11 = vand.u32 2147483648, %v5144_v57  ;;  %v1423_v21 = vor.u32 1.1754944e-38, %v1422_v63 }
 0x142   : > { %v1415_v17 = vadd.f32 %v4161_v50, %v1414_v0  ;;  %v1398_v22 = vsub.f32 1.0, %v1397_v7  ;;  %v5202_v23 = vadd.f32 1.0, %v4157_v28  ;;  %v1344_v27 = vsel %vm1343_vm14, %v4159_v47, %v1340_v61  ;;  %v1602_v0 = vld [vmem:[%s6215_s2 + $0x148] sm:$0xff] }
 0x143   : > { %1741 = vst.msk [vmem:[#allocation2 + $0x8c] sm:$0xf] %vm1705_vm5, %v1692_v56  ;;  %v1691_v26 = vpack.c.bf16 %v1643_v13, %v1643_v13  ;;  %vm1402_vm0 = vweird.f32 %v4163_v4  ;;  %4166 = vpow2.f32 %v5118_v15  ;;  %v4165_v29 = vpop.eup %4164  ;;  %v1349_v30 = vsel %vm5171_vm8, %v1348_v59, %v1344_v27 }
 0x144   : > { %v1419_v31 = vsel %vm1418_vm15, %v4161_v50, %v1415_v17  ;;  %v1399_v51 = vmul.f32 %v4163_v4, %v1398_v22  ;;  %4168 = vrcp.f32 %v5202_v23  ;;  %v1642_v36 = vmul.f32 %v1594_v16, %v1349_v30  ;;  %vm1403_vm2 = vmor %vm1401_vm11, %vm1402_vm0 }
 0x145   : > { %1740 = vst.msk [vmem:[#allocation2 + $0x88] sm:$0xf] %vm1705_vm5, %v1691_v26  ;;  %v1424_v24 = vsel %vm5177_vm9, %v1423_v21, %v1419_v31  ;;  %vm5217_vm1 = vcmp.eq.f32.partialorder %v1405_v14, 8.507059e+37  ;;  %v1382_v15 = vmul.f32 %v4165_v29, %v5160_v41  ;;  %v1408_v18 = vor.u32 1.1754944e-38, %v1407_v11 }
 0x146   : > { %v1647_v37 = vmul.f32 %v1599_v9, %v1424_v24  ;;  %v1400_v38 = vadd.f32 %v4163_v4, %v1399_v51  ;;  %v3548_v53 = vmul.f32 -1.442695, %v636_v19  ;;  %v1690_v39 = vpack.c.bf16 %v1642_v36, %v1642_v36 }
 0x147   : > { %v1383_v40 = vsub.f32 1.0, %v1382_v15  ;;  %v1390_v43 = vand.u32 2147483647, %v5160_v41  ;;  %4170 = vpow2.f32 %v5120_v2  ;;  %v1392_v20 = vand.u32 2147483648, %v5160_v41 }
 0x148   : > { %v1695_v33 = vpack.c.bf16 %v1647_v37, %v1647_v37  ;;  %v1404_v28 = vsel %vm1403_vm2, %v4163_v4, %v1400_v38  ;;  %4172 = vpow2.f32 %v5146_v35  ;;  %1739 = vst.msk [vmem:[#allocation2 + $0x84] sm:$0xf] %vm1705_vm5, %v1690_v39  ;;  %vm1387_vm3 = vweird.f32 %v4165_v29 }
 0x149   : > { %v4167_v47 = vpop.eup %4166  ;;  %v1409_v57 = vsel %vm5217_vm1, %v1408_v18, %v1404_v28  ;;  %v1384_v45 = vmul.f32 %v4165_v29, %v1383_v40  ;;  %4174 = vpow2.f32 %v3548_v53  ;;  %v3547_v8 = vmul.f32 -1.442695, %v633_v44  ;;  %v1601_v44 = vld [vmem:[%s6215_s2 + $0x140] sm:$0xff]  ;;  %v1608_v40 = vld [vmem:[%s6215_s2 + $0x178] sm:$0xff] }
 0x14a   : > { %v4169_v49 = vpop.eup %4168  ;;  %1744 = vst.msk [vmem:[#allocation2 + $0x98] sm:$0xf] %vm1705_vm5, %v1695_v33  ;;  %v1646_v2 = vmul.f32 %v1598_v32, %v1409_v57  ;;  %v5236_v50 = vadd.f32 1.0, %v4167_v47  ;;  %vm1386_vm4 = vweird.f32 %v5160_v41  ;;  %v3552_v34 = vmul.f32 -1.442695, %v648_v46 }
 0x14b   : > { %v1385_v52 = vadd.f32 %v4165_v29, %v1384_v45  ;;  %v1457_v35 = vmul.f32 %v4169_v49, %v5202_v23  ;;  %vm1388_vm6 = vmor %vm1386_vm4, %vm1387_vm3  ;;  %vm1391_vm7 = vcmp.eq.f32.partialorder %v1390_v43, 8.507059e+37  ;;  %v1393_v59 = vor.u32 1.1754944e-38, %v1392_v20 }
 0x14c   : > { %v1694_v55 = vpack.c.bf16 %v1646_v2, %v1646_v2  ;;  %4176 = vrcp.f32 %v5236_v50  ;;  %v1465_v62 = vand.u32 2147483647, %v5202_v23  ;;  %vm1462_vm8 = vweird.f32 %v4169_v49 }
 0x14d   : > { %v4171_v42 = vpop.eup %4170  ;;  %v1389_v60 = vsel %vm1388_vm6, %v4165_v29, %v1385_v52  ;;  %v1458_v54 = vsub.f32 1.0, %v1457_v35  ;;  %4178 = vpow2.f32 %v3547_v8  ;;  %v1467_v63 = vand.u32 2147483648, %v5202_v23 }
 0x14e   : > { %v4173_v41 = vpop.eup %4172  ;;  %1743 = vst.msk [vmem:[#allocation2 + $0x94] sm:$0xf] %vm1705_vm5, %v1694_v55  ;;  %v1394_v25 = vsel %vm1391_vm7, %v1393_v59, %v1389_v60  ;;  %v5247_v48 = vadd.f32 1.0, %v4171_v42  ;;  %4180 = vpow2.f32 %v3552_v34  ;;  %vm1461_vm9 = vweird.f32 %v5202_v23  ;;  %v642_v34 = vpop.xlane.xlu0 %641  ;;  %v1600_v60 = vld [vmem:[%s6215_s2 + $0x138] sm:$0xff] }
 0x14f   : > { %v1645_v3 = vmul.f32 %v1597_v58, %v1394_v25  ;;  %v1459_v1 = vmul.f32 %v4169_v49, %v1458_v54  ;;  %v5249_v4 = vadd.f32 1.0, %v4173_v41  ;;  %v4175_v5 = vpop.eup %4174  ;;  %vm1466_vm10 = vcmp.eq.f32.partialorder %v1465_v62, 8.507059e+37  ;;  %vm1463_vm11 = vmor %vm1461_vm9, %vm1462_vm8 }
 0x150   : > { %4182 = vrcp.f32 %v5247_v48  ;;  %v1468_v7 = vor.u32 1.1754944e-38, %v1467_v63  ;;  %vm1446_vm12 = vweird.f32 %v5236_v50  ;;  %v1450_v13 = vand.u32 2147483647, %v5236_v50 }
 0x151   : > { %v1693_v10 = vpack.c.bf16 %v1645_v3, %v1645_v3  ;;  %v1460_v56 = vadd.f32 %v4169_v49, %v1459_v1  ;;  %4184 = vrcp.f32 %v5249_v4  ;;  %v1452_v61 = vand.u32 2147483648, %v5236_v50  ;;  %v1605_v3 = vld [vmem:[%s6215_s2 + $0x160] sm:$0xff] }
 0x152   : > { %v4177_v12 = vpop.eup %4176  ;;  %v1435_v17 = vand.u32 2147483647, %v5247_v48  ;;  %v5264_v21 = vadd.f32 1.0, %v4175_v5  ;;  %v1437_v23 = vand.u32 2147483648, %v5247_v48  ;;  %v1510_v26 = vand.u32 2147483647, %v5249_v4 }
 0x153   : > { %v4179_v14 = vpop.eup %4178  ;;  %1742 = vst.msk [vmem:[#allocation2 + $0x90] sm:$0xf] %vm1705_vm5, %v1693_v10  ;;  %v1464_v11 = vsel %vm1463_vm11, %v4169_v49, %v1460_v56  ;;  %v1442_v16 = vmul.f32 %v4177_v12, %v5236_v50  ;;  %v1512_v30 = vand.u32 2147483648, %v5249_v4  ;;  %vm5272_vm13 = vcmp.eq.f32.partialorder %v1450_v13, 8.507059e+37  ;;  %v645_v49 = vpop.xlane.xlu1 %644 }
 0x154   : > { %v1469_v22 = vsel %vm1466_vm10, %v1468_v7, %v1464_v11  ;;  %v5268_v27 = vadd.f32 1.0, %v4179_v14  ;;  %v4181_v9 = vpop.eup %4180  ;;  %4186 = vrcp.f32 %v5264_v21  ;;  %v1453_v36 = vor.u32 1.1754944e-38, %v1452_v61  ;;  %v1604_v14 = vld [vmem:[%s6215_s2 + $0x158] sm:$0xff] }
 0x155   : > { %v1650_v19 = vmul.f32 %v1602_v0, %v1469_v22  ;;  %v1443_v29 = vsub.f32 1.0, %v1442_v16  ;;  %vm1431_vm14 = vweird.f32 %v5247_v48  ;;  %vm1447_vm15 = vweird.f32 %v4177_v12 }
 0x156   : > { %v4183_v31 = vpop.eup %4182  ;;  %4188 = vrcp.f32 %v5268_v27  ;;  %vm5279_vm0 = vcmp.eq.f32.partialorder %v1435_v17, 8.507059e+37  ;;  %v1438_v18 = vor.u32 1.1754944e-38, %v1437_v23  ;;  %vm1506_vm1 = vweird.f32 %v5249_v4  ;;  %vm1448_vm3 = vmor %vm1446_vm12, %vm1447_vm15 }
 0x157   : > { %v4185_v24 = vpop.eup %4184  ;;  %v1698_v6 = vpack.c.bf16 %v1650_v19, %v1650_v19  ;;  %v1444_v15 = vmul.f32 %v4177_v12, %v1443_v29  ;;  %v1427_v37 = vmul.f32 %v4183_v31, %v5247_v48  ;;  %vm5286_vm2 = vcmp.eq.f32.partialorder %v1510_v26, 8.507059e+37  ;;  %v1603_v26 = vld [vmem:[%s6215_s2 + $0x150] sm:$0xff] }
 0x158   : > { %v1502_v53 = vmul.f32 %v4185_v24, %v5249_v4  ;;  %v1513_v43 = vor.u32 1.1754944e-38, %v1512_v30  ;;  %vm1491_vm4 = vweird.f32 %v5264_v21  ;;  %v1495_v28 = vand.u32 2147483647, %v5264_v21 }
 0x159   : > { %1747 = vst.msk [vmem:[#allocation2 + $0xa4] sm:$0xf] %vm1705_vm5, %v1698_v6  ;;  %v1445_v39 = vadd.f32 %v4177_v12, %v1444_v15  ;;  %v1428_v32 = vsub.f32 1.0, %v1427_v37  ;;  %v1497_v20 = vand.u32 2147483648, %v5264_v21  ;;  %v5298_v46 = vadd.f32 1.0, %v4181_v9 }
 0x15a   : > { %v1503_v33 = vsub.f32 1.0, %v1502_v53  ;;  %v4187_v47 = vpop.eup %4186  ;;  %vm1432_vm6 = vweird.f32 %v4183_v31  ;;  %vm1507_vm7 = vweird.f32 %v4185_v24  ;;  %v1480_v35 = vand.u32 2147483647, %v5268_v27 }
 0x15b   : > { %v1449_v57 = vsel %vm1448_vm3, %v4177_v12, %v1445_v39  ;;  %v1429_v45 = vmul.f32 %v4183_v31, %v1428_v32  ;;  %v1487_v52 = vmul.f32 %v4187_v47, %v5264_v21  ;;  %v1482_v42 = vand.u32 2147483648, %v5268_v27  ;;  %vm1433_vm8 = vmor %vm1431_vm14, %vm1432_vm6 }
 0x15c   : > { %v4189_v2 = vpop.eup %4188  ;;  %v1454_v50 = vsel %vm5272_vm13, %v1453_v36, %v1449_v57  ;;  %v1504_v8 = vmul.f32 %v4185_v24, %v1503_v33  ;;  %4190 = vrcp.f32 %v5298_v46  ;;  %v3551_v41 = vmul.f32 -1.442695, %v645_v49  ;;  %vm1508_vm9 = vmor %vm1506_vm1, %vm1507_vm7 }
 0x15d   : > { %v1649_v55 = vmul.f32 %v1601_v44, %v1454_v50  ;;  %v1430_v58 = vadd.f32 %v4183_v31, %v1429_v45  ;;  %v1472_v59 = vmul.f32 %v4189_v2, %v5268_v27  ;;  %v1488_v62 = vsub.f32 1.0, %v1487_v52 }
 0x15e   : > { %v1505_v54 = vadd.f32 %v4185_v24, %v1504_v8  ;;  %v3550_v5 = vmul.f32 -1.442695, %v642_v34  ;;  %vm1492_vm10 = vweird.f32 %v4187_v47  ;;  %vm1477_vm11 = vweird.f32 %v4189_v2 }
 0x15f   : > { %v1697_v25 = vpack.c.bf16 %v1649_v55, %v1649_v55  ;;  %v1434_v63 = vsel %vm1433_vm8, %v4183_v31, %v1430_v58  ;;  %v1473_v1 = vsub.f32 1.0, %v1472_v59  ;;  %v1489_v56 = vmul.f32 %v4187_v47, %v1488_v62  ;;  %vm1493_vm13 = vmor %vm1491_vm4, %vm1492_vm10  ;;  %v1607_v59 = vld [vmem:[%s6215_s2 + $0x170] sm:$0xff]  ;;  %v1606_v62 = vld [vmem:[%s6215_s2 + $0x168] sm:$0xff] }
 0x160   : > { %v1439_v48 = vsel %vm5279_vm0, %v1438_v18, %v1434_v63  ;;  %v1509_v10 = vsel %vm1508_vm9, %v4185_v24, %v1505_v54  ;;  %vm1476_vm12 = vweird.f32 %v5268_v27  ;;  %4192 = vpow2.f32 %v3551_v41 }
 0x161   : > { %1746 = vst.msk [vmem:[#allocation2 + $0xa0] sm:$0xf] %vm1705_vm5, %v1697_v25  ;;  %v1648_v12 = vmul.f32 %v1600_v60, %v1439_v48  ;;  %v1514_v0 = vsel %vm5286_vm2, %v1513_v43, %v1509_v10  ;;  %v1474_v7 = vmul.f32 %v4189_v2, %v1473_v1  ;;  %v1490_v61 = vadd.f32 %v4187_v47, %v1489_v56  ;;  %vm1478_vm15 = vmor %vm1476_vm12, %vm1477_vm11 }
 0x162   : > { %v1653_v13 = vmul.f32 %v1605_v3, %v1514_v0  ;;  %v1498_v11 = vor.u32 1.1754944e-38, %v1497_v20  ;;  %4194 = vpow2.f32 %v3550_v5  ;;  %v4191_v17 = vpop.eup %4190  ;;  %vm1496_vm14 = vcmp.eq.f32.partialorder %v1495_v28, 8.507059e+37 }
 0x163   : > { %v1696_v4 = vpack.c.bf16 %v1648_v12, %v1648_v12  ;;  %v1475_v16 = vadd.f32 %v4189_v2, %v1474_v7  ;;  %v1494_v23 = vsel %vm1493_vm13, %v4187_v47, %v1490_v61  ;;  %v1483_v27 = vor.u32 1.1754944e-38, %v1482_v42 }
 0x164   : > { %v1701_v22 = vpack.c.bf16 %v1653_v13, %v1653_v13  ;;  %v1499_v9 = vsel %vm1496_vm14, %v1498_v11, %v1494_v23  ;;  %vm1481_vm0 = vcmp.eq.f32.partialorder %v1480_v35, 8.507059e+37  ;;  %v1547_v21 = vmul.f32 %v4191_v17, %v5298_v46 }
 0x165   : > { %1745 = vst.msk [vmem:[#allocation2 + $0x9c] sm:$0xf] %vm1705_vm5, %v1696_v4  ;;  %v1479_v19 = vsel %vm1478_vm15, %v4189_v2, %v1475_v16  ;;  %v1652_v29 = vmul.f32 %v1604_v14, %v1499_v9  ;;  %v1555_v6 = vand.u32 2147483647, %v5298_v46  ;;  %v1557_v15 = vand.u32 2147483648, %v5298_v46 }
 0x166   : > { %1750 = vst.msk [vmem:[#allocation2 + $0xb0] sm:$0xf] %vm1705_vm5, %v1701_v22  ;;  %v1484_v30 = vsel %vm1481_vm0, %v1483_v27, %v1479_v19  ;;  %v1548_v51 = vsub.f32 1.0, %v1547_v21  ;;  %v4193_v36 = vpop.eup %4192  ;;  %vm1552_vm1 = vweird.f32 %v4191_v17  ;;  %vm1551_vm2 = vweird.f32 %v5298_v46 }
 0x167   : > { %v1651_v31 = vmul.f32 %v1603_v26, %v1484_v30  ;;  %v1700_v24 = vpack.c.bf16 %v1652_v29, %v1652_v29  ;;  %v839_v53 = vadd.f32 1.0, %v4193_v36  ;;  %vm1553_vm3 = vmor %vm1551_vm2, %vm1552_vm1  ;;  %v1558_v43 = vor.u32 1.1754944e-38, %v1557_v15 }
 0x168   : > { %v4195_v37 = vpop.eup %4194  ;;  %v1549_v18 = vmul.f32 %v4191_v17, %v1548_v51  ;;  %vm1556_vm4 = vcmp.eq.f32.partialorder %v1555_v6, 8.507059e+37 }
 0x169   : > { %v1699_v38 = vpack.c.bf16 %v1651_v31, %v1651_v31  ;;  %1749 = vst.msk [vmem:[#allocation2 + $0xac] sm:$0xf] %vm1705_vm5, %v1700_v24  ;;  %v838_v39 = vadd.f32 1.0, %v4195_v37  ;;  %4196 = vrcp.f32 %v839_v53  ;;  %v1542_v2 = vand.u32 2147483648, %v839_v53 }
 0x16a   : > { %v1550_v32 = vadd.f32 %v4191_v17, %v1549_v18  ;;  %v1540_v52 = vand.u32 2147483647, %v839_v53  ;;  %vm1536_vm8 = vweird.f32 %v839_v53 }
 0x16b   : > { %1748 = vst.msk [vmem:[#allocation2 + $0xa8] sm:$0xf] %vm1705_vm5, %v1699_v38  ;;  %4198 = vrcp.f32 %v838_v39  ;;  %v1527_v35 = vand.u32 2147483648, %v838_v39  ;;  %v1525_v55 = vand.u32 2147483647, %v838_v39  ;;  %v1543_v42 = vor.u32 1.1754944e-38, %v1542_v2 }
 0x16c   : > { %v1554_v44 = vsel %vm1553_vm3, %v4191_v17, %v1550_v32  ;;  %vm1521_vm10 = vweird.f32 %v838_v39  ;;  %vm1541_vm11 = vcmp.eq.f32.partialorder %v1540_v52, 8.507059e+37 }
 0x16d   : > { %v1559_v33 = vsel %vm1556_vm4, %v1558_v43, %v1554_v44  ;;  %v1528_v41 = vor.u32 1.1754944e-38, %v1527_v35  ;;  %vm1526_vm13 = vcmp.eq.f32.partialorder %v1525_v55, 8.507059e+37 }
 0x16e   : > { %v1656_v28 = vmul.f32 %v1608_v40, %v1559_v33 }
 0x16f   : > { %v4197_v20 = vpop.eup %4196 }
 0x170   : > { %v1704_v47 = vpack.c.bf16 %v1656_v28, %v1656_v28  ;;  %v1532_v45 = vmul.f32 %v4197_v20, %v839_v53  ;;  %vm1537_vm6 = vweird.f32 %v4197_v20 }
 0x171   : > { %v4199_v57 = vpop.eup %4198  ;;  %vm1538_vm9 = vmor %vm1536_vm8, %vm1537_vm6 }
 0x172   : > { %1753 = vst.msk [vmem:[#allocation2 + $0xbc] sm:$0xf] %vm1705_vm5, %v1704_v47  ;;  %v1517_v49 = vmul.f32 %v4199_v57, %v838_v39  ;;  %v1533_v46 = vsub.f32 1.0, %v1532_v45  ;;  %vm1522_vm7 = vweird.f32 %v4199_v57 }
 0x173   : > { %vm1523_vm12 = vmor %vm1521_vm10, %vm1522_vm7 }
 0x174   : > { %v1518_v50 = vsub.f32 1.0, %v1517_v49  ;;  %v1534_v8 = vmul.f32 %v4197_v20, %v1533_v46 }
 0x176   : > { %v1519_v34 = vmul.f32 %v4199_v57, %v1518_v50  ;;  %v1535_v58 = vadd.f32 %v4197_v20, %v1534_v8 }
 0x178   : > { %v1520_v60 = vadd.f32 %v4199_v57, %v1519_v34  ;;  %v1539_v54 = vsel %vm1538_vm9, %v4197_v20, %v1535_v58 }
 0x179   : > { %v1544_v25 = vsel %vm1541_vm11, %v1543_v42, %v1539_v54 }
 0x17a   : > { %v1524_v63 = vsel %vm1523_vm12, %v4199_v57, %v1520_v60  ;;  %v1655_v3 = vmul.f32 %v1607_v59, %v1544_v25 }
 0x17b   : > { %v1529_v1 = vsel %vm1526_vm13, %v1528_v41, %v1524_v63 }
 0x17c   : > { %v1654_v5 = vmul.f32 %v1606_v62, %v1529_v1  ;;  %v1703_v48 = vpack.c.bf16 %v1655_v3, %v1655_v3 }
 0x17e   : > { %v1702_v10 = vpack.c.bf16 %v1654_v5, %v1654_v5  ;;  %1752 = vst.msk [vmem:[#allocation2 + $0xb8] sm:$0xf] %vm1705_vm5, %v1703_v48 }
 0x180   : > { %1751 = vst.msk [vmem:[#allocation2 + $0xb4] sm:$0xf] %vm1705_vm5, %v1702_v10 }
 0x181 PF: > { %v2996_v56 = vld [vmem:[%s4311_s8 + $0x10] sm:$0xff]  ;;  %v2995_v12 = vld [vmem:[%s4311_s8 + $0x8] sm:$0xff]  ;;  %v2994_v0 = vld [vmem:[%s4311_s8] sm:$0xff]  ;;  %v4259_v7 = vmov 0   ;;  %vm2393_vm5 = vcmask 523264  }
 0x182   : > { %4202 = vset.pattern.permute.xlu2 %v4259_v7  ;;  %4201 = vset.pattern.permute.xlu1 %v4259_v7  ;;  %v3838_v13 = vld [vmem:[#allocation2 + $0x38] sm:$0xff]  ;;  %v3837_v14 = vld [vmem:[#allocation2 + $0x30] sm:$0xff]  ;;  %v2998_v22 = vld [vmem:[%s4311_s8 + $0x20] sm:$0xff] }
 0x183   : > { %v5356_v61 = vld [vmem:[#allocation2 + $0x78] sm:$0xff]  ;;  %4200 = vset.pattern.permute.xlu0 %v4259_v7  ;;  %3030 = vperm.xlu2 %4202, %v2996_v56   ;;  %v5362_v11 = vld [vmem:[#allocation2 + $0x70] sm:$0xff]  ;;  %v3836_v26 = vld [vmem:[#allocation2 + $0x28] sm:$0xff] }
 0x184   : > { %3025 = vperm.xlu1 %4201, %v2995_v12   ;;  %3020 = vperm.xlu0 %4200, %v2994_v0   ;;  %v2997_v17 = vld [vmem:[%s4311_s8 + $0x18] sm:$0xff]  ;;  %v5371_v27 = vld [vmem:[#allocation2 + $0x68] sm:$0xff]  ;;  %v3835_v19 = vld [vmem:[#allocation2 + $0x20] sm:$0xff] }
 0x185   : > { %v5358_v4 = vld [vmem:[#allocation2 + $0xb8] sm:$0xff]  ;;  %2186 = vmatpush.bf16.msra.mxu0 %v3838_v13  ;;  %3974 = vmatpush.bf16.msra.mxu3 %v3838_v13  ;;  %v5373_v9 = vld [vmem:[#allocation2 + $0xa8] sm:$0xff]  ;;  %v5377_v21 = vld [vmem:[#allocation2 + $0x60] sm:$0xff] }
 0x186   : > { %2255 = vmatpush.bf16.msra.mxu1 %v5356_v61  ;;  %2324 = vmatpush.bf16.msra.mxu2 %v5358_v4  ;;  %v3001_v23 = vld [vmem:[%s4311_s8 + $0x38] sm:$0xff]  ;;  %v5379_v29 = vld [vmem:[#allocation2 + $0xa0] sm:$0xff]  ;;  %v2999_v30 = vld [vmem:[%s4311_s8 + $0x28] sm:$0xff] }
 0x187   : > { %v5364_v16 = vld [vmem:[#allocation2 + $0xb0] sm:$0xff]  ;;  %v3834_v36 = vld [vmem:[#allocation2 + $0x18] sm:$0xff]  ;;  %v3002_v18 = vld [vmem:[%s4311_s8 + $0x40] sm:$0xff] }
 0x188   : > { %v3000_v31 = vld [vmem:[%s4311_s8 + $0x30] sm:$0xff]  ;;  %v5386_v24 = vld [vmem:[#allocation2 + $0x58] sm:$0xff]  ;;  %v3003_v53 = vld [vmem:[%s4311_s8 + $0x48] sm:$0xff] }
 0x189   : > { %2187 = vmatpush.bf16.msra.mxu0 %v3837_v14  ;;  %3975 = vmatpush.bf16.msra.mxu3 %v3837_v14  ;;  %v3004_v51 = vld [vmem:[%s4311_s8 + $0x50] sm:$0xff]  ;;  %v5388_v6 = vld [vmem:[#allocation2 + $0x98] sm:$0xff]  ;;  %v3007_v39 = vld [vmem:[%s4311_s8 + $0x68] sm:$0xff] }
 0x18a   : > { %2256 = vmatpush.bf16.msra.mxu1 %v5362_v11  ;;  %2325 = vmatpush.bf16.msra.mxu2 %v5364_v16  ;;  %v3833_v15 = vld [vmem:[#allocation2 + $0x10] sm:$0xff]  ;;  %v3832_v32 = vld [vmem:[#allocation2 + $0x8] sm:$0xff]  ;;  %v3831_v44 = vld [vmem:[#allocation2] sm:$0xff] }
 0x18b   : > { %3035 = vperm.xlu2 %4202, %v2997_v17   ;;  %v5392_v37 = vld [vmem:[#allocation2 + $0x50] sm:$0xff]  ;;  %v5401_v40 = vld [vmem:[#allocation2 + $0x48] sm:$0xff]  ;;  %v5405_v33 = vld [vmem:[#allocation2 + $0x40] sm:$0xff] }
 0x18c   : > { %3040 = vperm.xlu1 %4201, %v2998_v22   ;;  %3055 = vperm.xlu0 %4200, %v3001_v23   ;;  %v5394_v38 = vld [vmem:[#allocation2 + $0x90] sm:$0xff]  ;;  %v5403_v43 = vld [vmem:[#allocation2 + $0x88] sm:$0xff]  ;;  %v5407_v28 = vld [vmem:[#allocation2 + $0x80] sm:$0xff] }
 0x18d   : > { %2188 = vmatpush.bf16.msra.mxu0 %v3836_v26  ;;  %3976 = vmatpush.bf16.msra.mxu3 %v3836_v26  ;;  %v3555_v20 = vld [vmem:[%s4321_s14] sm:$0xf]  ;;  %v3796_v47 = vld [vmem:[%s4321_s14 + $0x8] sm:$0xf0]  ;;  %v3663_v57 = vld [vmem:[%s4321_s14 + $0xd8] sm:$0xf] }
 0x18e   : > { %2257 = vmatpush.bf16.msra.mxu1 %v5371_v27  ;;  %2326 = vmatpush.bf16.msra.mxu2 %v5373_v9  ;;  %v3823_v45 = vld [vmem:[%s4321_s14 + $0xe0] sm:$0xf0]  ;;  %v3557_v46 = vld [vmem:[%s4321_s14 + $0xc] sm:$0xf0]  ;;  %v3563_v2 = vld [vmem:[%s4321_s14 + $0x8] sm:$0xf]  ;;  %v3556_v34 = vor.u32 %v3796_v47, %v3555_v20 }
 0x18f   : > { %v3795_v49 = vld [vmem:[%s4321_s14 + $0x4] sm:$0xf]  ;;  %v3797_v50 = vld [vmem:[%s4321_s14 + $0x10] sm:$0xf0]  ;;  %v3005_v8 = vld [vmem:[%s4311_s8 + $0x58] sm:$0xff]  ;;  %v3664_v55 = vor.u32 %v3823_v45, %v3663_v57 }
 0x190   : > { %v3006_v52 = vld [vmem:[%s4311_s8 + $0x60] sm:$0xff]  ;;  %v3560_v58 = vor.u32 %v3795_v49, %v3557_v46  ;;  %v3564_v59 = vor.u32 %v3797_v50, %v3563_v2  ;;  %v3008_v42 = vld [vmem:[%s4311_s8 + $0x70] sm:$0xff]  ;;  %v3009_v60 = vld [vmem:[%s4311_s8 + $0x78] sm:$0xff] }
 0x191   : > { %2189 = vmatpush.bf16.msra.mxu0 %v3835_v19  ;;  %3977 = vmatpush.bf16.msra.mxu3 %v3835_v19  ;;  %v3010_v35 = vld [vmem:[%s4311_s8 + $0x80] sm:$0xff]  ;;  %v3013_v54 = vld [vmem:[%s4311_s8 + $0x98] sm:$0xff]  ;;  %v3675_v25 = vld [vmem:[%s4321_s14 + $0xf0] sm:$0xf] }
 0x192   : > { %2258 = vmatpush.bf16.msra.mxu1 %v5377_v21  ;;  %2327 = vmatpush.bf16.msra.mxu2 %v5379_v29  ;;  %v3567_v62 = vld [vmem:[%s4321_s14 + $0x18] sm:$0xf]  ;;  %v3799_v41 = vld [vmem:[%s4321_s14 + $0x20] sm:$0xf0]  ;;  %v3826_v63 = vld [vmem:[%s4321_s14 + $0xf8] sm:$0xf0] }
 0x193   : > { %3045 = vperm.xlu2 %4202, %v2999_v30   ;;  %v3798_v3 = vld [vmem:[%s4321_s14 + $0x1c] sm:$0xf]  ;;  %v3569_v1 = vld [vmem:[%s4321_s14 + $0x24] sm:$0xf0]  ;;  %v3575_v5 = vld [vmem:[%s4321_s14 + $0x20] sm:$0xf]  ;;  %v3568_v0 = vor.u32 %v3799_v41, %v3567_v62  ;;  %v3676_v7 = vor.u32 %v3826_v63, %v3675_v25 }
 0x194   : > { %3050 = vperm.xlu1 %4201, %v3000_v31   ;;  %3070 = vperm.xlu0 %4200, %v3004_v51   ;;  %v3800_v48 = vld [vmem:[%s4321_s14 + $0x28] sm:$0xf0]  ;;  %v3012_v56 = vld [vmem:[%s4311_s8 + $0x90] sm:$0xff]  ;;  %v3572_v13 = vor.u32 %v3798_v3, %v3569_v1  ;;  %v3014_v14 = vld [vmem:[%s4311_s8 + $0xa0] sm:$0xff] }
 0x195   : > { %2190 = vmatpush.bf16.msra.mxu0 %v3834_v36  ;;  %3978 = vmatpush.bf16.msra.mxu3 %v3834_v36  ;;  %v3011_v10 = vld [vmem:[%s4311_s8 + $0x88] sm:$0xff]  ;;  %v3016_v12 = vld [vmem:[%s4311_s8 + $0xb0] sm:$0xff]  ;;  %v3802_v23 = vld [vmem:[%s4321_s14 + $0x38] sm:$0xf0] }
 0x196   : > { %2259 = vmatpush.bf16.msra.mxu1 %v5386_v24  ;;  %2328 = vmatpush.bf16.msra.mxu2 %v5388_v6  ;;  %v3163_v17 = vld [vmem:[%s4316_s11 + $0x8] sm:$0xff]  ;;  %v3579_v22 = vld [vmem:[%s4321_s14 + $0x30] sm:$0xf]  ;;  %v3801_v19 = vld [vmem:[%s4321_s14 + $0x34] sm:$0xf] }
 0x197   : > { %v3687_v26 = vld [vmem:[%s4321_s14 + $0x108] sm:$0xf]  ;;  %v3587_v30 = vld [vmem:[%s4321_s14 + $0x38] sm:$0xf]  ;;  %v3803_v31 = vld [vmem:[%s4321_s14 + $0x40] sm:$0xf0] }
 0x198   : > { %v3017_v51 = vld [vmem:[%s4311_s8 + $0xb8] sm:$0xff]  ;;  %v3162_v36 = vld [vmem:[%s4316_s11] sm:$0xff]  ;;  %v3665_v47 = vld [vmem:[%s4321_s14 + $0xe4] sm:$0xf0] }
 0x199   : > { %2191 = vmatpush.bf16.msra.mxu0 %v3833_v15  ;;  %3979 = vmatpush.bf16.msra.mxu3 %v3833_v15  ;;  %v3580_v15 = vor.u32 %v3802_v23, %v3579_v22  ;;  %v3822_v20 = vld [vmem:[%s4321_s14 + $0xdc] sm:$0xf]  ;;  %v3593_v57 = vld [vmem:[%s4321_s14 + $0x54] sm:$0xf0]  ;;  %v3599_v45 = vld [vmem:[%s4321_s14 + $0x50] sm:$0xf] }
 0x19a   : > { %2260 = vmatpush.bf16.msra.mxu1 %v5392_v37  ;;  %2329 = vmatpush.bf16.msra.mxu2 %v5394_v38  ;;  %v3806_v49 = vld [vmem:[%s4321_s14 + $0x58] sm:$0xf0]  ;;  %v3168_v46 = vld [vmem:[%s4316_s11 + $0x30] sm:$0xff]  ;;  %v3174_v41 = vld [vmem:[%s4316_s11 + $0x60] sm:$0xff] }
 0x19b   : > { %3060 = vperm.xlu2 %4202, %v3002_v18   ;;  %v3172_v2 = vld [vmem:[%s4316_s11 + $0x50] sm:$0xff]  ;;  %v3178_v25 = vld [vmem:[%s4316_s11 + $0x80] sm:$0xff] }
 0x19c   : > { %3065 = vperm.xlu1 %4201, %v3003_v53   ;;  %3085 = vperm.xlu0 %4200, %v3007_v39   ;;  %v3588_v53 = vor.u32 %v3803_v31, %v3587_v30  ;;  %v3165_v39 = vld [vmem:[%s4316_s11 + $0x18] sm:$0xff]  ;;  %v3809_v62 = vld [vmem:[%s4321_s14 + $0x70] sm:$0xf0] }
 0x19d   : > { %2192 = vmatpush.bf16.msra.mxu0 %v3832_v32  ;;  %3980 = vmatpush.bf16.msra.mxu3 %v3832_v32  ;;  %v3169_v32 = vld [vmem:[%s4316_s11 + $0x38] sm:$0xff]  ;;  %v3813_v31 = vld [vmem:[%s4321_s14 + $0x94] sm:$0xf] }
 0x19e   : > { %2261 = vmatpush.bf16.msra.mxu1 %v5401_v40  ;;  %2330 = vmatpush.bf16.msra.mxu2 %v5403_v43  ;;  %v3814_v30 = vld [vmem:[%s4321_s14 + $0x98] sm:$0xf0] }
 0x1a1   : > { %2193 = vmatpush.bf16.msra.mxu0 %v3831_v44  ;;  %3981 = vmatpush.bf16.msra.mxu3 %v3831_v44  ;;  %v3805_v44 = vld [vmem:[%s4321_s14 + $0x50] sm:$0xf0] }
 0x1a2   : > { %2262 = vmatpush.bf16.msra.mxu1 %v5405_v33  ;;  %2331 = vmatpush.bf16.msra.mxu2 %v5407_v28 }
 0x1a3   : > { %3075 = vperm.xlu2 %4202, %v3005_v8  }
 0x1a4   : > { %3080 = vperm.xlu1 %4201, %v3006_v52   ;;  %3100 = vperm.xlu0 %4200, %v3010_v35   ;;  %v3600_v52 = vor.u32 %v3806_v49, %v3599_v45  ;;  %v3171_v35 = vld [vmem:[%s4316_s11 + $0x48] sm:$0xff]  ;;  %v3818_v45 = vld [vmem:[%s4321_s14 + $0xb8] sm:$0xf0] }
 0x1a5   : > { %3982 = vmatpush.bf16.msrb.mxu3 %v5356_v61  ;;  %2194 = vmatmul.bf16.vlgmr.msra.gmra.mxu0 %v3556_v34  ;;  %v3576_v61 = vor.u32 %v3800_v48, %v3575_v5  ;;  %v3603_v34 = vld [vmem:[%s4321_s14 + $0x60] sm:$0xf]  ;;  %v3177_v5 = vld [vmem:[%s4316_s11 + $0x78] sm:$0xff] }
 0x1a6   : > { %2239 = vmatmul.bf16.vlgmr.msra.gmra.mxu3 %v3664_v55  ;;  %2263 = vmatmul.bf16.vlgmr.msra.gmra.mxu1 %v3560_v58  ;;  %v3808_v55 = vld [vmem:[%s4321_s14 + $0x68] sm:$0xf0]  ;;  %v3807_v58 = vld [vmem:[%s4321_s14 + $0x64] sm:$0xf]  ;;  %v3181_v48 = vld [vmem:[%s4316_s11 + $0x98] sm:$0xff] }
 0x1a7   : > { %2332 = vmatmul.bf16.vlgmr.msra.gmra.mxu2 %v3564_v59  ;;  %v3825_v59 = vld [vmem:[%s4321_s14 + $0xf4] sm:$0xf]  ;;  %v3604_v63 = vor.u32 %v3808_v55, %v3603_v34  ;;  %v3651_v34 = vld [vmem:[%s4321_s14 + $0xc0] sm:$0xf]  ;;  %v3820_v55 = vld [vmem:[%s4321_s14 + $0xc8] sm:$0xf0] }
 0x1a9   : > { %3983 = vmatpush.bf16.msrb.mxu3 %v5362_v11  ;;  %v3015_v11 = vld [vmem:[%s4311_s8 + $0xa8] sm:$0xff] }
 0x1ab   : > { %3090 = vperm.xlu2 %4202, %v3008_v42   ;;  %v3677_v42 = vld [vmem:[%s4321_s14 + $0xfc] sm:$0xf0] }
 0x1ac   : > { %3095 = vperm.xlu1 %4201, %v3009_v60   ;;  %3115 = vperm.xlu0 %4200, %v3013_v54   ;;  %v3605_v60 = vld [vmem:[%s4321_s14 + $0x6c] sm:$0xf0]  ;;  %v3611_v54 = vld [vmem:[%s4321_s14 + $0x68] sm:$0xf] }
 0x1ad   : > { %3984 = vmatpush.bf16.msrb.mxu3 %v5371_v27  ;;  %v3829_v27 = vld [vmem:[%s4321_s14 + $0x110] sm:$0xf0]  ;;  %v3608_v3 = vor.u32 %v3807_v58, %v3605_v60  ;;  %v3612_v1 = vor.u32 %v3809_v62, %v3611_v54  ;;  %v3653_v60 = vld [vmem:[%s4321_s14 + $0xcc] sm:$0xf0] }
 0x1b1   : > { %3985 = vmatpush.bf16.msrb.mxu3 %v5377_v21  ;;  %v3581_v21 = vld [vmem:[%s4321_s14 + $0x3c] sm:$0xf0] }
 0x1b2   : > { %v3584_v18 = vor.u32 %v3801_v19, %v3581_v21  ;;  %v3182_v19 = vld [vmem:[%s4316_s11 + $0xa0] sm:$0xff]  ;;  %v3627_v21 = vld [vmem:[%s4321_s14 + $0x90] sm:$0xf] }
 0x1b3   : > { %3105 = vperm.xlu2 %4202, %v3011_v10   ;;  %v3615_v10 = vld [vmem:[%s4321_s14 + $0x78] sm:$0xf] }
 0x1b4   : > { %3110 = vperm.xlu1 %4201, %v3012_v56   ;;  %3130 = vperm.xlu0 %4200, %v3016_v12   ;;  %v3811_v56 = vld [vmem:[%s4321_s14 + $0x80] sm:$0xf0]  ;;  %v3810_v12 = vld [vmem:[%s4321_s14 + $0x7c] sm:$0xf] }
 0x1b5   : > { %3986 = vmatpush.bf16.msrb.mxu3 %v5386_v24  ;;  %2199 = vmatmul.bf16.gmra.mxu0 %v3568_v0  ;;  %v3166_v24 = vld [vmem:[%s4316_s11 + $0x20] sm:$0xff]  ;;  %v3828_v0 = vld [vmem:[%s4321_s14 + $0x10c] sm:$0xf]  ;;  %v3616_v22 = vor.u32 %v3811_v56, %v3615_v10 }
 0x1b6   : > { %2244 = vmatmul.bf16.gmra.mxu3 %v3676_v7  ;;  %2268 = vmatmul.bf16.gmra.mxu1 %v3572_v13  ;;  %v3689_v7 = vld [vmem:[%s4321_s14 + $0x114] sm:$0xf0]  ;;  %v3617_v13 = vld [vmem:[%s4321_s14 + $0x84] sm:$0xf0] }
 0x1b7   : > { %2337 = vmatmul.bf16.gmra.mxu2 %v3576_v61  ;;  %v3623_v61 = vld [vmem:[%s4321_s14 + $0x80] sm:$0xf]  ;;  %v3692_v23 = vor.u32 %v3828_v0, %v3689_v7 }
 0x1b9   : > { %3987 = vmatpush.bf16.msrb.mxu3 %v5392_v37  ;;  %v3688_v37 = vor.u32 %v3829_v27, %v3687_v26  ;;  %v3620_v26 = vor.u32 %v3810_v12, %v3617_v13 }
 0x1bb   : > { %3120 = vperm.xlu2 %4202, %v3014_v14   ;;  %v3812_v14 = vld [vmem:[%s4321_s14 + $0x88] sm:$0xf0] }
 0x1bc   : > { %3125 = vperm.xlu1 %4201, %v3015_v11   ;;  %3193 = vperm.xlu0 %4200, %v3163_v17   ;;  %v3179_v11 = vld [vmem:[%s4316_s11 + $0x88] sm:$0xff]  ;;  %v3180_v17 = vld [vmem:[%s4316_s11 + $0x90] sm:$0xff]  ;;  %v3624_v27 = vor.u32 %v3812_v14, %v3623_v61 }
 0x1bd   : > { %3988 = vmatpush.bf16.msrb.mxu3 %v5401_v40  ;;  %v3591_v40 = vld [vmem:[%s4321_s14 + $0x48] sm:$0xf] }
 0x1be   : > { %v3592_v50 = vor.u32 %v3805_v44, %v3591_v40  ;;  %v3817_v40 = vld [vmem:[%s4321_s14 + $0xb0] sm:$0xf0]  ;;  %v3816_v44 = vld [vmem:[%s4321_s14 + $0xac] sm:$0xf] }
 0x1c1   : > { %3989 = vmatpush.bf16.msrb.mxu3 %v5405_v33  ;;  %v3804_v33 = vld [vmem:[%s4321_s14 + $0x4c] sm:$0xf] }
 0x1c2   : > { %v3596_v8 = vor.u32 %v3804_v33, %v3593_v57  ;;  %v3683_v33 = vld [vmem:[%s4321_s14 + $0xf8] sm:$0xf]  ;;  %v3647_v57 = vld [vmem:[%s4321_s14 + $0xb0] sm:$0xf] }
 0x1c3   : > { %3135 = vperm.xlu2 %4202, %v3017_v51   ;;  %v3671_v51 = vld [vmem:[%s4321_s14 + $0xe0] sm:$0xf] }
 0x1c4   : > { %3188 = vperm.xlu1 %4201, %v3162_v36   ;;  %3208 = vperm.xlu0 %4200, %v3166_v24   ;;  %v3824_v36 = vld [vmem:[%s4321_s14 + $0xe8] sm:$0xf0]  ;;  %v3629_v24 = vld [vmem:[%s4321_s14 + $0x9c] sm:$0xf0] }
 0x1c5   : > { %3990 = vmatpush.bf16.msra.mxu3 %v5358_v4  ;;  %2204 = vmatmul.bf16.gmra.mxu0 %v3580_v15  ;;  %v3164_v4 = vld [vmem:[%s4316_s11 + $0x10] sm:$0xff]  ;;  %v3635_v15 = vld [vmem:[%s4321_s14 + $0x98] sm:$0xf] }
 0x1c6   : > { %2249 = vmatmul.bf16.gmra.mxu3 %v3688_v37  ;;  %2273 = vmatmul.bf16.gmra.mxu1 %v3584_v18  ;;  %v3815_v37 = vld [vmem:[%s4321_s14 + $0xa0] sm:$0xf0]  ;;  %v3628_v18 = vor.u32 %v3814_v30, %v3627_v21 }
 0x1c7   : > { %2342 = vmatmul.bf16.gmra.mxu2 %v3588_v53  ;;  %v3672_v53 = vor.u32 %v3824_v36, %v3671_v51 }
 0x1c9   : > { %3991 = vmatpush.bf16.msra.mxu3 %v5364_v16  ;;  %v3167_v16 = vld [vmem:[%s4316_s11 + $0x28] sm:$0xff] }
 0x1cb   : > { %3198 = vperm.xlu2 %4202, %v3164_v4   ;;  %v3632_v4 = vor.u32 %v3813_v31, %v3629_v24 }
 0x1cc   : > { %3203 = vperm.xlu1 %4201, %v3165_v39   ;;  %3223 = vperm.xlu0 %4200, %v3169_v32   ;;  %v3636_v39 = vor.u32 %v3815_v37, %v3635_v15  ;;  %v3639_v32 = vld [vmem:[%s4321_s14 + $0xa8] sm:$0xf] }
 0x1cd   : > { %3992 = vmatpush.bf16.msra.mxu3 %v5373_v9  ;;  %v3668_v9 = vor.u32 %v3822_v20, %v3665_v47  ;;  %v3827_v20 = vld [vmem:[%s4321_s14 + $0x100] sm:$0xf0]  ;;  %v3641_v47 = vld [vmem:[%s4321_s14 + $0xb4] sm:$0xf0]  ;;  %v3640_v49 = vor.u32 %v3817_v40, %v3639_v32 }
 0x1d1   : > { %3993 = vmatpush.bf16.msra.mxu3 %v5379_v29  ;;  %v3170_v29 = vld [vmem:[%s4316_s11 + $0x40] sm:$0xff] }
 0x1d3   : > { %3213 = vperm.xlu2 %4202, %v3167_v16   ;;  %v3684_v16 = vor.u32 %v3827_v20, %v3683_v33 }
 0x1d4   : > { %3218 = vperm.xlu1 %4201, %v3168_v46   ;;  %3238 = vperm.xlu0 %4200, %v3172_v2   ;;  %v3644_v46 = vor.u32 %v3816_v44, %v3641_v47  ;;  %v3648_v2 = vor.u32 %v3818_v45, %v3647_v57 }
 0x1d5   : > { %3994 = vmatpush.bf16.msra.mxu3 %v5388_v6  ;;  %2209 = vmatmul.bf16.gmra.mxu0 %v3592_v50  ;;  %v3175_v6 = vld [vmem:[%s4316_s11 + $0x68] sm:$0xff] }
 0x1d6   : > { %2308 = vmatmul.bf16.vlgmr.msrb.gmra.mxu3 %v3668_v9  ;;  %2278 = vmatmul.bf16.gmra.mxu1 %v3596_v8 }
 0x1d7   : > { %2347 = vmatmul.bf16.gmra.mxu2 %v3600_v52  ;;  %v3659_v52 = vld [vmem:[%s4321_s14 + $0xc8] sm:$0xf] }
 0x1d9   : > { %3995 = vmatpush.bf16.msra.mxu3 %v5394_v38  ;;  %v3173_v38 = vld [vmem:[%s4316_s11 + $0x58] sm:$0xff] }
 0x1db   : > { %3228 = vperm.xlu2 %4202, %v3170_v29   ;;  %v3695_v29 = vld [vmem:[%s4321_s14 + $0x110] sm:$0xf] }
 0x1dc   : > { %3233 = vperm.xlu1 %4201, %v3171_v35   ;;  %3253 = vperm.xlu0 %4200, %v3175_v6   ;;  %v3830_v6 = vld [vmem:[%s4321_s14 + $0x118] sm:$0xf0] }
 0x1dd   : > { %3996 = vmatpush.bf16.msra.mxu3 %v5403_v43  ;;  %v3680_v43 = vor.u32 %v3825_v59, %v3677_v42  ;;  %v5526_v50 = vpop.permute.xlu2 %3030  ;;  %v3821_v59 = vld [vmem:[%s4321_s14 + $0xd0] sm:$0xf0]  ;;  %v3819_v42 = vld [vmem:[%s4321_s14 + $0xc4] sm:$0xf]  ;;  %v3696_v62 = vor.u32 %v3830_v6, %v3695_v29 }
 0x1e1   : > { %3997 = vmatpush.bf16.msra.mxu3 %v5407_v28  ;;  %v3176_v28 = vld [vmem:[%s4316_s11 + $0x70] sm:$0xff] }
 0x1e3   : > { %3243 = vperm.xlu2 %4202, %v3173_v38   ;;  %v3652_v38 = vor.u32 %v3820_v55, %v3651_v34 }
 0x1e4   : > { %3248 = vperm.xlu1 %4201, %v3174_v41   ;;  %3268 = vperm.xlu0 %4200, %v3178_v25   ;;  %v3660_v25 = vor.u32 %v3821_v59, %v3659_v52 }
 0x1e5   : > { %2214 = vmatmul.bf16.gmra.mxu0 %v3604_v63  ;;  %v5534_v35 = vpop.permute.xlu2 %3035  ;;  %v3656_v63 = vor.u32 %v3819_v42, %v3653_v60 }
 0x1e6   : > { %2313 = vmatmul.bf16.gmra.mxu3 %v3680_v43  ;;  %2283 = vmatmul.bf16.gmra.mxu1 %v3608_v3 }
 0x1e7   : > { %2352 = vmatmul.bf16.gmra.mxu2 %v3612_v1 }
 0x1eb   : > { %3258 = vperm.xlu2 %4202, %v3176_v28  }
 0x1ec   : > { %3263 = vperm.xlu1 %4201, %v3177_v5   ;;  %3283 = vperm.xlu0 %4200, %v3181_v48  }
 0x1ed   : > { %v5546_v1 = vpop.permute.xlu2 %3045 }
 0x1f3   : > { %3273 = vperm.xlu2 %4202, %v3179_v11  }
 0x1f4   : > { %3278 = vperm.xlu1 %4201, %v3180_v17  }
 0x1f5   : > { %2219 = vmatmul.bf16.gmra.mxu0 %v3616_v22  ;;  %v5562_v17 = vpop.permute.xlu2 %3060 }
 0x1f6   : > { %2318 = vmatmul.bf16.gmra.mxu3 %v3692_v23  ;;  %2288 = vmatmul.bf16.gmra.mxu1 %v3620_v26  ;;  %v5528_v9 = vpop.permute.xlu1 %3025  ;;  %v5530_v8 = vpop.permute.xlu0 %3020 }
 0x1f7   : > { %2357 = vmatmul.bf16.gmra.mxu2 %v3624_v27 }
 0x1fb   : > { %3288 = vperm.xlu2 %4202, %v3182_v19  }
 0x1fe   : > { %v5539_v58 = vpop.permute.xlu1 %3040  ;;  %v5544_v54 = vpop.permute.xlu0 %3055 }
 0x205   : > { %2224 = vmatmul.bf16.gmra.mxu0 %v3628_v18 }
 0x206   : > { %2377 = vmatmul.bf16.vlgmr.msra.gmra.mxu3 %v3672_v53  ;;  %2293 = vmatmul.bf16.gmra.mxu1 %v3632_v4  ;;  %v5550_v5 = vpop.permute.xlu1 %3050  ;;  %v5552_v10 = vpop.permute.xlu0 %3070 }
 0x207   : > { %2362 = vmatmul.bf16.gmra.mxu2 %v3636_v39  ;;  %v5578_v53 = vpop.permute.xlu2 %3075 }
 0x208   : > { %6299 = vst [vmem:[#allocation4_spill] sm:$0xff] %v5578_v53 }
 0x20e   : > { %v5566_v26 = vpop.permute.xlu1 %3065  ;;  %v5568_v19 = vpop.permute.xlu0 %3085 }
 0x20f   : > { %6298 = vst [vmem:[#allocation3_spill] sm:$0xff] %v5568_v19 }
 0x215   : > { %2229 = vmatmul.bf16.gmra.mxu0 %v3640_v49 }
 0x216   : > { %2382 = vmatmul.bf16.gmra.mxu3 %v3684_v16  ;;  %2298 = vmatmul.bf16.gmra.mxu1 %v3644_v46  ;;  %v5584_v32 = vpop.permute.xlu1 %3080  ;;  %v5586_v40 = vpop.permute.xlu0 %3100 }
 0x217   : > { %2367 = vmatmul.bf16.gmra.mxu2 %v3648_v2  ;;  %6300 = vst [vmem:[#allocation5_spill] sm:$0xff] %v5584_v32  ;;  %v5597_v2 = vpop.permute.xlu2 %3090 }
 0x218   : > { %6301 = vst [vmem:[#allocation6_spill] sm:$0xff] %v5586_v40 }
 0x219   : > { %6302 = vst [vmem:[#allocation7_spill] sm:$0xff] %v5597_v2 }
 0x21e   : > { %v5602_v34 = vpop.permute.xlu1 %3095  ;;  %v5604_v55 = vpop.permute.xlu0 %3115 }
 0x21f   : > { %6303 = vst [vmem:[#allocation8_spill] sm:$0xff] %v5602_v34 }
 0x220   : > { %6304 = vst [vmem:[#allocation9_spill] sm:$0xff] %v5604_v55 }
 0x222   : > { %v2195_v41 = vpop.f32.mrf.mxu0 }
 0x223   : > { %v2264_v43 = vpop.f32.mrf.mxu1 }
 0x224   : > { %v2265_v3 = vadd.f32 %v2264_v43, %v2195_v41  ;;  %v5615_v43 = vpop.permute.xlu2 %3105 }
 0x225   : > { %2234 = vmatmul.bf16.gmra.mxu0 %v3652_v38  ;;  %6305 = vst [vmem:[#allocation10_spill] sm:$0xff] %v5615_v43 }
 0x226   : > { %2387 = vmatmul.bf16.gmra.mxu3 %v3696_v62  ;;  %2303 = vmatmul.bf16.gmra.mxu1 %v3656_v63 }
 0x227   : > { %2372 = vmatmul.bf16.gmra.mxu2 %v3660_v25 }
 0x229   : > { %v5548_v28 = vpop.f32.mrf.mxu3 }
 0x22a   : > { %v2333_v48 = vpop.f32.mrf.mxu2  ;;  %v2197_v12 = vpop.f32.mrf.mxu0 }
 0x22b   : > { %v5554_v56 = vadd.f32 %v2333_v48, %v2265_v3  ;;  %v2266_v0 = vpop.f32.mrf.mxu1 }
 0x22c   : > { %v2267_v13 = vadd.f32 %v2266_v0, %v2197_v12  ;;  %v5619_v12 = vpop.permute.xlu1 %3110 }
 0x22d   : > { %v2394_v7 = vsel %vm2393_vm5, %v5554_v56, 0.0  ;;  %v2490_v14 = vmul.f32 %v5554_v56, %v5554_v56  ;;  %6306 = vst [vmem:[#allocation11_spill] sm:$0xff] %v5619_v12 }
 0x22e   : > { %2395 = vadd.xlane.f32.xlu0 %v2394_v7  ;;  %v5621_v7 = vpop.permute.xlu0 %3130 }
 0x22f   : > { %v2514_v21 = vsel %vm2393_vm5, %v2490_v14, 0.0  ;;  %6307 = vst [vmem:[#allocation12_spill] sm:$0xff] %v5621_v7 }
 0x231   : > { %v5558_v61 = vpop.f32.mrf.mxu3 }
 0x232   : > { %v2335_v11 = vpop.f32.mrf.mxu2  ;;  %v2200_v23 = vpop.f32.mrf.mxu0 }
 0x233   : > { %v5564_v22 = vadd.f32 %v2335_v11, %v2267_v13  ;;  %v2269_v27 = vpop.f32.mrf.mxu1 }
 0x234   : > { %v2270_v31 = vadd.f32 %v2269_v27, %v2200_v23 }
 0x235   : > { %v2491_v30 = vmul.f32 %v5564_v22, %v5564_v22  ;;  %v2397_v4 = vsel %vm2393_vm5, %v5564_v22, 0.0 }
 0x236   : > { %2515 = vadd.xlane.f32.xlu0 %v2514_v21 }
 0x237   : > { %v2517_v51 = vsel %vm2393_vm5, %v2491_v30, 0.0 }
 0x238   : > { %2518 = vadd.xlane.f32.xlu1 %v2517_v51  ;;  %v5631_v51 = vpop.permute.xlu2 %3120 }
 0x239   : > { %v5574_v36 = vpop.f32.mrf.mxu3  ;;  %6308 = vst [vmem:[#allocation13_spill] sm:$0xff] %v5631_v51 }
 0x23a   : > { %v2338_v24 = vpop.f32.mrf.mxu2  ;;  %v2202_v37 = vpop.f32.mrf.mxu0 }
 0x23b   : > { %v5576_v15 = vadd.f32 %v2338_v24, %v2270_v31  ;;  %v2271_v18 = vpop.f32.mrf.mxu1 }
 0x23c   : > { %v2272_v20 = vadd.f32 %v2271_v18, %v2202_v37  ;;  %v5635_v18 = vpop.permute.xlu1 %3125 }
 0x23d   : > { %v2492_v39 = vmul.f32 %v5576_v15, %v5576_v15  ;;  %v2400_v33 = vsel %vm2393_vm5, %v5576_v15, 0.0  ;;  %6309 = vst [vmem:[#allocation14_spill] sm:$0xff] %v5635_v18 }
 0x23e   : > { %2398 = vadd.xlane.f32.xlu0 %v2397_v4 }
 0x23f   : > { %v2520_v44 = vsel %vm2393_vm5, %v2492_v39, 0.0  ;;  %v5637_v39 = vpop.permute.xlu0 %3193 }
 0x240   : > { %2521 = vadd.xlane.f32.xlu2 %v2520_v44  ;;  %2401 = vadd.xlane.f32.xlu1 %v2400_v33 }
 0x241   : > { %v5591_v47 = vpop.f32.mrf.mxu3 }
 0x242   : > { %v2340_v57 = vpop.f32.mrf.mxu2  ;;  %v2205_v49 = vpop.f32.mrf.mxu0 }
 0x243   : > { %v5593_v45 = vadd.f32 %v2340_v57, %v2272_v20  ;;  %v2274_v16 = vpop.f32.mrf.mxu1 }
 0x244   : > { %v2275_v52 = vadd.f32 %v2274_v16, %v2205_v49 }
 0x245   : > { %v2493_v46 = vmul.f32 %v5593_v45, %v5593_v45  ;;  %v2403_v29 = vsel %vm2393_vm5, %v5593_v45, 0.0 }
 0x247   : > { %v2523_v6 = vsel %vm2393_vm5, %v2493_v46, 0.0 }
 0x248   : > { %2404 = vadd.xlane.f32.xlu1 %v2403_v29  ;;  %2524 = vadd.xlane.f32.xlu0 %v2523_v6  ;;  %v5648_v6 = vpop.permute.xlu2 %3135 }
 0x249   : > { %v5606_v59 = vpop.f32.mrf.mxu3  ;;  %6310 = vst [vmem:[#allocation15_spill] sm:$0xff] %v5648_v6 }
 0x24a   : > { %v2343_v42 = vpop.f32.mrf.mxu2  ;;  %v2207_v62 = vpop.f32.mrf.mxu0 }
 0x24b   : > { %v5608_v60 = vadd.f32 %v2343_v42, %v2275_v52  ;;  %v2276_v38 = vpop.f32.mrf.mxu1 }
 0x24c   : > { %v2277_v3 = vadd.f32 %v2276_v38, %v2207_v62  ;;  %v5653_v38 = vpop.permute.xlu1 %3188 }
 0x24d   : > { %v2406_v41 = vsel %vm2393_vm5, %v5608_v60, 0.0  ;;  %v2494_v25 = vmul.f32 %v5608_v60, %v5608_v60 }
 0x24e   : > { %2407 = vadd.xlane.f32.xlu2 %v2406_v41  ;;  %v5655_v41 = vpop.permute.xlu0 %3208 }
 0x24f   : > { %v2526_v63 = vsel %vm2393_vm5, %v2494_v25, 0.0 }
 0x250   : > { %2527 = vadd.xlane.f32.xlu1 %v2526_v63 }
 0x251   : > { %v5617_v48 = vpop.f32.mrf.mxu3 }
 0x252   : > { %v2345_v0 = vpop.f32.mrf.mxu2  ;;  %v2210_v14 = vpop.f32.mrf.mxu0 }
 0x253   : > { %v5623_v13 = vadd.f32 %v2345_v0, %v2277_v3  ;;  %v2279_v11 = vpop.f32.mrf.mxu1 }
 0x254   : > { %v2280_v27 = vadd.f32 %v2279_v11, %v2210_v14 }
 0x255   : > { %v2409_v23 = vsel %vm2393_vm5, %v5623_v13, 0.0  ;;  %v2495_v30 = vmul.f32 %v5623_v13, %v5623_v13 }
 0x256   : > { %2410 = vadd.xlane.f32.xlu2 %v2409_v23 }
 0x257   : > { %v2529_v44 = vsel %vm2393_vm5, %v2495_v30, 0.0 }
 0x259   : > { %v5627_v21 = vpop.f32.mrf.mxu3 }
 0x25a   : > { %v2348_v31 = vpop.f32.mrf.mxu2  ;;  %v2212_v37 = vpop.f32.mrf.mxu0 }
 0x25b   : > { %v5633_v24 = vadd.f32 %v2348_v31, %v2280_v27  ;;  %v2281_v4 = vpop.f32.mrf.mxu1  ;;  %v5666_v31 = vpop.permute.xlu2 %3198 }
 0x25c   : > { %v2282_v20 = vadd.f32 %v2281_v4, %v2212_v37  ;;  %v5668_v37 = vpop.permute.xlu1 %3203  ;;  %v5670_v4 = vpop.permute.xlu0 %3223 }
 0x25d   : > { %v2412_v33 = vsel %vm2393_vm5, %v5633_v24, 0.0  ;;  %v2496_v49 = vmul.f32 %v5633_v24, %v5633_v24 }
 0x25e   : > { %2530 = vadd.xlane.f32.xlu2 %v2529_v44  ;;  %2413 = vadd.xlane.f32.xlu0 %v2412_v33 }
 0x25f   : > { %v2532_v62 = vsel %vm2393_vm5, %v2496_v49, 0.0 }
 0x261   : > { %v5642_v57 = vpop.f32.mrf.mxu3 }
 0x262   : > { %v2350_v16 = vpop.f32.mrf.mxu2  ;;  %v2215_v52 = vpop.f32.mrf.mxu0 }
 0x263   : > { %v5646_v46 = vadd.f32 %v2350_v16, %v2282_v20  ;;  %v2284_v29 = vpop.f32.mrf.mxu1 }
 0x264   : > { %v2285_v25 = vadd.f32 %v2284_v29, %v2215_v52 }
 0x265   : > { %v2415_v42 = vsel %vm2393_vm5, %v5646_v46, 0.0  ;;  %v2497_v3 = vmul.f32 %v5646_v46, %v5646_v46 }
 0x266   : > { %2416 = vadd.xlane.f32.xlu1 %v2415_v42  ;;  %2533 = vadd.xlane.f32.xlu0 %v2532_v62 }
 0x267   : > { %v2535_v30 = vsel %vm2393_vm5, %v2497_v3, 0.0  ;;  %v5681_v3 = vpop.permute.xlu2 %3213 }
 0x269   : > { %v5657_v63 = vpop.f32.mrf.mxu3 }
 0x26a   : > { %v2353_v0 = vpop.f32.mrf.mxu2  ;;  %v2217_v11 = vpop.f32.mrf.mxu0 }
 0x26b   : > { %v5661_v14 = vadd.f32 %v2353_v0, %v2285_v25  ;;  %v2286_v23 = vpop.f32.mrf.mxu1 }
 0x26c   : > { %v2287_v44 = vadd.f32 %v2286_v23, %v2217_v11  ;;  %v5687_v23 = vpop.permute.xlu1 %3218 }
 0x26d   : > { %v2418_v27 = vsel %vm2393_vm5, %v5661_v14, 0.0  ;;  %v2498_v20 = vmul.f32 %v5661_v14, %v5661_v14 }
 0x26e   : > { %2419 = vadd.xlane.f32.xlu2 %v2418_v27  ;;  %2536 = vadd.xlane.f32.xlu1 %v2535_v30  ;;  %v5689_v30 = vpop.permute.xlu0 %3238 }
 0x26f   : > { %v2538_v42 = vsel %vm2393_vm5, %v2498_v20, 0.0  ;;  %v5700_v43 = vpop.permute.xlu2 %3228 }
 0x271   : > { %v5672_v33 = vpop.f32.mrf.mxu3 }
 0x272   : > { %v2355_v49 = vpop.f32.mrf.mxu2  ;;  %v2220_v52 = vpop.f32.mrf.mxu0 }
 0x273   : > { %v5676_v16 = vadd.f32 %v2355_v49, %v2287_v44  ;;  %v2289_v29 = vpop.f32.mrf.mxu1 }
 0x274   : > { %v2290_v25 = vadd.f32 %v2289_v29, %v2220_v52  ;;  %v5704_v40 = vpop.permute.xlu1 %3233 }
 0x275   : > { %v2421_v62 = vsel %vm2393_vm5, %v5676_v16, 0.0  ;;  %v2499_v11 = vmul.f32 %v5676_v16, %v5676_v16 }
 0x276   : > { %2539 = vadd.xlane.f32.xlu2 %v2538_v42  ;;  %2422 = vadd.xlane.f32.xlu0 %v2421_v62  ;;  %v5706_v34 = vpop.permute.xlu0 %3253 }
 0x277   : > { %v2541_v52 = vsel %vm2393_vm5, %v2499_v11, 0.0  ;;  %6312 = vst [vmem:[#allocation17_spill] sm:$0xff] %v5706_v34  ;;  %v5715_v2 = vpop.permute.xlu2 %3243 }
 0x278   : > { %6314 = vst [vmem:[#allocation19_spill] sm:$0xff] %v5715_v2 }
 0x279   : > { %v5683_v0 = vpop.f32.mrf.mxu3 }
 0x27a   : > { %v2358_v27 = vpop.f32.mrf.mxu2  ;;  %v2222_v20 = vpop.f32.mrf.mxu0 }
 0x27b   : > { %v5691_v44 = vadd.f32 %v2358_v27, %v2290_v25  ;;  %v2291_v49 = vpop.f32.mrf.mxu1 }
 0x27c   : > { %v2292_v29 = vadd.f32 %v2291_v49, %v2222_v20 }
 0x27d   : > { %v2424_v42 = vsel %vm2393_vm5, %v5691_v44, 0.0  ;;  %v2500_v6 = vmul.f32 %v5691_v44, %v5691_v44 }
 0x27e   : > { %2425 = vadd.xlane.f32.xlu1 %v2424_v42  ;;  %2542 = vadd.xlane.f32.xlu0 %v2541_v52 }
 0x27f   : > { %v2544_v20 = vsel %vm2393_vm5, %v2500_v6, 0.0  ;;  %v5720_v6 = vpop.permute.xlu1 %3248 }
 0x280   : > { %6315 = vst [vmem:[#allocation20_spill] sm:$0xff] %v5720_v6 }
 0x281   : > { %v5696_v62 = vpop.f32.mrf.mxu3 }
 0x282   : > { %v2360_v7 = vpop.f32.mrf.mxu2  ;;  %v2225_v27 = vpop.f32.mrf.mxu0 }
 0x283   : > { %v5702_v25 = vadd.f32 %v2360_v7, %v2292_v29  ;;  %v2294_v18 = vpop.f32.mrf.mxu1 }
 0x284   : > { %v2295_v49 = vadd.f32 %v2294_v18, %v2225_v27  ;;  %v5722_v18 = vpop.permute.xlu0 %3268  ;;  %v2310_v27 = vadd.f32 %v5627_v21, %v5548_v28  ;;  %v2312_v28 = vadd.f32 %v5642_v57, %v5558_v61 }
 0x285   : > { %6311 = vst [vmem:[#allocation16_spill] sm:$0xff] %v5702_v25  ;;  %v2427_v11 = vsel %vm2393_vm5, %v5702_v25, 0.0  ;;  %v2501_v42 = vmul.f32 %v5702_v25, %v5702_v25 }
 0x286   : > { %2428 = vadd.xlane.f32.xlu2 %v2427_v11  ;;  %2545 = vadd.xlane.f32.xlu1 %v2544_v20  ;;  %6316 = vst [vmem:[#allocation21_spill] sm:$0xff] %v5722_v18  ;;  %v5734_v18 = vpop.permute.xlu2 %3258 }
 0x287   : > { %v2547_v12 = vsel %vm2393_vm5, %v2501_v42, 0.0  ;;  %6319 = vst [vmem:[#allocation24_spill] sm:$0xff] %v5734_v18  ;;  %v5738_v21 = vpop.permute.xlu1 %3263 }
 0x288   : > { %6320 = vst [vmem:[#allocation25_spill] sm:$0xff] %v5738_v21 }
 0x289   : > { %v2378_v7 = vpop.f32.mrf.mxu3 }
 0x28a   : > { %v2363_v52 = vpop.f32.mrf.mxu2  ;;  %v2227_v51 = vpop.f32.mrf.mxu0  ;;  %v5726_v11 = vadd.f32 %v2378_v7, %v2310_v27 }
 0x28b   : > { %v5713_v29 = vadd.f32 %v2363_v52, %v2295_v49  ;;  %v2296_v55 = vpop.f32.mrf.mxu1 }
 0x28c   : > { %6317 = vst [vmem:[#allocation22_spill] sm:$0xff] %v5726_v11  ;;  %v2297_v20 = vadd.f32 %v2296_v55, %v2227_v51  ;;  %v5740_v51 = vpop.permute.xlu0 %3283 }
 0x28d   : > { %6313 = vst [vmem:[#allocation18_spill] sm:$0xff] %v5713_v29  ;;  %v2430_v34 = vsel %vm2393_vm5, %v5713_v29, 0.0 }
 0x28e   : > { %2548 = vadd.xlane.f32.xlu2 %v2547_v12  ;;  %2431 = vadd.xlane.f32.xlu0 %v2430_v34  ;;  %v2448_v34 = vsel %vm2393_vm5, %v5726_v11, 0.0  ;;  %6321 = vst [vmem:[#allocation26_spill] sm:$0xff] %v5740_v51 }
 0x291   : > { %v2380_v19 = vpop.f32.mrf.mxu3 }
 0x292   : > { %v2365_v49 = vpop.f32.mrf.mxu2  ;;  %v2230_v12 = vpop.f32.mrf.mxu0  ;;  %v5742_v7 = vadd.f32 %v2380_v19, %v2312_v28  ;;  %v2315_v19 = vadd.f32 %v5657_v63, %v5574_v36 }
 0x293   : > { %v5728_v52 = vadd.f32 %v2365_v49, %v2297_v20  ;;  %v2299_v6 = vpop.f32.mrf.mxu1  ;;  %v2502_v20 = vmul.f32 %v5713_v29, %v5713_v29  ;;  %v5755_v28 = vpop.permute.xlu2 %3273 }
 0x294   : > { %v2300_v55 = vadd.f32 %v2299_v6, %v2230_v12  ;;  %6322 = vst [vmem:[#allocation27_spill] sm:$0xff] %v5742_v7 }
 0x295   : > { %6318 = vst [vmem:[#allocation23_spill] sm:$0xff] %v5728_v52  ;;  %v2433_v42 = vsel %vm2393_vm5, %v5728_v52, 0.0  ;;  %v2550_v57 = vsel %vm2393_vm5, %v2502_v20, 0.0  ;;  %v2503_v21 = vmul.f32 %v5728_v52, %v5728_v52 }
 0x296   : > { %2434 = vadd.xlane.f32.xlu1 %v2433_v42  ;;  %2449 = vadd.xlane.f32.xlu0 %v2448_v34  ;;  %v2451_v34 = vsel %vm2393_vm5, %v5742_v7, 0.0  ;;  %6324 = vst [vmem:[#allocation29_spill] sm:$0xff] %v5755_v28 }
 0x297   : > { %v2553_v63 = vsel %vm2393_vm5, %v2503_v21, 0.0 }
 0x299   : > { %v2383_v61 = vpop.f32.mrf.mxu3 }
 0x29a   : > { %v2368_v27 = vpop.f32.mrf.mxu2  ;;  %v2232_v6 = vpop.f32.mrf.mxu0 }
 0x29b   : > { %v5746_v49 = vadd.f32 %v2368_v27, %v2300_v55  ;;  %v2301_v12 = vpop.f32.mrf.mxu1  ;;  %v5757_v55 = vadd.f32 %v2383_v61, %v2315_v19  ;;  %v5779_v52 = vpop.permute.xlu2 %3288 }
 0x29c   : > { %6327 = vst [vmem:[#allocation32_spill] sm:$0xff] %v5779_v52 }
 0x29d   : > { %6323 = vst [vmem:[#allocation28_spill] sm:$0xff] %v5746_v49  ;;  %v2436_v42 = vsel %vm2393_vm5, %v5746_v49, 0.0  ;;  %v2454_v36 = vsel %vm2393_vm5, %v5757_v55, 0.0 }
 0x29e   : > { %2437 = vadd.xlane.f32.xlu2 %v2436_v42  ;;  %2452 = vadd.xlane.f32.xlu1 %v2451_v34  ;;  %6325 = vst [vmem:[#allocation30_spill] sm:$0xff] %v5757_v55  ;;  %v2508_v42 = vmul.f32 %v5726_v11, %v5726_v11  ;;  %v5763_v34 = vpop.permute.xlu1 %3278  ;;  %v2504_v11 = vmul.f32 %v5746_v49, %v5746_v49 }
 0x29f   : > { %2551 = vadd.xlane.f32.xlu0 %v2550_v57  ;;  %6326 = vst [vmem:[#allocation31_spill] sm:$0xff] %v5763_v34  ;;  %v2302_v57 = vadd.f32 %v2301_v12, %v2232_v6  ;;  %v2509_v34 = vmul.f32 %v5742_v7, %v5742_v7 }
 0x2a0   : > { %v2568_v61 = vsel %vm2393_vm5, %v2508_v42, 0.0  ;;  %v2556_v32 = vsel %vm2393_vm5, %v2504_v11, 0.0  ;;  %v2510_v11 = vmul.f32 %v5757_v55, %v5757_v55 }
 0x2a1   : > { %v2396_v27 = vpop.xlane.xlu0 %2395  ;;  %v2571_v49 = vsel %vm2393_vm5, %v2509_v34, 0.0 }
 0x2a2   : > { %v2370_v51 = vpop.f32.mrf.mxu2  ;;  %v5768_v20 = vmul.f32 0.015625, %v2396_v27  ;;  %v2235_v19 = vpop.f32.mrf.mxu0 }
 0x2a3   : > { %v2304_v28 = vpop.f32.mrf.mxu1  ;;  %v5777_v27 = vadd.f32 %v2370_v51, %v2302_v57 }
 0x2a4   : > { %v2610_v21 = vmul.f32 %v5768_v20, %v5768_v20  ;;  %v2305_v42 = vadd.f32 %v2304_v28, %v2235_v19 }
 0x2a5   : > { %v2439_v7 = vsel %vm2393_vm5, %v5777_v27, 0.0 }
 0x2a6   : > { %2455 = vadd.xlane.f32.xlu2 %v2454_v36  ;;  %2554 = vadd.xlane.f32.xlu1 %v2553_v63  ;;  %v2385_v36 = vpop.f32.mrf.mxu3 }
 0x2a7   : > { %2569 = vadd.xlane.f32.xlu0 %v2568_v61 }
 0x2a9   : > { %v2516_v18 = vpop.xlane.xlu0 %2515 }
 0x2aa   : > { %v2586_v63 = vmul.f32 0.015625, %v2516_v18  ;;  %v2373_v61 = vpop.f32.mrf.mxu2  ;;  %v2317_v18 = vadd.f32 %v5672_v33, %v5591_v47 }
 0x2ab   : > { %v2519_v6 = vpop.xlane.xlu1 %2518  ;;  %v5785_v51 = vadd.f32 %v2373_v61, %v2305_v42 }
 0x2ac   : > { %v2634_v12 = vsub.f32 %v2586_v63, %v2610_v21  ;;  %v5793_v19 = vadd.f32 %v2385_v36, %v2317_v18  ;;  %v2587_v33 = vmul.f32 0.015625, %v2519_v6  ;;  %v2320_v6 = vadd.f32 %v5683_v0, %v5606_v59 }
 0x2ae   : > { %v2658_v29 = vmax.f32 %v2634_v12, 0.0  ;;  %2557 = vadd.xlane.f32.xlu2 %v2556_v32  ;;  %2572 = vadd.xlane.f32.xlu1 %v2571_v49  ;;  %v2237_v32 = vpop.f32.mrf.mxu0  ;;  %v2306_v49 = vpop.f32.mrf.mxu1  ;;  %v2574_v12 = vsel %vm2393_vm5, %v2510_v11, 0.0  ;;  %v2457_v55 = vsel %vm2393_vm5, %v5793_v19, 0.0 }
 0x2af   : > { %2440 = vadd.xlane.f32.xlu0 %v2439_v7  ;;  %v2442_v7 = vsel %vm2393_vm5, %v5785_v51, 0.0  ;;  %v2388_v47 = vpop.f32.mrf.mxu3  ;;  %v2307_v36 = vadd.f32 %v2306_v49, %v2237_v32 }
 0x2b0   : > { %v5789_v28 = vadd.f32 1e-05, %v2658_v29  ;;  %v5812_v49 = vadd.f32 %v2388_v47, %v2320_v6 }
 0x2b1   : > { %v2399_v57 = vpop.xlane.xlu0 %2398 }
 0x2b2   : > { %4203 = vrsqrt.f32 %v5789_v28  ;;  %v5796_v34 = vmul.f32 0.015625, %v2399_v57  ;;  %v2375_v18 = vpop.f32.mrf.mxu2  ;;  %vm2736_vm15 = vweird.f32 %v5789_v28 }
 0x2b3   : > { %v2522_v21 = vpop.xlane.xlu2 %2521  ;;  %v2402_v63 = vpop.xlane.xlu1 %2401 }
 0x2b4   : > { %v2611_v29 = vmul.f32 %v5796_v34, %v5796_v34  ;;  %v5802_v42 = vmul.f32 0.015625, %v2402_v63  ;;  %v2588_v52 = vmul.f32 0.015625, %v2522_v21  ;;  %v5814_v21 = vadd.f32 %v2375_v18, %v2307_v36 }
 0x2b6   : > { %v2635_v61 = vsub.f32 %v2587_v33, %v2611_v29  ;;  %v2612_v57 = vmul.f32 %v5802_v42, %v5802_v42  ;;  %2575 = vadd.xlane.f32.xlu2 %v2574_v12  ;;  %2443 = vadd.xlane.f32.xlu1 %v2442_v7  ;;  %v2505_v7 = vmul.f32 %v5777_v27, %v5777_v27 }
 0x2b7   : > { %2458 = vadd.xlane.f32.xlu0 %v2457_v55  ;;  %v2445_v55 = vsel %vm2393_vm5, %v5814_v21, 0.0  ;;  %v2390_v47 = vpop.f32.mrf.mxu3 }
 0x2b8   : > { %v4204_v63 = vpop.eup %4203  ;;  %v2659_v2 = vmax.f32 %v2635_v61, 0.0  ;;  %v2636_v32 = vsub.f32 %v2588_v52, %v2612_v57  ;;  %v2559_v18 = vsel %vm2393_vm5, %v2505_v7, 0.0  ;;  %v2682_v7 = vsub.f32 %v5554_v56, %v5768_v20 }
 0x2b9   : > { %v2731_v11 = vmul.f32 %v4204_v63, %v5789_v28  ;;  %vm2737_vm14 = vweird.f32 %v4204_v63 }
 0x2ba   : > { %v5816_v33 = vadd.f32 1e-05, %v2659_v2  ;;  %v2660_v29 = vmax.f32 %v2636_v32, 0.0  ;;  %v2460_v2 = vsel %vm2393_vm5, %v5812_v49, 0.0  ;;  %v2506_v32 = vmul.f32 %v5785_v51, %v5785_v51  ;;  %vm2738_vm0 = vmor %vm2736_vm15, %vm2737_vm14 }
 0x2bb   : > { %v2732_v12 = vmul.f32 %v4204_v63, %v2731_v11  ;;  %v2405_v53 = vpop.xlane.xlu1 %2404  ;;  %v2525_v25 = vpop.xlane.xlu0 %2524 }
 0x2bc   : > { %4205 = vrsqrt.f32 %v5816_v33  ;;  %v5821_v59 = vadd.f32 1e-05, %v2660_v29  ;;  %v5823_v0 = vmul.f32 0.015625, %v2405_v53  ;;  %v2589_v61 = vmul.f32 0.015625, %v2525_v25 }
 0x2bd   : > { %v2733_v52 = vmul.f32 0.5, %v2732_v12  ;;  %v2322_v53 = vadd.f32 %v5696_v62, %v5617_v48  ;;  %v2511_v62 = vmul.f32 %v5793_v19, %v5793_v19  ;;  %v2562_v56 = vsel %vm2393_vm5, %v2506_v32, 0.0 }
 0x2be   : > { %4207 = vrsqrt.f32 %v5821_v59  ;;  %v2613_v36 = vmul.f32 %v5823_v0, %v5823_v0  ;;  %2446 = vadd.xlane.f32.xlu2 %v2445_v55  ;;  %2461 = vadd.xlane.f32.xlu1 %v2460_v2  ;;  %vm2746_vm2 = vweird.f32 %v5816_v33  ;;  %vm2756_vm6 = vweird.f32 %v5821_v59 }
 0x2bf   : > { %v2734_v57 = vsub.f32 1.5, %v2733_v52  ;;  %2560 = vadd.xlane.f32.xlu0 %v2559_v18  ;;  %v5838_v29 = vadd.f32 %v2390_v47, %v2322_v53 }
 0x2c0   : > { %v2637_v6 = vsub.f32 %v2589_v61, %v2613_v36 }
 0x2c1   : > { %v2735_v11 = vmul.f32 %v4204_v63, %v2734_v57  ;;  %v2408_v25 = vpop.xlane.xlu2 %2407 }
 0x2c2   : > { %v4206_v12 = vpop.eup %4205  ;;  %v2661_v55 = vmax.f32 %v2637_v6, 0.0  ;;  %v5842_v48 = vmul.f32 0.015625, %v2408_v25  ;;  %v3330_v25 = vld [vmem:[%s4326_s17] sm:$0xff] }
 0x2c3   : > { %v2739_v52 = vsel %vm2738_vm0, %v4204_v63, %v2735_v11  ;;  %v2741_v2 = vmul.f32 %v4206_v12, %v5816_v33  ;;  %v2528_v36 = vpop.xlane.xlu1 %2527  ;;  %v2463_v63 = vsel %vm2393_vm5, %v5838_v29, 0.0  ;;  %v2577_v11 = vsel %vm2393_vm5, %v2511_v62, 0.0 }
 0x2c4   : > { %v4208_v28 = vpop.eup %4207  ;;  %v2970_v47 = vmul.f32 %v2739_v52, %v2682_v7  ;;  %v5847_v61 = vadd.f32 1e-05, %v2661_v55  ;;  %v2614_v18 = vmul.f32 %v5842_v48, %v5842_v48  ;;  %v2590_v57 = vmul.f32 0.015625, %v2528_v36 }
 0x2c5   : > { %v2742_v20 = vmul.f32 %v4206_v12, %v2741_v2  ;;  %v2751_v53 = vmul.f32 %v4208_v28, %v5821_v59  ;;  %v2507_v2 = vmul.f32 %v5814_v21, %v5814_v21  ;;  %vm2747_vm1 = vweird.f32 %v4206_v12  ;;  %v3331_v59 = vld [vmem:[%s4326_s17 + $0x8] sm:$0xff] }
 0x2c6   : > { %v3138_v6 = vmul.f32 %v5530_v8, %v2970_v47  ;;  %4209 = vrsqrt.f32 %v5847_v61  ;;  %2464 = vadd.xlane.f32.xlu2 %v2463_v63  ;;  %2563 = vadd.xlane.f32.xlu1 %v2562_v56  ;;  %v2638_v52 = vsub.f32 %v2590_v57, %v2614_v18  ;;  %v2512_v8 = vmul.f32 %v5812_v49, %v5812_v49  ;;  %vm2748_vm4 = vmor %vm2746_vm2, %vm2747_vm1 }
 0x2c7   : > { %v2743_v7 = vmul.f32 0.5, %v2742_v20  ;;  %v2752_v55 = vmul.f32 %v4208_v28, %v2751_v53  ;;  %2578 = vadd.xlane.f32.xlu0 %v2577_v11  ;;  %vm2757_vm3 = vweird.f32 %v4208_v28  ;;  %v2683_v57 = vsub.f32 %v5564_v22, %v5796_v34 }
 0x2c8   : > { %v3306_v32 = vadd.f32 %v5653_v38, %v3138_v6  ;;  %v2662_v56 = vmax.f32 %v2638_v52, 0.0  ;;  %v2565_v6 = vsel %vm2393_vm5, %v2507_v2, 0.0  ;;  %v2580_v11 = vsel %vm2393_vm5, %v2512_v8, 0.0  ;;  %vm2758_vm7 = vmor %vm2756_vm6, %vm2757_vm3 }
 0x2c9   : > { %v2744_v36 = vsub.f32 1.5, %v2743_v7  ;;  %v2753_v47 = vmul.f32 0.5, %v2752_v55  ;;  %v2411_v63 = vpop.xlane.xlu2 %2410  ;;  %v2684_v52 = vsub.f32 %v5576_v15, %v5802_v42  ;;  %v2513_v15 = vmul.f32 %v5838_v29, %v5838_v29 }
 0x2ca   : > { %v3354_v62 = vadd.f32 %v3330_v25, %v3306_v32  ;;  %v5865_v53 = vadd.f32 1e-05, %v2662_v56  ;;  %v5878_v22 = vmul.f32 0.015625, %v2411_v63  ;;  %vm2766_vm9 = vweird.f32 %v5847_v61 }
 0x2cb   : > { %v2745_v20 = vmul.f32 %v4206_v12, %v2744_v36  ;;  %v2754_v18 = vsub.f32 1.5, %v2753_v47 }
 0x2cc   : > { %v4210_v38 = vpop.eup %4209  ;;  %3378 = vst.msk [vmem:[%s4331_s20] sm:$0xff] %vm2393_vm5, %v3354_v62  ;;  %4211 = vrsqrt.f32 %v5865_v53  ;;  %v2615_v63 = vmul.f32 %v5878_v22, %v5878_v22  ;;  %v3332_v62 = vld [vmem:[%s4326_s17 + $0x10] sm:$0xff]  ;;  %vm2776_vm12 = vweird.f32 %v5865_v53 }
 0x2cd   : > { %v2749_v25 = vsel %vm2748_vm4, %v4206_v12, %v2745_v20  ;;  %v2755_v7 = vmul.f32 %v4208_v28, %v2754_v18  ;;  %v2761_v33 = vmul.f32 %v4210_v38, %v5847_v61  ;;  %vm2767_vm8 = vweird.f32 %v4210_v38 }
 0x2ce   : > { %v2971_v55 = vmul.f32 %v2749_v25, %v2683_v57  ;;  %2566 = vadd.xlane.f32.xlu2 %v2565_v6  ;;  %2581 = vadd.xlane.f32.xlu1 %v2580_v11  ;;  %vm2768_vm10 = vmor %vm2766_vm9, %vm2767_vm8 }
 0x2cf   : > { %v2759_v34 = vsel %vm2758_vm7, %v4208_v28, %v2755_v7  ;;  %v2762_v32 = vmul.f32 %v4210_v38, %v2761_v33  ;;  %v2685_v7 = vsub.f32 %v5593_v45, %v5823_v0  ;;  %v3333_v45 = vld [vmem:[%s4326_s17 + $0x18] sm:$0xff] }
 0x2d0   : > { %v3139_v12 = vmul.f32 %v5528_v9, %v2971_v55  ;;  %v2972_v2 = vmul.f32 %v2759_v34, %v2684_v52 }
 0x2d1   : > { %v2763_v8 = vmul.f32 0.5, %v2762_v32  ;;  %v2531_v36 = vpop.xlane.xlu2 %2530  ;;  %v2414_v47 = vpop.xlane.xlu0 %2413  ;;  %v3184_v32 = vld [vmem:[%s4316_s11 + $0xb0] sm:$0xff] }
 0x2d2   : > { %v3307_v42 = vadd.f32 %v5637_v39, %v3139_v12  ;;  %v3140_v56 = vmul.f32 %v5526_v50, %v2972_v2  ;;  %v2591_v28 = vmul.f32 0.015625, %v2531_v36  ;;  %v4212_v9 = vpop.eup %4211  ;;  %v2583_v50 = vsel %vm2393_vm5, %v2513_v15, 0.0 }
 0x2d3   : > { %v2764_v20 = vsub.f32 1.5, %v2763_v8  ;;  %v2771_v39 = vmul.f32 %v4212_v9, %v5865_v53  ;;  %v5897_v52 = vmul.f32 0.015625, %v2414_v47  ;;  %vm2777_vm11 = vweird.f32 %v4212_v9 }
 0x2d4   : > { %v3355_v18 = vadd.f32 %v3331_v59, %v3307_v42  ;;  %v3308_v57 = vadd.f32 %v5666_v31, %v3140_v56  ;;  %v2639_v6 = vsub.f32 %v2591_v28, %v2615_v63  ;;  %vm2778_vm13 = vmor %vm2776_vm12, %vm2777_vm11 }
 0x2d5   : > { %v2765_v11 = vmul.f32 %v4210_v38, %v2764_v20  ;;  %v2772_v55 = vmul.f32 %v4212_v9, %v2771_v39  ;;  %v3334_v39 = vld [vmem:[%s4326_s17 + $0x20] sm:$0xff] }
 0x2d6   : > { %3379 = vst.msk [vmem:[%s4331_s20 + $0x8] sm:$0xff] %vm2393_vm5, %v3355_v18  ;;  %v3356_v25 = vadd.f32 %v3332_v62, %v3308_v57  ;;  %v2663_v33 = vmax.f32 %v2639_v6, 0.0  ;;  %2584 = vadd.xlane.f32.xlu2 %v2583_v50 }
 0x2d7   : > { %v2769_v31 = vsel %vm2768_vm10, %v4210_v38, %v2765_v11  ;;  %v2773_v12 = vmul.f32 0.5, %v2772_v55  ;;  %v2616_v38 = vmul.f32 %v5897_v52, %v5897_v52 }
 0x2d8   : > { %3380 = vst.msk [vmem:[%s4331_s20 + $0x10] sm:$0xff] %vm2393_vm5, %v3356_v25  ;;  %v2973_v61 = vmul.f32 %v2769_v31, %v2685_v7  ;;  %v2711_v34 = vadd.f32 1e-05, %v2663_v33  ;;  %v3183_v7 = vld [vmem:[%s4316_s11 + $0xa8] sm:$0xff] }
 0x2d9   : > { %v2417_v2 = vpop.xlane.xlu1 %2416  ;;  %v2534_v59 = vpop.xlane.xlu0 %2533  ;;  %v2774_v0 = vsub.f32 1.5, %v2773_v12 }
 0x2da   : > { %v3141_v8 = vmul.f32 %v5534_v35, %v2973_v61  ;;  %4213 = vrsqrt.f32 %v2711_v34  ;;  %v2592_v36 = vmul.f32 0.015625, %v2534_v59  ;;  %v2686_v35 = vsub.f32 %v5608_v60, %v5842_v48 }
 0x2db   : > { %3298 = vperm.xlu0 %4200, %v3184_v32   ;;  %v2775_v15 = vmul.f32 %v4212_v9, %v2774_v0  ;;  %v5910_v63 = vmul.f32 0.015625, %v2417_v2  ;;  %vm2786_vm15 = vweird.f32 %v2711_v34 }
 0x2dc   : > { %v3309_v47 = vadd.f32 %v5668_v37, %v3141_v8  ;;  %v2640_v42 = vsub.f32 %v2592_v36, %v2616_v38 }
 0x2dd   : > { %v2779_v28 = vsel %vm2778_vm13, %v4212_v9, %v2775_v15  ;;  %v2617_v60 = vmul.f32 %v5910_v63, %v5910_v63 }
 0x2de   : > { %v3357_v56 = vadd.f32 %v3333_v45, %v3309_v47  ;;  %v2664_v62 = vmax.f32 %v2640_v42, 0.0  ;;  %v2974_v18 = vmul.f32 %v2779_v28, %v2686_v35  ;;  %v3185_v47 = vld [vmem:[%s4316_s11 + $0xb8] sm:$0xff] }
 0x2e0   : > { %v4214_v20 = vpop.eup %4213  ;;  %3381 = vst.msk [vmem:[%s4331_s20 + $0x18] sm:$0xff] %vm2393_vm5, %v3357_v56  ;;  %v2712_v57 = vadd.f32 1e-05, %v2664_v62  ;;  %v3142_v11 = vmul.f32 %v5539_v58, %v2974_v18  ;;  %v3335_v62 = vld [vmem:[%s4326_s17 + $0x28] sm:$0xff] }
 0x2e1   : > { %v2781_v37 = vmul.f32 %v4214_v20, %v2711_v34  ;;  %v2420_v6 = vpop.xlane.xlu2 %2419  ;;  %v2537_v53 = vpop.xlane.xlu1 %2536  ;;  %vm2787_vm14 = vweird.f32 %v4214_v20 }
 0x2e2   : > { %v2593_v48 = vmul.f32 0.015625, %v2537_v53  ;;  %4215 = vrsqrt.f32 %v2712_v57  ;;  %v3310_v9 = vadd.f32 %v5655_v41, %v3142_v11  ;;  %v5920_v32 = vmul.f32 0.015625, %v2420_v6  ;;  %vm2788_vm0 = vmor %vm2786_vm15, %vm2787_vm14 }
 0x2e3   : > { %v2782_v50 = vmul.f32 %v4214_v20, %v2781_v37  ;;  %v2687_v41 = vsub.f32 %v5623_v13, %v5878_v22  ;;  %vm2796_vm2 = vweird.f32 %v2712_v57 }
 0x2e4   : > { %v2641_v25 = vsub.f32 %v2593_v48, %v2617_v60  ;;  %v3358_v31 = vadd.f32 %v3334_v39, %v3310_v9  ;;  %v2618_v38 = vmul.f32 %v5920_v32, %v5920_v32 }
 0x2e5   : > { %v2783_v33 = vmul.f32 0.5, %v2782_v50  ;;  %v2688_v50 = vsub.f32 %v5633_v24, %v5897_v52 }
 0x2e6   : > { %v2665_v55 = vmax.f32 %v2641_v25, 0.0  ;;  %3382 = vst.msk [vmem:[%s4331_s20 + $0x20] sm:$0xff] %vm2393_vm5, %v3358_v31 }
 0x2e7   : > { %v2784_v61 = vsub.f32 1.5, %v2783_v33  ;;  %3293 = vperm.xlu1 %4201, %v3183_v7  }
 0x2e8   : > { %v2713_v58 = vadd.f32 1e-05, %v2665_v55  ;;  %v4216_v12 = vpop.eup %4215 }
 0x2e9   : > { %v2785_v2 = vmul.f32 %v4214_v20, %v2784_v61  ;;  %v2540_v59 = vpop.xlane.xlu2 %2539  ;;  %v2423_v8 = vpop.xlane.xlu0 %2422  ;;  %v2791_v45 = vmul.f32 %v4216_v12, %v2712_v57  ;;  %vm2797_vm1 = vweird.f32 %v4216_v12 }
 0x2ea   : > { %4217 = vrsqrt.f32 %v2713_v58  ;;  %v2594_v36 = vmul.f32 0.015625, %v2540_v59  ;;  %v5930_v28 = vmul.f32 0.015625, %v2423_v8  ;;  %vm2798_vm3 = vmor %vm2796_vm2, %vm2797_vm1  ;;  %vm2806_vm6 = vweird.f32 %v2713_v58 }
 0x2eb   : > { %v2789_v0 = vsel %vm2788_vm0, %v4214_v20, %v2785_v2  ;;  %v2792_v42 = vmul.f32 %v4216_v12, %v2791_v45  ;;  %v3336_v2 = vld [vmem:[%s4326_s17 + $0x30] sm:$0xff]  ;;  %v2689_v45 = vsub.f32 %v5646_v46, %v5910_v63  ;;  %v3337_v46 = vld [vmem:[%s4326_s17 + $0x38] sm:$0xff] }
 0x2ec   : > { %v2975_v15 = vmul.f32 %v2789_v0, %v2687_v41  ;;  %v2642_v56 = vsub.f32 %v2594_v36, %v2618_v38 }
 0x2ed   : > { %v2793_v35 = vmul.f32 0.5, %v2792_v42 }
 0x2ee   : > { %v3143_v34 = vmul.f32 %v5546_v1, %v2975_v15  ;;  %3303 = vperm.xlu2 %4202, %v3185_v47   ;;  %v2666_v13 = vmax.f32 %v2642_v56, 0.0  ;;  %v2619_v1 = vmul.f32 %v5930_v28, %v5930_v28 }
 0x2ef   : > { %v2794_v20 = vsub.f32 1.5, %v2793_v35 }
 0x2f0   : > { %v4218_v22 = vpop.eup %4217  ;;  %v3311_v18 = vadd.f32 %v5681_v3, %v3143_v34  ;;  %v2714_v6 = vadd.f32 1e-05, %v2666_v13 }
 0x2f1   : > { %v2801_v37 = vmul.f32 %v4218_v22, %v2713_v58  ;;  %v2426_v53 = vpop.xlane.xlu1 %2425  ;;  %v2543_v11 = vpop.xlane.xlu0 %2542  ;;  %v2795_v48 = vmul.f32 %v4216_v12, %v2794_v20  ;;  %vm2807_vm4 = vweird.f32 %v4218_v22 }
 0x2f2   : > { %v3359_v60 = vadd.f32 %v3335_v62, %v3311_v18  ;;  %v2595_v39 = vmul.f32 0.015625, %v2543_v11  ;;  %4219 = vrsqrt.f32 %v2714_v6  ;;  %v5941_v61 = vmul.f32 0.015625, %v2426_v53  ;;  %vm2808_vm7 = vmor %vm2806_vm6, %vm2807_vm4 }
 0x2f3   : > { %v2802_v3 = vmul.f32 %v4218_v22, %v2801_v37  ;;  %v2799_v57 = vsel %vm2798_vm3, %v4216_v12, %v2795_v48  ;;  %vm2816_vm9 = vweird.f32 %v2714_v6  ;;  %v2690_v48 = vsub.f32 %v5661_v14, %v5920_v32 }
 0x2f4   : > { %3383 = vst.msk [vmem:[%s4331_s20 + $0x28] sm:$0xff] %vm2393_vm5, %v3359_v60  ;;  %v2643_v9 = vsub.f32 %v2595_v39, %v2619_v1  ;;  %v2976_v25 = vmul.f32 %v2799_v57, %v2688_v50  ;;  %v2620_v36 = vmul.f32 %v5941_v61, %v5941_v61 }
 0x2f5   : > { %v2803_v7 = vmul.f32 0.5, %v2802_v3 }
 0x2f6   : > { %v2667_v33 = vmax.f32 %v2643_v9, 0.0  ;;  %v3144_v31 = vmul.f32 %v5550_v5, %v2976_v25  ;;  %v3338_v25 = vld [vmem:[%s4326_s17 + $0x40] sm:$0xff] }
 0x2f7   : > { %v2804_v55 = vsub.f32 1.5, %v2803_v7 }
 0x2f8   : > { %v2715_v59 = vadd.f32 1e-05, %v2667_v33  ;;  %v4220_v8 = vpop.eup %4219  ;;  %v3312_v24 = vadd.f32 %v5687_v23, %v3144_v31 }
 0x2f9   : > { %v2805_v52 = vmul.f32 %v4218_v22, %v2804_v55  ;;  %v2429_v41 = vpop.xlane.xlu2 %2428  ;;  %v2546_v12 = vpop.xlane.xlu1 %2545  ;;  %v2811_v5 = vmul.f32 %v4220_v8, %v2714_v6  ;;  %vm2817_vm8 = vweird.f32 %v4220_v8 }
 0x2fa   : > { %4221 = vrsqrt.f32 %v2715_v59  ;;  %v3360_v0 = vadd.f32 %v3336_v2, %v3312_v24  ;;  %v2596_v47 = vmul.f32 0.015625, %v2546_v12  ;;  %v5952_v34 = vmul.f32 0.015625, %v2429_v41  ;;  %vm2818_vm10 = vmor %vm2816_vm9, %vm2817_vm8 }
 0x2fb   : > { %v2809_v38 = vsel %vm2808_vm7, %v4218_v22, %v2805_v52  ;;  %v2812_v42 = vmul.f32 %v4220_v8, %v2811_v5  ;;  %vm2826_vm12 = vweird.f32 %v2715_v59  ;;  %v2691_v2 = vsub.f32 %v5676_v16, %v5930_v28 }
 0x2fc   : > { %v2977_v15 = vmul.f32 %v2809_v38, %v2689_v45  ;;  %3384 = vst.msk [vmem:[%s4331_s20 + $0x30] sm:$0xff] %vm2393_vm5, %v3360_v0  ;;  %v2644_v23 = vsub.f32 %v2596_v47, %v2620_v36  ;;  %v3339_v45 = vld [vmem:[%s4326_s17 + $0x48] sm:$0xff] }
 0x2fd   : > { %v2813_v56 = vmul.f32 0.5, %v2812_v42 }
 0x2fe   : > { %v3145_v58 = vmul.f32 %v5544_v54, %v2977_v15  ;;  %v2668_v63 = vmax.f32 %v2644_v23, 0.0  ;;  %v2621_v54 = vmul.f32 %v5952_v34, %v5952_v34 }
 0x2ff   : > { %v2814_v13 = vsub.f32 1.5, %v2813_v56 }
 0x300   : > { %v4222_v35 = vpop.eup %4221  ;;  %v3313_v62 = vadd.f32 %v5670_v4, %v3145_v58  ;;  %v2716_v18 = vadd.f32 1e-05, %v2668_v63 }
 0x301   : > { %v2821_v22 = vmul.f32 %v4222_v35, %v2715_v59  ;;  %v2549_v20 = vpop.xlane.xlu2 %2548  ;;  %v2432_v37 = vpop.xlane.xlu0 %2431  ;;  %v2815_v11 = vmul.f32 %v4220_v8, %v2814_v13  ;;  %vm2827_vm11 = vweird.f32 %v4222_v35 }
 0x302   : > { %v3361_v53 = vadd.f32 %v3337_v46, %v3313_v62  ;;  %v2597_v60 = vmul.f32 0.015625, %v2549_v20  ;;  %4223 = vrsqrt.f32 %v2716_v18  ;;  %vm2828_vm13 = vmor %vm2826_vm12, %vm2827_vm11  ;;  %v5971_v5 = vmul.f32 0.015625, %v2432_v37 }
 0x303   : > { %v2822_v4 = vmul.f32 %v4222_v35, %v2821_v22  ;;  %v2819_v6 = vsel %vm2818_vm10, %v4220_v8, %v2815_v11  ;;  %vm2836_vm15 = vweird.f32 %v2716_v18 }
 0x304   : > { %3385 = vst.msk [vmem:[%s4331_s20 + $0x38] sm:$0xff] %vm2393_vm5, %v3361_v53  ;;  %v2645_v1 = vsub.f32 %v2597_v60, %v2621_v54  ;;  %v2978_v39 = vmul.f32 %v2819_v6, %v2690_v48  ;;  %v2622_v58 = vmul.f32 %v5971_v5, %v5971_v5  ;;  %v6328_v60 = vld [vmem:[#allocation16_spill] sm:$0xff] }
 0x305   : > { %v2823_v50 = vmul.f32 0.5, %v2822_v4  ;;  %v2693_v48 = vsub.f32 %v6328_v60, %v5952_v34 }
 0x306   : > { %v2669_v3 = vmax.f32 %v2645_v1, 0.0  ;;  %v3146_v57 = vmul.f32 %v5562_v17, %v2978_v39 }
 0x307   : > { %v2824_v9 = vsub.f32 1.5, %v2823_v50 }
 0x308   : > { %v2717_v7 = vadd.f32 1e-05, %v2669_v3  ;;  %v4224_v33 = vpop.eup %4223  ;;  %v3314_v14 = vadd.f32 %v5700_v43, %v3146_v57 }
 0x309   : > { %v2825_v32 = vmul.f32 %v4222_v35, %v2824_v9  ;;  %v2435_v31 = vpop.xlane.xlu1 %2434  ;;  %v2450_v55 = vpop.xlane.xlu0 %2449  ;;  %v2831_v8 = vmul.f32 %v4224_v33, %v2716_v18  ;;  %vm2837_vm14 = vweird.f32 %v4224_v33  ;;  %v6329_v9 = vld [vmem:[#allocation4_spill] sm:$0xff] }
 0x30a   : > { %4225 = vrsqrt.f32 %v2717_v7  ;;  %v3362_v17 = vadd.f32 %v3338_v25, %v3314_v14  ;;  %vm2838_vm0 = vmor %vm2836_vm15, %vm2837_vm14  ;;  %v5980_v62 = vmul.f32 0.015625, %v2435_v31  ;;  %vm2846_vm2 = vweird.f32 %v2717_v7  ;;  %v6330_v31 = vld [vmem:[#allocation19_spill] sm:$0xff] }
 0x30b   : > { %v2829_v24 = vsel %vm2828_vm13, %v4222_v35, %v2825_v32  ;;  %v2832_v41 = vmul.f32 %v4224_v33, %v2831_v8  ;;  %v5985_v37 = vmul.f32 0.015625, %v2450_v55 }
 0x30c   : > { %v2979_v52 = vmul.f32 %v2829_v24, %v2691_v2  ;;  %3386 = vst.msk [vmem:[%s4331_s20 + $0x40] sm:$0xff] %vm2393_vm5, %v3362_v17 }
 0x30d   : > { %v2833_v43 = vmul.f32 0.5, %v2832_v41  ;;  %v2628_v3 = vmul.f32 %v5985_v37, %v5985_v37 }
 0x30e   : > { %v3147_v12 = vmul.f32 %v5566_v26, %v2979_v52  ;;  %v2692_v26 = vsub.f32 %v5691_v44, %v5941_v61  ;;  %v3340_v44 = vld [vmem:[%s4326_s17 + $0x50] sm:$0xff] }
 0x30f   : > { %v2834_v16 = vsub.f32 1.5, %v2833_v43 }
 0x310   : > { %v4226_v59 = vpop.eup %4225  ;;  %v3315_v0 = vadd.f32 %v5704_v40, %v3147_v12 }
 0x311   : > { %v2841_v28 = vmul.f32 %v4226_v59, %v2717_v7  ;;  %v2438_v38 = vpop.xlane.xlu2 %2437  ;;  %v2453_v36 = vpop.xlane.xlu1 %2452  ;;  %v2835_v15 = vmul.f32 %v4224_v33, %v2834_v16  ;;  %vm2847_vm1 = vweird.f32 %v4226_v59 }
 0x312   : > { %v3363_v47 = vadd.f32 %v3339_v45, %v3315_v0  ;;  %v2552_v42 = vpop.xlane.xlu0 %2551  ;;  %vm2848_vm3 = vmor %vm2846_vm2, %vm2847_vm1  ;;  %v5996_v25 = vmul.f32 0.015625, %v2438_v38  ;;  %v5999_v14 = vmul.f32 0.015625, %v2453_v36 }
 0x313   : > { %v2842_v23 = vmul.f32 %v4226_v59, %v2841_v28  ;;  %v2598_v56 = vmul.f32 0.015625, %v2552_v42  ;;  %v2839_v40 = vsel %vm2838_vm0, %v4224_v33, %v2835_v15  ;;  %v3341_v33 = vld [vmem:[%s4326_s17 + $0x58] sm:$0xff] }
 0x314   : > { %3387 = vst.msk [vmem:[%s4331_s20 + $0x48] sm:$0xff] %vm2393_vm5, %v3363_v47  ;;  %v2980_v46 = vmul.f32 %v2839_v40, %v2692_v26  ;;  %v2624_v12 = vmul.f32 %v5996_v25, %v5996_v25 }
 0x315   : > { %v2843_v63 = vmul.f32 0.5, %v2842_v23  ;;  %v2646_v35 = vsub.f32 %v2598_v56, %v2622_v58 }
 0x316   : > { %v3148_v13 = vmul.f32 %v5552_v10, %v2980_v46  ;;  %v2623_v10 = vmul.f32 %v5980_v62, %v5980_v62 }
 0x317   : > { %v2844_v22 = vsub.f32 1.5, %v2843_v63  ;;  %v2670_v18 = vmax.f32 %v2646_v35, 0.0 }
 0x318   : > { %v3316_v61 = vadd.f32 %v5689_v30, %v3148_v13 }
 0x319   : > { %v2845_v20 = vmul.f32 %v4226_v59, %v2844_v22  ;;  %v2718_v53 = vadd.f32 1e-05, %v2670_v18  ;;  %v2456_v11 = vpop.xlane.xlu2 %2455  ;;  %v2555_v54 = vpop.xlane.xlu1 %2554 }
 0x31a   : > { %v2599_v4 = vmul.f32 0.015625, %v2555_v54  ;;  %v2570_v6 = vpop.xlane.xlu0 %2569  ;;  %v3364_v1 = vadd.f32 %v3340_v44, %v3316_v61  ;;  %v6014_v42 = vmul.f32 0.015625, %v2456_v11 }
 0x31b   : > { %v2849_v39 = vsel %vm2848_vm3, %v4226_v59, %v2845_v20  ;;  %4227 = vrsqrt.f32 %v2718_v53  ;;  %v2604_v57 = vmul.f32 0.015625, %v2570_v6  ;;  %v2629_v59 = vmul.f32 %v5999_v14, %v5999_v14  ;;  %v6331_v20 = vld [vmem:[#allocation18_spill] sm:$0xff] }
 0x31c   : > { %v2981_v30 = vmul.f32 %v2849_v39, %v2693_v48  ;;  %v2647_v50 = vsub.f32 %v2599_v4, %v2623_v10  ;;  %3388 = vst.msk [vmem:[%s4331_s20 + $0x50] sm:$0xff] %vm2393_vm5, %v3364_v1  ;;  %vm2856_vm6 = vweird.f32 %v2718_v53  ;;  %v2694_v11 = vsub.f32 %v6331_v20, %v5971_v5  ;;  %v6332_v39 = vld [vmem:[#allocation5_spill] sm:$0xff] }
 0x31d   : > { %v2652_v32 = vsub.f32 %v2604_v57, %v2628_v3  ;;  %v2630_v54 = vmul.f32 %v6014_v42, %v6014_v42  ;;  %v6333_v3 = vld [vmem:[#allocation23_spill] sm:$0xff] }
 0x31e   : > { %v3149_v34 = vmul.f32 %v6329_v9, %v2981_v30  ;;  %v2671_v7 = vmax.f32 %v2647_v50, 0.0  ;;  %v2695_v57 = vsub.f32 %v6333_v3, %v5980_v62  ;;  %v3342_v9 = vld [vmem:[%s4326_s17 + $0x60] sm:$0xff]  ;;  %v6335_v62 = vld [vmem:[#allocation22_spill] sm:$0xff] }
 0x31f   : > { %v2676_v17 = vmax.f32 %v2652_v32, 0.0 }
 0x320   : > { %v3317_v55 = vadd.f32 %v6330_v31, %v3149_v34  ;;  %v6002_v2 = vadd.f32 1e-05, %v2671_v7 }
 0x321   : > { %v4228_v8 = vpop.eup %4227  ;;  %v2558_v24 = vpop.xlane.xlu2 %2557  ;;  %v6009_v0 = vadd.f32 1e-05, %v2676_v17 }
 0x322   : > { %v2573_v52 = vpop.xlane.xlu1 %2572  ;;  %v3365_v41 = vadd.f32 %v3341_v33, %v3317_v55  ;;  %v2851_v43 = vmul.f32 %v4228_v8, %v2718_v53  ;;  %4229 = vrsqrt.f32 %v6002_v2  ;;  %v2441_v45 = vpop.xlane.xlu0 %2440  ;;  %v2600_v16 = vmul.f32 0.015625, %v2558_v24  ;;  %v6334_v33 = vld [vmem:[#allocation20_spill] sm:$0xff] }
 0x323   : > { %v2605_v28 = vmul.f32 0.015625, %v2573_v52  ;;  %4231 = vrsqrt.f32 %v6009_v0  ;;  %vm2857_vm4 = vweird.f32 %v4228_v8  ;;  %vm2866_vm9 = vweird.f32 %v6002_v2 }
 0x324   : > { %3389 = vst.msk [vmem:[%s4331_s20 + $0x58] sm:$0xff] %vm2393_vm5, %v3365_v41  ;;  %v2852_v38 = vmul.f32 %v4228_v8, %v2851_v43  ;;  %v2648_v36 = vsub.f32 %v2600_v16, %v2624_v12  ;;  %vm2858_vm7 = vmor %vm2856_vm6, %vm2857_vm4  ;;  %v6036_v55 = vmul.f32 0.015625, %v2441_v45  ;;  %v2700_v41 = vsub.f32 %v6335_v62, %v5985_v37 }
 0x325   : > { %v2653_v47 = vsub.f32 %v2605_v28, %v2629_v59  ;;  %vm2916_vm12 = vweird.f32 %v6009_v0 }
 0x326   : > { %v2853_v15 = vmul.f32 0.5, %v2852_v38  ;;  %v2672_v26 = vmax.f32 %v2648_v36, 0.0  ;;  %v6336_v36 = vld [vmem:[#allocation28_spill] sm:$0xff] }
 0x327   : > { %v2677_v23 = vmax.f32 %v2653_v47, 0.0  ;;  %v2696_v47 = vsub.f32 %v6336_v36, %v5996_v25 }
 0x328   : > { %v4230_v58 = vpop.eup %4229  ;;  %v2854_v56 = vsub.f32 1.5, %v2853_v15  ;;  %v6017_v46 = vadd.f32 1e-05, %v2672_v26  ;;  %v6337_v15 = vld [vmem:[#allocation27_spill] sm:$0xff] }
 0x329   : > { %v2861_v40 = vmul.f32 %v4230_v58, %v6002_v2  ;;  %v6019_v63 = vadd.f32 1e-05, %v2677_v23  ;;  %v2576_v35 = vpop.xlane.xlu2 %2575  ;;  %v4232_v61 = vpop.eup %4231  ;;  %vm2867_vm8 = vweird.f32 %v4230_v58  ;;  %v2701_v26 = vsub.f32 %v6337_v15, %v5999_v14 }
 0x32a   : > { %v2444_v13 = vpop.xlane.xlu1 %2443  ;;  %v2855_v22 = vmul.f32 %v4228_v8, %v2854_v56  ;;  %v2606_v18 = vmul.f32 0.015625, %v2576_v35  ;;  %v2459_v44 = vpop.xlane.xlu0 %2458  ;;  %4233 = vrsqrt.f32 %v6017_v46  ;;  %v2911_v10 = vmul.f32 %v4232_v61, %v6009_v0  ;;  %vm2868_vm10 = vmor %vm2866_vm9, %vm2867_vm8 }
 0x32b   : > { %v2862_v60 = vmul.f32 %v4230_v58, %v2861_v40  ;;  %4235 = vrsqrt.f32 %v6019_v63  ;;  %vm2917_vm11 = vweird.f32 %v4232_v61  ;;  %v2625_v23 = vmul.f32 %v6036_v55, %v6036_v55 }
 0x32c   : > { %v2859_v48 = vsel %vm2858_vm7, %v4228_v8, %v2855_v22  ;;  %v2654_v6 = vsub.f32 %v2606_v18, %v2630_v54  ;;  %v2912_v1 = vmul.f32 %v4232_v61, %v2911_v10  ;;  %vm2918_vm13 = vmor %vm2916_vm12, %vm2917_vm11  ;;  %v6064_v22 = vmul.f32 0.015625, %v2444_v13  ;;  %v3343_v18 = vld [vmem:[%s4326_s17 + $0x68] sm:$0xff]  ;;  %v6340_v10 = vld [vmem:[#allocation11_spill] sm:$0xff] }
 0x32d   : > { %v2982_v53 = vmul.f32 %v2859_v48, %v2694_v11  ;;  %v2863_v4 = vmul.f32 0.5, %v2862_v60  ;;  %vm2876_vm14 = vweird.f32 %v6017_v46  ;;  %v6339_v11 = vld [vmem:[#allocation17_spill] sm:$0xff]  ;;  %v6070_v48 = vmul.f32 0.015625, %v2459_v44 }
 0x32e   : > { %v2678_v50 = vmax.f32 %v2654_v6, 0.0  ;;  %v2913_v34 = vmul.f32 0.5, %v2912_v1  ;;  %vm2926_vm1 = vweird.f32 %v6019_v63 }
 0x32f   : > { %v3150_v30 = vmul.f32 %v6332_v39, %v2982_v53  ;;  %v2864_v5 = vsub.f32 1.5, %v2863_v4 }
 0x330   : > { %v6033_v7 = vpop.eup %4233  ;;  %v6038_v8 = vadd.f32 1e-05, %v2678_v50  ;;  %v2914_v2 = vsub.f32 1.5, %v2913_v34  ;;  %v6341_v50 = vld [vmem:[#allocation31_spill] sm:$0xff]  ;;  %v2626_v34 = vmul.f32 %v6064_v22, %v6064_v22 }
 0x331   : > { %v3318_v32 = vadd.f32 %v6334_v33, %v3150_v30  ;;  %v2865_v31 = vmul.f32 %v4230_v58, %v2864_v5  ;;  %v2447_v17 = vpop.xlane.xlu2 %2446  ;;  %v6042_v52 = vpop.eup %4235  ;;  %v2871_v12 = vmul.f32 %v6033_v7, %v6017_v46  ;;  %vm2877_vm15 = vweird.f32 %v6033_v7  ;;  %v3348_v30 = vld [vmem:[%s4326_s17 + $0x90] sm:$0xff] }
 0x332   : > { %v6040_v24 = vpop.xlane.xlu1 %2461  ;;  %v2561_v43 = vpop.xlane.xlu0 %2560  ;;  %v2921_v16 = vmul.f32 %v6042_v52, %v6019_v63  ;;  %v2915_v38 = vmul.f32 %v4232_v61, %v2914_v2  ;;  %4237 = vrsqrt.f32 %v6038_v8  ;;  %vm2927_vm0 = vweird.f32 %v6042_v52  ;;  %vm2878_vm2 = vmor %vm2876_vm14, %vm2877_vm15 }
 0x333   : > { %v3366_v45 = vadd.f32 %v3342_v9, %v3318_v32  ;;  %v2869_v59 = vsel %vm2868_vm10, %v4230_v58, %v2865_v31  ;;  %v2872_v37 = vmul.f32 %v6033_v7, %v2871_v12  ;;  %v6338_v58 = vld [vmem:[#allocation3_spill] sm:$0xff]  ;;  %v2601_v14 = vmul.f32 0.015625, %v2561_v43  ;;  %vm2928_vm3 = vmor %vm2926_vm1, %vm2927_vm0 }
 0x334   : > { %v2983_v28 = vmul.f32 %v2869_v59, %v2695_v57  ;;  %v2922_v0 = vmul.f32 %v6042_v52, %v2921_v16  ;;  %v2919_v40 = vsel %vm2918_vm13, %v4232_v61, %v2915_v38  ;;  %v2631_v46 = vmul.f32 %v6070_v48, %v6070_v48  ;;  %v6342_v16 = vld [vmem:[#allocation7_spill] sm:$0xff] }
 0x335   : > { %3390 = vst.msk [vmem:[%s4331_s20 + $0x60] sm:$0xff] %vm2393_vm5, %v3366_v45  ;;  %v2873_v35 = vmul.f32 0.5, %v2872_v37  ;;  %v2988_v20 = vmul.f32 %v2919_v40, %v2700_v41  ;;  %v2649_v13 = vsub.f32 %v2601_v14, %v2625_v23  ;;  %v6098_v32 = vmul.f32 0.015625, %v2447_v17  ;;  %v3344_v37 = vld [vmem:[%s4326_s17 + $0x70] sm:$0xff]  ;;  %v3349_v23 = vld [vmem:[%s4326_s17 + $0x98] sm:$0xff] }
 0x336   : > { %v3151_v56 = vmul.f32 %v6338_v58, %v2983_v28  ;;  %v2923_v25 = vmul.f32 0.5, %v2922_v0  ;;  %vm2936_vm4 = vweird.f32 %v6038_v8  ;;  %v6109_v17 = vmul.f32 0.015625, %v6040_v24 }
 0x337   : > { %v2874_v60 = vsub.f32 1.5, %v2873_v35  ;;  %v3156_v53 = vmul.f32 %v6340_v10, %v2988_v20  ;;  %v2673_v31 = vmax.f32 %v2649_v13, 0.0  ;;  %v6345_v35 = vld [vmem:[#allocation26_spill] sm:$0xff] }
 0x338   : > { %v3319_v54 = vadd.f32 %v6339_v11, %v3151_v56  ;;  %v2924_v61 = vsub.f32 1.5, %v2923_v25  ;;  %v6076_v1 = vpop.eup %4237 }
 0x339   : > { %v6074_v4 = vpop.xlane.xlu2 %2464  ;;  %v2875_v5 = vmul.f32 %v6033_v7, %v2874_v60  ;;  %v3324_v3 = vadd.f32 %v6341_v50, %v3156_v53  ;;  %v2931_v9 = vmul.f32 %v6076_v1, %v6038_v8  ;;  %v6102_v45 = vadd.f32 1e-05, %v2673_v31  ;;  %v6346_v53 = vld [vmem:[#allocation30_spill] sm:$0xff] }
 0x33a   : > { %v2564_v6 = vpop.xlane.xlu1 %2563  ;;  %v3367_v39 = vadd.f32 %v3343_v18, %v3319_v54  ;;  %v2925_v57 = vmul.f32 %v6042_v52, %v2924_v61  ;;  %v2579_v33 = vpop.xlane.xlu0 %2578  ;;  %vm2937_vm6 = vweird.f32 %v6076_v1  ;;  %v2632_v60 = vmul.f32 %v6109_v17, %v6109_v17 }
 0x33b   : > { %v2602_v44 = vmul.f32 0.015625, %v2564_v6  ;;  %v2879_v63 = vsel %vm2878_vm2, %v6033_v7, %v2875_v5  ;;  %v3372_v62 = vadd.f32 %v3348_v30, %v3324_v3  ;;  %v2932_v12 = vmul.f32 %v6076_v1, %v2931_v9  ;;  %vm2938_vm7 = vmor %vm2936_vm4, %vm2937_vm6 }
 0x33c   : > { %3391 = vst.msk [vmem:[%s4331_s20 + $0x68] sm:$0xff] %vm2393_vm5, %v3367_v39  ;;  %v2984_v41 = vmul.f32 %v2879_v63, %v2696_v47  ;;  %v2929_v2 = vsel %vm2928_vm3, %v6042_v52, %v2925_v57  ;;  %v2607_v59 = vmul.f32 0.015625, %v2579_v33  ;;  %v6343_v52 = vld [vmem:[#allocation9_spill] sm:$0xff]  ;;  %v2627_v47 = vmul.f32 %v6098_v32, %v6098_v32  ;;  %v3350_v33 = vld [vmem:[%s4326_s17 + $0xa0] sm:$0xff] }
 0x33d   : > { %v2989_v43 = vmul.f32 %v2929_v2, %v2701_v26  ;;  %v2650_v7 = vsub.f32 %v2602_v44, %v2626_v34  ;;  %3396 = vst.msk [vmem:[%s4331_s20 + $0x90] sm:$0xff] %vm2393_vm5, %v3372_v62  ;;  %v2933_v38 = vmul.f32 0.5, %v2932_v12  ;;  %4239 = vrsqrt.f32 %v6102_v45  ;;  %v6344_v26 = vld [vmem:[#allocation24_spill] sm:$0xff]  ;;  %v6347_v57 = vld [vmem:[#allocation13_spill] sm:$0xff] }
 0x33e   : > { %v3152_v28 = vmul.f32 %v6342_v16, %v2984_v41  ;;  %v2655_v56 = vsub.f32 %v2607_v59, %v2631_v46  ;;  %v2702_v61 = vsub.f32 %v6346_v53, %v6014_v42  ;;  %v6139_v8 = vmul.f32 0.015625, %v6074_v4  ;;  %v6348_v62 = vld [vmem:[#allocation32_spill] sm:$0xff] }
 0x33f   : > { %v3157_v36 = vmul.f32 %v6343_v52, %v2989_v43  ;;  %v2674_v15 = vmax.f32 %v2650_v7, 0.0  ;;  %v2934_v58 = vsub.f32 1.5, %v2933_v38  ;;  %vm2886_vm9 = vweird.f32 %v6102_v45 }
 0x340   : > { %v3320_v0 = vadd.f32 %v6344_v26, %v3152_v28  ;;  %v2679_v10 = vmax.f32 %v2655_v56, 0.0  ;;  %v2633_v12 = vmul.f32 %v6139_v8, %v6139_v8 }
 0x341   : > { %v2567_v40 = vpop.xlane.xlu2 %2566  ;;  %v3325_v18 = vadd.f32 %v6345_v35, %v3157_v36  ;;  %v6120_v20 = vadd.f32 1e-05, %v2674_v15  ;;  %v2935_v54 = vmul.f32 %v6076_v1, %v2934_v58  ;;  %v2698_v35 = vsub.f32 %v5785_v51, %v6064_v22 }
 0x342   : > { %v2582_v24 = vpop.xlane.xlu1 %2581  ;;  %v2603_v25 = vmul.f32 0.015625, %v2567_v40  ;;  %v3368_v11 = vadd.f32 %v3344_v37, %v3320_v0  ;;  %v6133_v30 = vadd.f32 1e-05, %v2679_v10  ;;  %v2697_v0 = vsub.f32 %v5777_v27, %v6036_v55  ;;  %v3345_v10 = vld [vmem:[%s4326_s17 + $0x78] sm:$0xff] }
 0x343   : > { %v2608_v14 = vmul.f32 0.015625, %v2582_v24  ;;  %v3373_v13 = vadd.f32 %v3349_v23, %v3325_v18  ;;  %4241 = vrsqrt.f32 %v6120_v20  ;;  %v2939_v39 = vsel %vm2938_vm7, %v6076_v1, %v2935_v54  ;;  %v4240_v44 = vpop.eup %4239 }
 0x344   : > { %v2651_v6 = vsub.f32 %v2603_v25, %v2627_v47  ;;  %3392 = vst.msk [vmem:[%s4331_s20 + $0x70] sm:$0xff] %vm2393_vm5, %v3368_v11  ;;  %v2990_v50 = vmul.f32 %v2939_v39, %v2702_v61  ;;  %v2881_v3 = vmul.f32 %v4240_v44, %v6102_v45  ;;  %4243 = vrsqrt.f32 %v6133_v30  ;;  %v6349_v11 = vld [vmem:[#allocation8_spill] sm:$0xff]  ;;  %v6350_v61 = vld [vmem:[#allocation25_spill] sm:$0xff] }
 0x345   : > { %v2656_v5 = vsub.f32 %v2608_v14, %v2632_v60  ;;  %3397 = vst.msk [vmem:[%s4331_s20 + $0x98] sm:$0xff] %vm2393_vm5, %v3373_v13  ;;  %vm2887_vm8 = vweird.f32 %v4240_v44  ;;  %vm2896_vm12 = vweird.f32 %v6120_v20  ;;  %vm2946_vm15 = vweird.f32 %v6133_v30 }
 0x346   : > { %v2675_v42 = vmax.f32 %v2651_v6, 0.0  ;;  %v3158_v9 = vmul.f32 %v6347_v57, %v2990_v50  ;;  %v2882_v63 = vmul.f32 %v4240_v44, %v2881_v3  ;;  %vm2888_vm10 = vmor %vm2886_vm9, %vm2887_vm8  ;;  %v2703_v39 = vsub.f32 %v5793_v19, %v6070_v48  ;;  %v6352_v48 = vld [vmem:[#allocation21_spill] sm:$0xff] }
 0x347   : > { %v2680_v1 = vmax.f32 %v2656_v5, 0.0  ;;  %v2699_v19 = vsub.f32 %v5814_v21, %v6098_v32 }
 0x348   : > { %v6143_v34 = vadd.f32 1e-05, %v2675_v42  ;;  %v3326_v41 = vadd.f32 %v6348_v62, %v3158_v9  ;;  %v2883_v4 = vmul.f32 0.5, %v2882_v63  ;;  %v6351_v42 = vld [vmem:[#allocation6_spill] sm:$0xff]  ;;  %v3346_v9 = vld [vmem:[%s4326_s17 + $0x80] sm:$0xff] }
 0x349   : > { %v2585_v46 = vpop.xlane.xlu2 %2584  ;;  %v4242_v31 = vpop.eup %4241  ;;  %v6148_v2 = vadd.f32 1e-05, %v2680_v1 }
 0x34a   : > { %4245 = vrsqrt.f32 %v6143_v34  ;;  %v2891_v43 = vmul.f32 %v4242_v31, %v6120_v20  ;;  %v2609_v7 = vmul.f32 0.015625, %v2585_v46  ;;  %v3374_v59 = vadd.f32 %v3350_v33, %v3326_v41  ;;  %v4244_v16 = vpop.eup %4243 }
 0x34b   : > { %4247 = vrsqrt.f32 %v6148_v2  ;;  %v2884_v28 = vsub.f32 1.5, %v2883_v4  ;;  %v2941_v52 = vmul.f32 %v4244_v16, %v6133_v30  ;;  %vm2897_vm11 = vweird.f32 %v4242_v31 }
 0x34c   : > { %v2892_v38 = vmul.f32 %v4242_v31, %v2891_v43  ;;  %v2657_v37 = vsub.f32 %v2609_v7, %v2633_v12  ;;  %3398 = vst.msk [vmem:[%s4331_s20 + $0xa0] sm:$0xff] %vm2393_vm5, %v3374_v59  ;;  %vm2898_vm13 = vmor %vm2896_vm12, %vm2897_vm11  ;;  %vm2947_vm14 = vweird.f32 %v4244_v16  ;;  %vm2906_vm2 = vweird.f32 %v6143_v34  ;;  %v6353_v12 = vld [vmem:[#allocation14_spill] sm:$0xff] }
 0x34d   : > { %v2885_v36 = vmul.f32 %v4240_v44, %v2884_v28  ;;  %v2942_v23 = vmul.f32 %v4244_v16, %v2941_v52  ;;  %vm2948_vm1 = vmor %vm2946_vm15, %vm2947_vm14  ;;  %vm2956_vm6 = vweird.f32 %v6148_v2  ;;  %v2704_v4 = vsub.f32 %v5812_v49, %v6109_v17  ;;  %v3347_v52 = vld [vmem:[%s4326_s17 + $0x88] sm:$0xff]  ;;  %v6355_v17 = vld [vmem:[#allocation29_spill] sm:$0xff] }
 0x34e   : > { %v2893_v47 = vmul.f32 0.5, %v2892_v38  ;;  %v2681_v15 = vmax.f32 %v2657_v37, 0.0 }
 0x34f   : > { %v2889_v58 = vsel %vm2888_vm10, %v4240_v44, %v2885_v36  ;;  %v2943_v45 = vmul.f32 0.5, %v2942_v23  ;;  %v3352_v23 = vld [vmem:[%s4326_s17 + $0xb0] sm:$0xff] }
 0x350   : > { %v4246_v26 = vpop.eup %4245  ;;  %v2894_v56 = vsub.f32 1.5, %v2893_v47  ;;  %v2985_v18 = vmul.f32 %v2889_v58, %v2697_v0  ;;  %v6163_v25 = vadd.f32 1e-05, %v2681_v15  ;;  %v6356_v47 = vld [vmem:[#allocation12_spill] sm:$0xff]  ;;  %v3299_v58 = vpop.permute.xlu0 %3298 }
 0x351   : > { %v2901_v40 = vmul.f32 %v4246_v26, %v6143_v34  ;;  %v4248_v24 = vpop.eup %4247  ;;  %v2944_v60 = vsub.f32 1.5, %v2943_v45  ;;  %vm2907_vm0 = vweird.f32 %v4246_v26 }
 0x352   : > { %v2895_v14 = vmul.f32 %v4242_v31, %v2894_v56  ;;  %v2951_v55 = vmul.f32 %v4248_v24, %v6148_v2  ;;  %v3153_v54 = vmul.f32 %v6349_v11, %v2985_v18  ;;  %4249 = vrsqrt.f32 %v6163_v25  ;;  %vm2908_vm4 = vmor %vm2906_vm2, %vm2907_vm0  ;;  %v6354_v2 = vld [vmem:[#allocation10_spill] sm:$0xff] }
 0x353   : > { %v2902_v27 = vmul.f32 %v4246_v26, %v2901_v40  ;;  %v2945_v20 = vmul.f32 %v4244_v16, %v2944_v60  ;;  %vm2957_vm3 = vweird.f32 %v4248_v24  ;;  %vm2966_vm9 = vweird.f32 %v6163_v25  ;;  %v3353_v11 = vld [vmem:[%s4326_s17 + $0xb8] sm:$0xff] }
 0x354   : > { %v2899_v53 = vsel %vm2898_vm13, %v4242_v31, %v2895_v14  ;;  %v2952_v22 = vmul.f32 %v4248_v24, %v2951_v55  ;;  %v3321_v13 = vadd.f32 %v6350_v61, %v3153_v54  ;;  %vm2958_vm7 = vmor %vm2956_vm6, %vm2957_vm3  ;;  %v3304_v54 = vpop.permute.xlu2 %3303 }
 0x355   : > { %v2903_v51 = vmul.f32 0.5, %v2902_v27  ;;  %v2986_v6 = vmul.f32 %v2899_v53, %v2698_v35  ;;  %v2949_v57 = vsel %vm2948_vm1, %v4244_v16, %v2945_v20  ;;  %v3351_v16 = vld [vmem:[%s4326_s17 + $0xa8] sm:$0xff]  ;;  %v2705_v35 = vsub.f32 %v5838_v29, %v6139_v8  ;;  %v6357_v27 = vld [vmem:[#allocation15_spill] sm:$0xff] }
 0x356   : > { %v2953_v44 = vmul.f32 0.5, %v2952_v22  ;;  %v3369_v50 = vadd.f32 %v3345_v10, %v3321_v13  ;;  %v2991_v30 = vmul.f32 %v2949_v57, %v2703_v39 }
 0x357   : > { %v2904_v5 = vsub.f32 1.5, %v2903_v51  ;;  %v3154_v3 = vmul.f32 %v6351_v42, %v2986_v6 }
 0x358   : > { %v2954_v33 = vsub.f32 1.5, %v2953_v44  ;;  %v4250_v63 = vpop.eup %4249  ;;  %3393 = vst.msk [vmem:[%s4331_s20 + $0x78] sm:$0xff] %vm2393_vm5, %v3369_v50  ;;  %v3159_v43 = vmul.f32 %v6353_v12, %v2991_v30 }
 0x359   : > { %v2905_v1 = vmul.f32 %v4246_v26, %v2904_v5  ;;  %v3322_v46 = vadd.f32 %v6352_v48, %v3154_v3  ;;  %v2961_v34 = vmul.f32 %v4250_v63, %v6163_v25  ;;  %v3294_v41 = vpop.permute.xlu1 %3293  ;;  %vm2967_vm8 = vweird.f32 %v4250_v63 }
 0x35a   : > { %v2955_v62 = vmul.f32 %v4248_v24, %v2954_v33  ;;  %v3327_v37 = vadd.f32 %v3294_v41, %v3159_v43  ;;  %vm2968_vm10 = vmor %vm2966_vm9, %vm2967_vm8 }
 0x35b   : > { %v2909_v31 = vsel %vm2908_vm4, %v4246_v26, %v2905_v1  ;;  %v3370_v21 = vadd.f32 %v3346_v9, %v3322_v46  ;;  %v2962_v7 = vmul.f32 %v4250_v63, %v2961_v34 }
 0x35c   : > { %v2987_v32 = vmul.f32 %v2909_v31, %v2699_v19  ;;  %v2959_v59 = vsel %vm2958_vm7, %v4248_v24, %v2955_v62  ;;  %v3375_v26 = vadd.f32 %v3351_v16, %v3327_v37 }
 0x35d   : > { %3394 = vst.msk [vmem:[%s4331_s20 + $0x80] sm:$0xff] %vm2393_vm5, %v3370_v21  ;;  %v2992_v38 = vmul.f32 %v2959_v59, %v2704_v4  ;;  %v2963_v49 = vmul.f32 0.5, %v2962_v7 }
 0x35e   : > { %v3155_v28 = vmul.f32 %v6354_v2, %v2987_v32  ;;  %3399 = vst.msk [vmem:[%s4331_s20 + $0xa8] sm:$0xff] %vm2393_vm5, %v3375_v26 }
 0x35f   : > { %v3160_v15 = vmul.f32 %v6356_v47, %v2992_v38  ;;  %v2964_v0 = vsub.f32 1.5, %v2963_v49 }
 0x360   : > { %v3323_v36 = vadd.f32 %v6355_v17, %v3155_v28 }
 0x361   : > { %v3328_v40 = vadd.f32 %v3299_v58, %v3160_v15  ;;  %v2965_v24 = vmul.f32 %v4250_v63, %v2964_v0 }
 0x362   : > { %v3371_v56 = vadd.f32 %v3347_v52, %v3323_v36 }
 0x363   : > { %v3376_v18 = vadd.f32 %v3352_v23, %v3328_v40  ;;  %v2969_v45 = vsel %vm2968_vm10, %v4250_v63, %v2965_v24 }
 0x364   : > { %3395 = vst.msk [vmem:[%s4331_s20 + $0x88] sm:$0xff] %vm2393_vm5, %v3371_v56  ;;  %v2993_v14 = vmul.f32 %v2969_v45, %v2705_v35 }
 0x365   : > { %3400 = vst.msk [vmem:[%s4331_s20 + $0xb0] sm:$0xff] %vm2393_vm5, %v3376_v18 }
 0x366   : > { %v3161_v55 = vmul.f32 %v6357_v27, %v2993_v14 }
 0x368   : > { %v3329_v60 = vadd.f32 %v3304_v54, %v3161_v55 }
 0x36a   : > { %v3377_v10 = vadd.f32 %v3353_v11, %v3329_v60 }
 0x36c   : > { %3401 = vst.msk [vmem:[%s4331_s20 + $0xb8] sm:$0xff] %vm2393_vm5, %v3377_v10 }
 0x36d PF: > { %s17_s24 = sadd.s32 1, %s4257_s24  }
 0x36e   : > { %p14_p5 = scmp.ge.s32.totalorder %s17_s24, 4  }
 0x370   :  { %16 = sbr.rel (!%p14_p5) target bundleno = 1 (0x1), region = 91 }

</bundles_post_ra>
